<compile_context>
chip_gen: v7x
topology: tpu7x:2x2x1
jax: 0.10.0
libtpu: 0.0.40
codegen_flags: <defaults>
</compile_context>

<pallas_src>
import functools

import jax
import jax.numpy as jnp
from jax import lax
from jax.experimental import pallas as pl
from jax.experimental.pallas import tpu as pltpu


def _pad_hw1(t, H, W, C):
    """Zero-pad an (H, W, C) register value by 1 on both spatial dims."""
    zcol = jnp.zeros((H, 1, C), jnp.float32)
    zrow = jnp.zeros((1, W + 2, C), jnp.float32)
    t = jnp.concatenate([zcol, t, zcol], axis=1)      # (H, W+2, C)
    return jnp.concatenate([zrow, t, zrow], axis=0)   # (H+2, W+2, C)


def _im2col_3x3(tp, H, W, C):
    """(H+2, W+2, C) padded -> (H*W, 9*C) patch matrix (tap-major, channel-minor)."""
    taps = [tp[dh:dh + H, dw:dw + W, :] for dh in range(3) for dw in range(3)]
    return jnp.concatenate(taps, axis=-1).reshape(H * W, 9 * C)


def basic_block_kernel(x_ref, w1_ref, s1_ref, b1_ref, w2_ref, s2_ref, b2_ref,
                       o_ref, *, H, W, Cin, Cout):
    """One batch element per grid step.

    x_ref  : (1, H, W, Cin)      unpadded input (NHWC)
    w1_ref : (9*Cin, Cout)       conv1 weights, taps flattened into K
    s1_ref : (1, Cout)           folded BN1 scale
    b1_ref : (1, Cout)           folded BN1 bias
    w2_ref : (9*Cout, Cout)      conv2 weights, taps flattened into K
    s2_ref : (1, Cout)           folded BN2 scale
    b2_ref : (1, Cout)           folded BN2 bias
    o_ref  : (1, H, W, Cout)     output (NHWC)
    """
    x = x_ref[0].astype(jnp.float32)                               # (H, W, Cin)

    # ---- conv1: single MXU contraction with K = 9*Cin ----
    p1 = _im2col_3x3(_pad_hw1(x, H, W, Cin), H, W, Cin)            # (H*W, 9*Cin)
    out1 = jnp.dot(p1, w1_ref[...], preferred_element_type=jnp.float32)
    # ---- bn1 (folded) + relu ----
    out1 = jnp.maximum(out1 * s1_ref[...] + b1_ref[...], 0.0)      # (H*W, Cout)

    # ---- conv2 on the register-resident intermediate (no scratch round trip) ----
    p2 = _im2col_3x3(_pad_hw1(out1.reshape(H, W, Cout), H, W, Cout), H, W, Cout)
    out2 = jnp.dot(p2, w2_ref[...], preferred_element_type=jnp.float32)
    # ---- bn2 (folded) ----
    out2 = out2 * s2_ref[...] + b2_ref[...]                        # (H*W, Cout)

    # ---- residual add (downsample=None => identity = x) + relu ----
    res = jnp.maximum(out2 + x.reshape(H * W, Cin), 0.0)
    o_ref[0] = res.reshape(H, W, Cout).astype(o_ref.dtype)


def basic_block_pallas(x_nchw, w1_oihw, bn1, w2_oihw, bn2, eps=1e-5):
    """x_nchw: (N, C, H, W) float32. Returns (N, C, H, W) float32."""
    N, Cin, H, W = x_nchw.shape
    Cout = w1_oihw.shape[0]
    assert Cin == Cout, "identity residual requires in_channel == out_channel"

    # --- glue: layout conversion + weight flattening + BN folding (plain JAX) ---
    x_nhwc = jnp.transpose(x_nchw, (0, 2, 3, 1)).astype(jnp.float32)   # NCHW -> NHWC
    # OIHW -> HWIO -> (9*C, Cout); row order (dh, dw, ci) matches the kernel's
    # im2col tap/channel concatenation order.
    w1_flat = jnp.transpose(w1_oihw, (2, 3, 1, 0)).reshape(9 * Cin, Cout).astype(jnp.float32)
    w2_flat = jnp.transpose(w2_oihw, (2, 3, 1, 0)).reshape(9 * Cout, Cout).astype(jnp.float32)

    def fold(bn):
        g, b, mean, var = bn
        scale = g / jnp.sqrt(var + eps)
        bias = b - mean * scale
        return (scale.reshape(1, -1).astype(jnp.float32),
                bias.reshape(1, -1).astype(jnp.float32))

    s1, b1 = fold(bn1)
    s2, b2 = fold(bn2)

    kernel = functools.partial(basic_block_kernel, H=H, W=W, Cin=Cin, Cout=Cout)

    out_nhwc = pl.pallas_call(
        kernel,
        out_shape=jax.ShapeDtypeStruct((N, H, W, Cout), jnp.float32),
        grid_spec=pltpu.PrefetchScalarGridSpec(
            num_scalar_prefetch=0,
            grid=(N,),
            in_specs=[
                pl.BlockSpec((1, H, W, Cin), lambda n: (n, 0, 0, 0)),
                pl.BlockSpec((9 * Cin, Cout), lambda n: (0, 0)),
                pl.BlockSpec((1, Cout), lambda n: (0, 0)),
                pl.BlockSpec((1, Cout), lambda n: (0, 0)),
                pl.BlockSpec((9 * Cout, Cout), lambda n: (0, 0)),
                pl.BlockSpec((1, Cout), lambda n: (0, 0)),
                pl.BlockSpec((1, Cout), lambda n: (0, 0)),
            ],
            out_specs=pl.BlockSpec((1, H, W, Cout), lambda n: (n, 0, 0, 0)),
        ),
        compiler_params=pltpu.CompilerParams(
            dimension_semantics=("parallel",),
            vmem_limit_bytes=32 * 1024 * 1024,   # explicit, safe on v5e/v6e/v7x
        ),
    )(x_nhwc, w1_flat, s1, b1, w2_flat, s2, b2)

    return jnp.transpose(out_nhwc, (0, 3, 1, 2))  # NHWC -> NCHW


# --- pure-JAX reference (NCHW, matches PyTorch eval-mode semantics) ---
def basic_block_ref(x, w1, bn1, w2, bn2, eps=1e-5):
    def conv(x, w):
        return lax.conv_general_dilated(
            x, w, window_strides=(1, 1), padding=((1, 1), (1, 1)),
            dimension_numbers=("NCHW", "OIHW", "NCHW"))

    def bn(x, p):
        g, b, mean, var = p
        g, b, mean, var = (t[None, :, None, None] for t in (g, b, mean, var))
        return (x - mean) / jnp.sqrt(var + eps) * g + b

    out = jax.nn.relu(bn(conv(x, w1), bn1))
    out = bn(conv(out, w2), bn2)
    return jax.nn.relu(out + x)


if __name__ == "__main__":
    key = jax.random.PRNGKey(0)
    ks = jax.random.split(key, 10)

    N, C, H, W = 2, 4, 16, 16  # in_channel == out_channel, stride=1, downsample=None

    x = jax.random.normal(ks[0], (N, C, H, W), jnp.float32)

    # conv weights in OIHW (PyTorch convention), deterministic init
    w1 = jax.random.normal(ks[1], (C, C, 3, 3), jnp.float32) * 0.1
    w2 = jax.random.normal(ks[2], (C, C, 3, 3), jnp.float32) * 0.1

    # BatchNorm parameters (eval mode): gamma, beta, running_mean, running_var
    bn1 = (1.0 + 0.1 * jax.random.normal(ks[3], (C,), jnp.float32),
           0.1 * jax.random.normal(ks[4], (C,), jnp.float32),
           0.1 * jax.random.normal(ks[5], (C,), jnp.float32),
           1.0 + 0.1 * jax.random.uniform(ks[6], (C,), jnp.float32))
    bn2 = (1.0 + 0.1 * jax.random.normal(ks[7], (C,), jnp.float32),
           0.1 * jax.random.normal(ks[8], (C,), jnp.float32),
           0.1 * jax.random.normal(ks[9], (C,), jnp.float32),
           1.0 + 0.1 * jax.random.uniform(ks[0], (C,), jnp.float32))

    out = basic_block_pallas(x, w1, bn1, w2, bn2)
    out = jax.block_until_ready(out)

    ref = basic_block_ref(x, w1, bn1, w2, bn2)
    assert out.shape == (N, C, H, W), out.shape
    assert jnp.allclose(out, ref, atol=1e-4, rtol=1e-4), float(jnp.max(jnp.abs(out - ref)))

    print("KERNEL_OK")
</pallas_src>

<mosaic_0001>
module attributes {stable_mosaic.version = 11 : i64} {
  func.func @basic_block_kernel(%arg0: i32, %arg1: memref<1x16x16x4xf32, #tpu.memory_space<vmem>>, %arg2: memref<36x4xf32, #tpu.memory_space<vmem>>, %arg3: memref<1x4xf32, #tpu.memory_space<vmem>>, %arg4: memref<1x4xf32, #tpu.memory_space<vmem>>, %arg5: memref<36x4xf32, #tpu.memory_space<vmem>>, %arg6: memref<1x4xf32, #tpu.memory_space<vmem>>, %arg7: memref<1x4xf32, #tpu.memory_space<vmem>>, %arg8: memref<1x16x16x4xf32, #tpu.memory_space<vmem>>) attributes {dimension_semantics = [#tpu.dimension_semantics<parallel>], iteration_bounds = array<i64: 2>, scalar_prefetch = 0 : i64, scratch_operands = 0 : i64, tpu.core_type = #tpu.core_type<tc>, window_params = [{transform_indices = @transform_0, window_bounds = array<i64: 1, 16, 16, 4>}, {pipeline_mode = #tpu.pipeline_mode<synchronous>, transform_indices = @transform_1, window_bounds = array<i64: 36, 4>}, {pipeline_mode = #tpu.pipeline_mode<synchronous>, transform_indices = @transform_2, window_bounds = array<i64: 1, 4>}, {pipeline_mode = #tpu.pipeline_mode<synchronous>, transform_indices = @transform_3, window_bounds = array<i64: 1, 4>}, {pipeline_mode = #tpu.pipeline_mode<synchronous>, transform_indices = @transform_4, window_bounds = array<i64: 36, 4>}, {pipeline_mode = #tpu.pipeline_mode<synchronous>, transform_indices = @transform_5, window_bounds = array<i64: 1, 4>}, {pipeline_mode = #tpu.pipeline_mode<synchronous>, transform_indices = @transform_6, window_bounds = array<i64: 1, 4>}, {transform_indices = @transform_7, window_bounds = array<i64: 1, 16, 16, 4>}]} {
    %c0 = arith.constant 0 : index
    %c0_0 = arith.constant 0 : index
    %c0_1 = arith.constant 0 : index
    %c0_2 = arith.constant 0 : index
    %0 = vector.load %arg1[%c0, %c0_0, %c0_1, %c0_2] : memref<1x16x16x4xf32, #tpu.memory_space<vmem>>, vector<1x16x16x4xf32>
    %1 = vector.shape_cast %0 : vector<1x16x16x4xf32> to vector<16x16x4xf32>
    %cst = arith.constant 0.000000e+00 : f32
    %2 = vector.broadcast %cst : f32 to vector<16x1x4xf32>
    %cst_3 = arith.constant 0.000000e+00 : f32
    %3 = vector.broadcast %cst_3 : f32 to vector<1x18x4xf32>
    %4 = tpu.concatenate %2, %1, %2 in 1 : vector<16x1x4xf32>, vector<16x16x4xf32>, vector<16x1x4xf32> -> vector<16x18x4xf32>
    %5 = tpu.concatenate %3, %4, %3 in 0 : vector<1x18x4xf32>, vector<16x18x4xf32>, vector<1x18x4xf32> -> vector<18x18x4xf32>
    %6 = vector.extract_strided_slice %5 {offsets = [0, 0, 0], sizes = [16, 16, 4], strides = [1, 1, 1]} : vector<18x18x4xf32> to vector<16x16x4xf32>
    %7 = vector.extract_strided_slice %5 {offsets = [0, 1, 0], sizes = [16, 16, 4], strides = [1, 1, 1]} : vector<18x18x4xf32> to vector<16x16x4xf32>
    %8 = vector.extract_strided_slice %5 {offsets = [0, 2, 0], sizes = [16, 16, 4], strides = [1, 1, 1]} : vector<18x18x4xf32> to vector<16x16x4xf32>
    %9 = vector.extract_strided_slice %5 {offsets = [1, 0, 0], sizes = [16, 16, 4], strides = [1, 1, 1]} : vector<18x18x4xf32> to vector<16x16x4xf32>
    %10 = vector.extract_strided_slice %5 {offsets = [1, 1, 0], sizes = [16, 16, 4], strides = [1, 1, 1]} : vector<18x18x4xf32> to vector<16x16x4xf32>
    %11 = vector.extract_strided_slice %5 {offsets = [1, 2, 0], sizes = [16, 16, 4], strides = [1, 1, 1]} : vector<18x18x4xf32> to vector<16x16x4xf32>
    %12 = vector.extract_strided_slice %5 {offsets = [2, 0, 0], sizes = [16, 16, 4], strides = [1, 1, 1]} : vector<18x18x4xf32> to vector<16x16x4xf32>
    %13 = vector.extract_strided_slice %5 {offsets = [2, 1, 0], sizes = [16, 16, 4], strides = [1, 1, 1]} : vector<18x18x4xf32> to vector<16x16x4xf32>
    %14 = vector.extract_strided_slice %5 {offsets = [2, 2, 0], sizes = [16, 16, 4], strides = [1, 1, 1]} : vector<18x18x4xf32> to vector<16x16x4xf32>
    %15 = tpu.concatenate %6, %7, %8, %9, %10, %11, %12, %13, %14 in 2 : vector<16x16x4xf32>, vector<16x16x4xf32>, vector<16x16x4xf32>, vector<16x16x4xf32>, vector<16x16x4xf32>, vector<16x16x4xf32>, vector<16x16x4xf32>, vector<16x16x4xf32>, vector<16x16x4xf32> -> vector<16x16x36xf32>
    %16 = vector.shape_cast %15 : vector<16x16x36xf32> to vector<256x36xf32>
    %c0_4 = arith.constant 0 : index
    %c0_5 = arith.constant 0 : index
    %17 = vector.load %arg2[%c0_4, %c0_5] : memref<36x4xf32, #tpu.memory_space<vmem>>, vector<36x4xf32>
    %cst_6 = arith.constant dense<0.000000e+00> : vector<256x4xf32>
    %18 = tpu.matmul %16, %17, %cst_6 {dimension_numbers = #tpu.dot_dimension_numbers<[1], [0], [0], [1], [0, 0, 1, 1], [], []>} : vector<256x36xf32>, vector<36x4xf32>, vector<256x4xf32> -> vector<256x4xf32>
    %c0_7 = arith.constant 0 : index
    %c0_8 = arith.constant 0 : index
    %19 = vector.load %arg3[%c0_7, %c0_8] : memref<1x4xf32, #tpu.memory_space<vmem>>, vector<1x4xf32>
    %20 = vector.broadcast %19 : vector<1x4xf32> to vector<256x4xf32>
    %21 = arith.mulf %18, %20 : vector<256x4xf32>
    %c0_9 = arith.constant 0 : index
    %c0_10 = arith.constant 0 : index
    %22 = vector.load %arg4[%c0_9, %c0_10] : memref<1x4xf32, #tpu.memory_space<vmem>>, vector<1x4xf32>
    %23 = vector.broadcast %22 : vector<1x4xf32> to vector<256x4xf32>
    %24 = arith.addf %21, %23 : vector<256x4xf32>
    %cst_11 = arith.constant 0.000000e+00 : f32
    %25 = vector.broadcast %cst_11 : f32 to vector<256x4xf32>
    %26 = arith.maximumf %24, %25 : vector<256x4xf32>
    %27 = vector.shape_cast %26 : vector<256x4xf32> to vector<16x16x4xf32>
    %cst_12 = arith.constant 0.000000e+00 : f32
    %28 = vector.broadcast %cst_12 : f32 to vector<16x1x4xf32>
    %cst_13 = arith.constant 0.000000e+00 : f32
    %29 = vector.broadcast %cst_13 : f32 to vector<1x18x4xf32>
    %30 = tpu.concatenate %28, %27, %28 in 1 : vector<16x1x4xf32>, vector<16x16x4xf32>, vector<16x1x4xf32> -> vector<16x18x4xf32>
    %31 = tpu.concatenate %29, %30, %29 in 0 : vector<1x18x4xf32>, vector<16x18x4xf32>, vector<1x18x4xf32> -> vector<18x18x4xf32>
    %32 = vector.extract_strided_slice %31 {offsets = [0, 0, 0], sizes = [16, 16, 4], strides = [1, 1, 1]} : vector<18x18x4xf32> to vector<16x16x4xf32>
    %33 = vector.extract_strided_slice %31 {offsets = [0, 1, 0], sizes = [16, 16, 4], strides = [1, 1, 1]} : vector<18x18x4xf32> to vector<16x16x4xf32>
    %34 = vector.extract_strided_slice %31 {offsets = [0, 2, 0], sizes = [16, 16, 4], strides = [1, 1, 1]} : vector<18x18x4xf32> to vector<16x16x4xf32>
    %35 = vector.extract_strided_slice %31 {offsets = [1, 0, 0], sizes = [16, 16, 4], strides = [1, 1, 1]} : vector<18x18x4xf32> to vector<16x16x4xf32>
    %36 = vector.extract_strided_slice %31 {offsets = [1, 1, 0], sizes = [16, 16, 4], strides = [1, 1, 1]} : vector<18x18x4xf32> to vector<16x16x4xf32>
    %37 = vector.extract_strided_slice %31 {offsets = [1, 2, 0], sizes = [16, 16, 4], strides = [1, 1, 1]} : vector<18x18x4xf32> to vector<16x16x4xf32>
    %38 = vector.extract_strided_slice %31 {offsets = [2, 0, 0], sizes = [16, 16, 4], strides = [1, 1, 1]} : vector<18x18x4xf32> to vector<16x16x4xf32>
    %39 = vector.extract_strided_slice %31 {offsets = [2, 1, 0], sizes = [16, 16, 4], strides = [1, 1, 1]} : vector<18x18x4xf32> to vector<16x16x4xf32>
    %40 = vector.extract_strided_slice %31 {offsets = [2, 2, 0], sizes = [16, 16, 4], strides = [1, 1, 1]} : vector<18x18x4xf32> to vector<16x16x4xf32>
    %41 = tpu.concatenate %32, %33, %34, %35, %36, %37, %38, %39, %40 in 2 : vector<16x16x4xf32>, vector<16x16x4xf32>, vector<16x16x4xf32>, vector<16x16x4xf32>, vector<16x16x4xf32>, vector<16x16x4xf32>, vector<16x16x4xf32>, vector<16x16x4xf32>, vector<16x16x4xf32> -> vector<16x16x36xf32>
    %42 = vector.shape_cast %41 : vector<16x16x36xf32> to vector<256x36xf32>
    %c0_14 = arith.constant 0 : index
    %c0_15 = arith.constant 0 : index
    %43 = vector.load %arg5[%c0_14, %c0_15] : memref<36x4xf32, #tpu.memory_space<vmem>>, vector<36x4xf32>
    %cst_16 = arith.constant dense<0.000000e+00> : vector<256x4xf32>
    %44 = tpu.matmul %42, %43, %cst_16 {dimension_numbers = #tpu.dot_dimension_numbers<[1], [0], [0], [1], [0, 0, 1, 1], [], []>} : vector<256x36xf32>, vector<36x4xf32>, vector<256x4xf32> -> vector<256x4xf32>
    %c0_17 = arith.constant 0 : index
    %c0_18 = arith.constant 0 : index
    %45 = vector.load %arg6[%c0_17, %c0_18] : memref<1x4xf32, #tpu.memory_space<vmem>>, vector<1x4xf32>
    %46 = vector.broadcast %45 : vector<1x4xf32> to vector<256x4xf32>
    %47 = arith.mulf %44, %46 : vector<256x4xf32>
    %c0_19 = arith.constant 0 : index
    %c0_20 = arith.constant 0 : index
    %48 = vector.load %arg7[%c0_19, %c0_20] : memref<1x4xf32, #tpu.memory_space<vmem>>, vector<1x4xf32>
    %49 = vector.broadcast %48 : vector<1x4xf32> to vector<256x4xf32>
    %50 = arith.addf %47, %49 : vector<256x4xf32>
    %51 = vector.shape_cast %1 : vector<16x16x4xf32> to vector<256x4xf32>
    %52 = arith.addf %50, %51 : vector<256x4xf32>
    %cst_21 = arith.constant 0.000000e+00 : f32
    %53 = vector.broadcast %cst_21 : f32 to vector<256x4xf32>
    %54 = arith.maximumf %52, %53 : vector<256x4xf32>
    %55 = vector.shape_cast %54 : vector<256x4xf32> to vector<16x16x4xf32>
    %c0_22 = arith.constant 0 : index
    %c0_23 = arith.constant 0 : index
    %c0_24 = arith.constant 0 : index
    %c0_25 = arith.constant 0 : index
    %56 = vector.load %arg8[%c0_22, %c0_23, %c0_24, %c0_25] : memref<1x16x16x4xf32, #tpu.memory_space<vmem>>, vector<1x16x16x4xf32>
    %57 = vector.shape_cast %56 : vector<1x16x16x4xf32> to vector<16x16x4xf32>
    %58 = vector.shape_cast %55 : vector<16x16x4xf32> to vector<1x16x16x4xf32>
    tpu.vector_store %arg8[%c0_22, %c0_23, %c0_24, %c0_25], %58 {strides = array<i32>} : memref<1x16x16x4xf32, #tpu.memory_space<vmem>>, vector<1x16x16x4xf32>,
    return
  }
  func.func @transform_0(%arg0: i32) -> (i32, i32, i32, i32) {
    %c0_i32 = arith.constant 0 : i32
    %c0_i32_0 = arith.constant 0 : i32
    %c0_i32_1 = arith.constant 0 : i32
    %c0_i32_2 = arith.constant 0 : i32
    return %arg0, %c0_i32, %c0_i32_0, %c0_i32_1 : i32, i32, i32, i32
  }
  func.func @transform_1(%arg0: i32) -> (i32, i32) {
    %c0_i32 = arith.constant 0 : i32
    %c0_i32_0 = arith.constant 0 : i32
    %c0_i32_1 = arith.constant 0 : i32
    return %c0_i32, %c0_i32_0 : i32, i32
  }
  func.func @transform_2(%arg0: i32) -> (i32, i32) {
    %c0_i32 = arith.constant 0 : i32
    %c0_i32_0 = arith.constant 0 : i32
    %c0_i32_1 = arith.constant 0 : i32
    return %c0_i32, %c0_i32_0 : i32, i32
  }
  func.func @transform_3(%arg0: i32) -> (i32, i32) {
    %c0_i32 = arith.constant 0 : i32
    %c0_i32_0 = arith.constant 0 : i32
    %c0_i32_1 = arith.constant 0 : i32
    return %c0_i32, %c0_i32_0 : i32, i32
  }
  func.func @transform_4(%arg0: i32) -> (i32, i32) {
    %c0_i32 = arith.constant 0 : i32
    %c0_i32_0 = arith.constant 0 : i32
    %c0_i32_1 = arith.constant 0 : i32
    return %c0_i32, %c0_i32_0 : i32, i32
  }
  func.func @transform_5(%arg0: i32) -> (i32, i32) {
    %c0_i32 = arith.constant 0 : i32
    %c0_i32_0 = arith.constant 0 : i32
    %c0_i32_1 = arith.constant 0 : i32
    return %c0_i32, %c0_i32_0 : i32, i32
  }
  func.func @transform_6(%arg0: i32) -> (i32, i32) {
    %c0_i32 = arith.constant 0 : i32
    %c0_i32_0 = arith.constant 0 : i32
    %c0_i32_1 = arith.constant 0 : i32
    return %c0_i32, %c0_i32_0 : i32, i32
  }
  func.func @transform_7(%arg0: i32) -> (i32, i32, i32, i32) {
    %c0_i32 = arith.constant 0 : i32
    %c0_i32_0 = arith.constant 0 : i32
    %c0_i32_1 = arith.constant 0 : i32
    %c0_i32_2 = arith.constant 0 : i32
    return %arg0, %c0_i32, %c0_i32_0, %c0_i32_1 : i32, i32, i32, i32
  }
}

</mosaic_0001>

<bundles_post_ra>
// kernel: tpu_custom_call.1
= control target key start
LH: loop header
LB: loop body
LE: loop exit
PB: predicated region body
PF: predicated region fallthrough
CT: control target
= control target key end

     0   :  { %s4420_s24 = smov 0   ;;  %s8053_s0 = inlined_call_operand.vmem [shape: f32[2,16,16,4], index: 0, kind: input, shape index: {}]   ;;  %s8054_s1 = inlined_call_operand.vmem [shape: f32[36,4], index: 1, kind: input, shape index: {}]   ;;  %s8055_s2 = inlined_call_operand.vmem [shape: f32[1,4], index: 2, kind: input, shape index: {}]   ;;  %s8056_s3 = inlined_call_operand.vmem [shape: f32[1,4], index: 3, kind: input, shape index: {}]   ;;  %s8057_s4 = inlined_call_operand.vmem [shape: f32[36,4], index: 4, kind: input, shape index: {}]   ;;  %s8058_s5 = inlined_call_operand.vmem [shape: f32[1,4], index: 5, kind: input, shape index: {}]   ;;  %s8059_s6 = inlined_call_operand.vmem [shape: f32[1,4], index: 6, kind: input, shape index: {}]   ;;  %s8060_s7 = inlined_call_operand.vmem [shape: f32[2,16,16,4], index: 7, kind: output, shape index: {}]  }
   0x1 LB: > { %s4025_s25 = sadd.s32 4294967295, %s4369_s24   ;;  %p4029_p0 = scmp.ge.s32.totalorder %s4369_s24, 1  ;;  %s4369_s24 = sphi %s4420_s24, %s17_s24  }
   0x2   : > { %p237_p1 = scmp.lt.s32.totalorder %s4369_s24, 3 }
   0x4   : > { %p238_p2 = pnand %p4029_p0, %p237_p1 }
   0x6   : > { %241 = sbr.rel (%p238_p2) target bundleno = 1632 (0x660), region = 48 }
   0xd   : > { %p269_p3 = scmp.lt.s32.totalorder %s4025_s25, 1  ;;  %v8061_v0 = vmov 0.0   ;;  %s4372_s26 = smov 4   ;;  %vm343_vm0 = vcmask 1040384   ;;  %vm502_vm1 = vcmask 1046528   ;;  %vm673_vm2 = vcmask 1045504  }
   0xe   : > { %v4429_v1 = vrot.slane %v8061_v0, 1  ;;  %s4373_s8 = smov 8   ;;  %s4374_s9 = smov 12   ;;  %vm1787_vm3 = vcmask 1043456   ;;  %vm1423_vm4 = vcmask 31744   ;;  %vm1455_vm5 = vcmask 64512  }
   0xf   : > { %s8944_s25 = smov (!%p269_p3, %s4025_s25), 1  ;;  %s4375_s10 = smov 16   ;;  %vm1487_vm6 = vcmask 97280   ;;  %vm1520_vm7 = vcmask 130048   ;;  %vm1553_vm8 = vcmask 162816   ;;  %vm1586_vm9 = vcmask 195584  }
  0x10   : > { %8279 = vst [vmem:[#allocation2_spill] sm:$0xff] %v4429_v1  ;;  %580 = vrot.lane.b32.xlu0 %v4429_v1, %s4372_s26  ;;  %s4106_s27 = sshll.u32 %s8944_s25, 8  ;;  %s4376_s11 = smov 20   ;;  %vm1619_vm10 = vcmask 228352   ;;  %vm1652_vm11 = vcmask 261120   ;;  %vm1690_vm12 = vcmask 293888  }
  0x11   : > { %s4441_s30 = scalar_lea.vmem %s8053_s0, %s4106_s27  ;;  %s4377_s12 = smov 24  }
  0x12   : > { %v279_v2 = vld [vmem:[%s4441_s30] sm:$0xff]  ;;  %v280_v3 = vld [vmem:[%s4441_s30 + $0x8] sm:$0xff]  ;;  %v281_v4 = vld [vmem:[%s4441_s30 + $0x10] sm:$0xff]  ;;  %s4378_s23 = smov 28   ;;  %s4379_s28 = smov 32  }
  0x13   : > { %v344_v5 = vrot.slane %v279_v2, 7  ;;  %v345_v6 = vrot.slane %v280_v3, 7  ;;  %v282_v7 = vld [vmem:[%s4441_s30 + $0x18] sm:$0xff]  ;;  %v347_v8 = vrot.slane %v281_v4, 7  ;;  %v283_v9 = vld [vmem:[%s4441_s30 + $0x20] sm:$0xff]  ;;  %v284_v10 = vld [vmem:[%s4441_s30 + $0x28] sm:$0xff]  ;;  %s7752_s13 = scalar_lea.vmem %s8060_s7, %s4106_s27 }
  0x14   : > { %v348_v11 = vrot.slane %v282_v7, 7  ;;  %v350_v12 = vrot.slane %v283_v9, 7  ;;  %v351_v13 = vrot.slane %v284_v10, 7  ;;  %v285_v26 = vld [vmem:[%s4441_s30 + $0x30] sm:$0xff]  ;;  %v286_v27 = vld [vmem:[%s4441_s30 + $0x38] sm:$0xff]  ;;  %v287_v32 = vld [vmem:[%s4441_s30 + $0x40] sm:$0xff] }
  0x15   : > { %v4450_v14 = vsel %vm343_vm0, %v344_v5, %v345_v6  ;;  %v4453_v15 = vsel %vm343_vm0, %v345_v6, 0.0  ;;  %v4456_v16 = vsel %vm343_vm0, 0.0, %v344_v5  ;;  %v4459_v17 = vsel %vm343_vm0, 0.0, %v347_v8  ;;  %v288_v33 = vld [vmem:[%s4441_s30 + $0x48] sm:$0xff]  ;;  %v289_v42 = vld [vmem:[%s4441_s30 + $0x50] sm:$0xff]  ;;  %v290_v49 = vld [vmem:[%s4441_s30 + $0x58] sm:$0xff] }
  0x16   : > { %8280 = vst [vmem:[#allocation3_spill] sm:$0xff] %v4450_v14  ;;  %8281 = vst [vmem:[#allocation4_spill] sm:$0xff] %v4456_v16  ;;  %v506_v18 = vrot.slane %v4450_v14, 1  ;;  %v508_v19 = vrot.slane %v4453_v15, 1  ;;  %v505_v20 = vrot.slane %v4456_v16, 1  ;;  %v4465_v21 = vsel %vm343_vm0, %v347_v8, %v348_v11  ;;  %v291_v58 = vld [vmem:[%s4441_s30 + $0x60] sm:$0xff] }
  0x17   : > { %v510_v22 = vrot.slane %v4459_v17, 1  ;;  %v511_v23 = vrot.slane %v4465_v21, 1  ;;  %v4470_v24 = vsel %vm343_vm0, %v348_v11, 0.0  ;;  %v4473_v25 = vsel %vm343_vm0, %v350_v12, %v351_v13  ;;  %v292_v60 = vld [vmem:[%s4441_s30 + $0x68] sm:$0xff]  ;;  %v293_v3 = vld [vmem:[%s4441_s30 + $0x70] sm:$0xff]  ;;  %v294_v8 = vld [vmem:[%s4441_s30 + $0x78] sm:$0xff] }
  0x18   : > { %v4478_v28 = vsel %vm502_vm1, %v506_v18, %v508_v19  ;;  %v4481_v29 = vsel %vm502_vm1, %v505_v20, %v506_v18  ;;  %v513_v30 = vrot.slane %v4470_v24, 1  ;;  %v4485_v31 = vsel %vm343_vm0, 0.0, %v350_v12 }
  0x19   : > { %584 = vrot.lane.b32.xlu1 %v4478_v28, %s4372_s26  ;;  %582 = vrot.lane.b32.xlu0 %v4481_v29, %s4372_s26  ;;  %v4494_v34 = vsel %vm502_vm1, %v510_v22, %v511_v23  ;;  %v515_v35 = vrot.slane %v4485_v31, 1  ;;  %v516_v36 = vrot.slane %v4473_v25, 1  ;;  %v4499_v37 = vsel %vm343_vm0, %v351_v13, 0.0  ;;  %v295_v22 = vld [vmem:[%s4441_s30 + $0x80] sm:$0xff] }
  0x1a   : > { %v4502_v38 = vsel %vm502_vm1, %v511_v23, %v513_v30  ;;  %v518_v39 = vrot.slane %v4499_v37, 1  ;;  %v353_v40 = vrot.slane %v285_v26, 7  ;;  %v354_v41 = vrot.slane %v286_v27, 7 }
  0x1b   : > { %v356_v43 = vrot.slane %v287_v32, 7  ;;  %v357_v44 = vrot.slane %v288_v33, 7  ;;  %v4507_v45 = vsel %vm502_vm1, %v515_v35, %v516_v36  ;;  %v359_v53 = vrot.slane %v289_v42, 7  ;;  %v296_v32 = vld [vmem:[%s4441_s30 + $0x88] sm:$0xff] }
  0x1c   : > { %v4510_v46 = vsel %vm343_vm0, %v353_v40, %v354_v41  ;;  %v4513_v47 = vsel %vm343_vm0, 0.0, %v353_v40  ;;  %v4516_v48 = vsel %vm343_vm0, %v354_v41, 0.0  ;;  %v4524_v50 = vsel %vm502_vm1, %v516_v36, %v518_v39 }
  0x1d   : > { %586 = vrot.lane.b32.xlu1 %v4494_v34, %s4372_s26  ;;  %588 = vrot.lane.b32.xlu0 %v4502_v38, %s4372_s26  ;;  %v520_v51 = vrot.slane %v4513_v47, 1  ;;  %v4528_v52 = vsel %vm343_vm0, %v356_v43, %v357_v44  ;;  %v521_v54 = vrot.slane %v4510_v46, 1  ;;  %v523_v55 = vrot.slane %v4516_v48, 1 }
  0x1e   : > { %v4533_v56 = vsel %vm343_vm0, 0.0, %v356_v43  ;;  %v4536_v57 = vsel %vm343_vm0, %v357_v44, 0.0  ;;  %v360_v59 = vrot.slane %v290_v49, 7  ;;  %v526_v62 = vrot.slane %v4528_v52, 1 }
  0x1f   : > { %v525_v61 = vrot.slane %v4533_v56, 1  ;;  %v528_v63 = vrot.slane %v4536_v57, 1  ;;  %v362_v2 = vrot.slane %v291_v58, 7  ;;  %v4549_v4 = vsel %vm502_vm1, %v520_v51, %v521_v54  ;;  %v297_v51 = vld [vmem:[%s4441_s30 + $0x90] sm:$0xff] }
  0x20   : > { %v4552_v5 = vsel %vm502_vm1, %v521_v54, %v523_v55  ;;  %v4555_v6 = vsel %vm343_vm0, 0.0, %v359_v53  ;;  %v363_v7 = vrot.slane %v292_v60, 7  ;;  %v4559_v9 = vsel %vm343_vm0, %v359_v53, %v360_v59  ;;  %v298_v53 = vld [vmem:[%s4441_s30 + $0x98] sm:$0xff] }
  0x21   : > { %590 = vrot.lane.b32.xlu1 %v4507_v45, %s4372_s26  ;;  %592 = vrot.lane.b32.xlu0 %v4524_v50, %s4372_s26  ;;  %v4562_v10 = vsel %vm343_vm0, %v360_v59, 0.0  ;;  %v4565_v11 = vsel %vm502_vm1, %v525_v61, %v526_v62  ;;  %v365_v12 = vrot.slane %v293_v3, 7  ;;  %v4572_v13 = vsel %vm502_vm1, %v526_v62, %v528_v63 }
  0x22   : > { %8282 = vst [vmem:[#allocation5_spill] sm:$0xff] %v4565_v11  ;;  %8283 = vst [vmem:[#allocation6_spill] sm:$0xff] %v4572_v13  ;;  %v530_v18 = vrot.slane %v4555_v6, 1  ;;  %v4576_v19 = vsel %vm343_vm0, 0.0, %v362_v2  ;;  %v366_v20 = vrot.slane %v294_v8, 7  ;;  %v531_v23 = vrot.slane %v4559_v9, 1 }
  0x23   : > { %v533_v26 = vrot.slane %v4562_v10, 1  ;;  %v4582_v27 = vsel %vm343_vm0, %v362_v2, %v363_v7  ;;  %v4585_v30 = vsel %vm343_vm0, %v363_v7, 0.0  ;;  %v535_v33 = vrot.slane %v4576_v19, 1  ;;  %v299_v7 = vld [vmem:[%s4441_s30 + $0xa0] sm:$0xff]  ;;  %v300_v8 = vld [vmem:[%s4441_s30 + $0xa8] sm:$0xff] }
  0x24   : > { %v4590_v35 = vsel %vm343_vm0, 0.0, %v365_v12  ;;  %v368_v36 = vrot.slane %v295_v22, 7  ;;  %v536_v39 = vrot.slane %v4582_v27, 1  ;;  %v538_v40 = vrot.slane %v4585_v30, 1 }
  0x25   : > { %594 = vrot.lane.b32.xlu1 %v4549_v4, %s4372_s26  ;;  %596 = vrot.lane.b32.xlu0 %v4552_v5, %s4372_s26  ;;  %8284 = vst [vmem:[#allocation7_spill] sm:$0xff] %v4590_v35  ;;  %v4599_v41 = vsel %vm343_vm0, %v365_v12, %v366_v20  ;;  %v369_v42 = vrot.slane %v296_v32, 7  ;;  %v4602_v43 = vsel %vm502_vm1, %v530_v18, %v531_v23  ;;  %v4608_v49 = vsel %vm343_vm0, %v366_v20, 0.0 }
  0x26   : > { %8285 = vst [vmem:[#allocation8_spill] sm:$0xff] %v4599_v41  ;;  %8286 = vst [vmem:[#allocation9_spill] sm:$0xff] %v4602_v43  ;;  %v4605_v44 = vsel %vm502_vm1, %v531_v23, %v533_v26  ;;  %v540_v54 = vrot.slane %v4590_v35, 1  ;;  %v541_v55 = vrot.slane %v4599_v41, 1  ;;  %v4619_v58 = vsel %vm502_vm1, %v535_v33, %v536_v39  ;;  %v301_v26 = vld [vmem:[%s4441_s30 + $0xb0] sm:$0xff] }
  0x27   : > { %8287 = vst [vmem:[#allocation10_spill] sm:$0xff] %v4605_v44  ;;  %8288 = vst [vmem:[#allocation11_spill] sm:$0xff] %v4619_v58  ;;  %v4622_v59 = vsel %vm502_vm1, %v536_v39, %v538_v40  ;;  %v4625_v60 = vsel %vm343_vm0, %v368_v36, %v369_v42  ;;  %v4628_v61 = vsel %vm343_vm0, 0.0, %v368_v36  ;;  %v543_v62 = vrot.slane %v4608_v49, 1 }
  0x28   : > { %8289 = vst [vmem:[#allocation12_spill] sm:$0xff] %v4622_v59  ;;  %8290 = vst [vmem:[#allocation13_spill] sm:$0xff] %v4625_v60  ;;  %v4632_v63 = vsel %vm343_vm0, %v369_v42, 0.0  ;;  %v371_v2 = vrot.slane %v297_v51, 7  ;;  %v372_v3 = vrot.slane %v298_v53, 7  ;;  %v545_v12 = vrot.slane %v4628_v61, 1 }
  0x29   : > { %598 = vrot.lane.b32.xlu1 %v4565_v11, %s4372_s26  ;;  %600 = vrot.lane.b32.xlu0 %v4572_v13, %s4372_s26  ;;  %8291 = vst [vmem:[#allocation14_spill] sm:$0xff] %v4628_v61  ;;  %v546_v18 = vrot.slane %v4625_v60, 1  ;;  %v4643_v20 = vsel %vm502_vm1, %v540_v54, %v541_v55  ;;  %v548_v22 = vrot.slane %v4632_v63, 1  ;;  %v374_v23 = vrot.slane %v299_v7, 7  ;;  %v302_v42 = vld [vmem:[%s4441_s30 + $0xb8] sm:$0xff] }
  0x2a   : > { %8292 = vst [vmem:[#allocation15_spill] sm:$0xff] %v4643_v20  ;;  %v4648_v32 = vsel %vm502_vm1, %v541_v55, %v543_v62  ;;  %v4651_v33 = vsel %vm343_vm0, %v371_v2, %v372_v3  ;;  %v4654_v36 = vsel %vm343_vm0, 0.0, %v371_v2  ;;  %v375_v39 = vrot.slane %v300_v8, 7 }
  0x2b   : > { %8293 = vst [vmem:[#allocation16_spill] sm:$0xff] %v4648_v32  ;;  %8294 = vst [vmem:[#allocation17_spill] sm:$0xff] %v4651_v33  ;;  %v4657_v40 = vsel %vm343_vm0, %v372_v3, 0.0  ;;  %v4661_v51 = vsel %vm502_vm1, %v545_v12, %v546_v18  ;;  %v377_v53 = vrot.slane %v301_v26, 7  ;;  %v4668_v54 = vsel %vm502_vm1, %v546_v18, %v548_v22  ;;  %v303_v18 = vld [vmem:[%s4441_s30 + $0xc0] sm:$0xff]  ;;  %v304_v26 = vld [vmem:[%s4441_s30 + $0xc8] sm:$0xff] }
  0x2c   : > { %8295 = vst [vmem:[#allocation18_spill] sm:$0xff] %v4654_v36  ;;  %8296 = vst [vmem:[#allocation19_spill] sm:$0xff] %v4661_v51  ;;  %v550_v55 = vrot.slane %v4654_v36, 1  ;;  %v551_v62 = vrot.slane %v4651_v33, 1  ;;  %v4673_v2 = vsel %vm343_vm0, 0.0, %v374_v23  ;;  %v553_v3 = vrot.slane %v4657_v40, 1 }
  0x2d   : > { %602 = vrot.lane.b32.xlu1 %v4602_v43, %s4372_s26  ;;  %604 = vrot.lane.b32.xlu0 %v4605_v44, %s4372_s26  ;;  %8297 = vst [vmem:[#allocation20_spill] sm:$0xff] %v4668_v54  ;;  %8298 = vst [vmem:[#allocation21_spill] sm:$0xff] %v4673_v2  ;;  %v4677_v7 = vsel %vm343_vm0, %v374_v23, %v375_v39  ;;  %v4680_v8 = vsel %vm343_vm0, %v375_v39, 0.0  ;;  %v378_v12 = vrot.slane %v302_v42, 7  ;;  %v555_v22 = vrot.slane %v4673_v2, 1  ;;  %v308_v43 = vld [vmem:[%s4441_s30 + $0xe8] sm:$0xff] }
  0x2e   : > { %8299 = vst [vmem:[#allocation22_spill] sm:$0xff] %v4677_v7  ;;  %v4690_v0 = vsel %vm502_vm1, %v550_v55, %v551_v62  ;;  %v556_v23 = vrot.slane %v4677_v7, 1  ;;  %v558_v39 = vrot.slane %v4680_v8, 1  ;;  %v4695_v42 = vsel %vm343_vm0, 0.0, %v377_v53 }
  0x2f   : > { %8300 = vst [vmem:[#allocation23_spill] sm:$0xff] %v4690_v0  ;;  %8301 = vst [vmem:[#allocation24_spill] sm:$0xff] %v4695_v42  ;;  %v4698_v1 = vsel %vm502_vm1, %v551_v62, %v553_v3  ;;  %v381_v55 = vrot.slane %v304_v26, 7  ;;  %v387_v13 = vrot.slane %v308_v43, 7 }
  0x30   : > { %8302 = vst [vmem:[#allocation25_spill] sm:$0xff] %v4698_v1  ;;  %v4713_v62 = vsel %vm502_vm1, %v555_v22, %v556_v23 }
  0x31   : > { %606 = vrot.lane.b32.xlu1 %v4619_v58, %s4372_s26  ;;  %608 = vrot.lane.b32.xlu0 %v4622_v59, %s4372_s26  ;;  %v306_v59 = vld [vmem:[%s4441_s30 + $0xd8] sm:$0xff]  ;;  %8304 = vst [vmem:[#allocation27_spill] sm:$0xff] %v4713_v62  ;;  %v4728_v22 = vsel %vm343_vm0, %v381_v55, 0.0 }
  0x35   : > { %610 = vrot.lane.b32.xlu1 %v4643_v20, %s4372_s26  ;;  %612 = vrot.lane.b32.xlu0 %v4648_v32, %s4372_s26  ;;  %v4701_v32 = vsel %vm343_vm0, %v377_v53, %v378_v12  ;;  %v305_v20 = vld [vmem:[%s4441_s30 + $0xd0] sm:$0xff]  ;;  %v560_v53 = vrot.slane %v4695_v42, 1 }
  0x36   : > { %8303 = vst [vmem:[#allocation26_spill] sm:$0xff] %v4701_v32  ;;  %v561_v3 = vrot.slane %v4701_v32, 1  ;;  %v383_v58 = vrot.slane %v305_v20, 7 }
  0x39   : > { %614 = vrot.lane.b32.xlu1 %v4661_v51, %s4372_s26  ;;  %616 = vrot.lane.b32.xlu0 %v4668_v54, %s4372_s26  ;;  %v4704_v51 = vsel %vm343_vm0, %v378_v12, 0.0  ;;  %v380_v54 = vrot.slane %v303_v18, 7  ;;  %v4719_v18 = vsel %vm502_vm1, %v556_v23, %v558_v39  ;;  %v4737_v23 = vsel %vm502_vm1, %v560_v53, %v561_v3 }
  0x3a   : > { %v563_v12 = vrot.slane %v4704_v51, 1  ;;  %8305 = vst [vmem:[#allocation28_spill] sm:$0xff] %v4719_v18  ;;  %8308 = vst [vmem:[#allocation31_spill] sm:$0xff] %v4737_v23  ;;  %v568_v39 = vrot.slane %v4728_v22, 1 }
  0x3b   : > { %v4722_v26 = vsel %vm343_vm0, 0.0, %v380_v54  ;;  %v4725_v44 = vsel %vm343_vm0, %v380_v54, %v381_v55 }
  0x3c   : > { %8306 = vst [vmem:[#allocation29_spill] sm:$0xff] %v4722_v26  ;;  %8307 = vst [vmem:[#allocation30_spill] sm:$0xff] %v4725_v44  ;;  %v4740_v20 = vsel %vm502_vm1, %v561_v3, %v563_v12  ;;  %v566_v54 = vrot.slane %v4725_v44, 1 }
  0x3d   : > { %618 = vrot.lane.b32.xlu1 %v4690_v0, %s4372_s26  ;;  %620 = vrot.lane.b32.xlu0 %v4698_v1, %s4372_s26  ;;  %v384_v0 = vrot.slane %v306_v59, 7  ;;  %v307_v1 = vld [vmem:[%s4441_s30 + $0xe0] sm:$0xff]  ;;  %8309 = vst [vmem:[#allocation32_spill] sm:$0xff] %v4740_v20  ;;  %v565_v59 = vrot.slane %v4722_v26, 1 }
  0x3e   : > { %v386_v53 = vrot.slane %v307_v1, 7 }
  0x3f   : > { %v4746_v55 = vsel %vm343_vm0, %v383_v58, %v384_v0  ;;  %v4761_v11 = vsel %vm502_vm1, %v565_v59, %v566_v54 }
  0x40   : > { %8310 = vst [vmem:[#allocation33_spill] sm:$0xff] %v4746_v55  ;;  %v571_v12 = vrot.slane %v4746_v55, 1  ;;  %8312 = vst [vmem:[#allocation35_spill] sm:$0xff] %v4761_v11  ;;  %v4768_v1 = vsel %vm343_vm0, %v386_v53, %v387_v13  ;;  %v4771_v43 = vsel %vm343_vm0, 0.0, %v386_v53 }
  0x41   : > { %622 = vrot.lane.b32.xlu1 %v4713_v62, %s4372_s26  ;;  %624 = vrot.lane.b32.xlu0 %v4719_v18, %s4372_s26  ;;  %v4749_v62 = vsel %vm343_vm0, 0.0, %v383_v58  ;;  %v4752_v18 = vsel %vm343_vm0, %v384_v0, 0.0  ;;  %v4764_v58 = vsel %vm502_vm1, %v566_v54, %v568_v39  ;;  %8314 = vst [vmem:[#allocation37_spill] sm:$0xff] %v4768_v1  ;;  %8315 = vst [vmem:[#allocation38_spill] sm:$0xff] %v4771_v43  ;;  %v575_v39 = vrot.slane %v4771_v43, 1 }
  0x42   : > { %8311 = vst [vmem:[#allocation34_spill] sm:$0xff] %v4749_v62  ;;  %v570_v3 = vrot.slane %v4749_v62, 1  ;;  %8313 = vst [vmem:[#allocation36_spill] sm:$0xff] %v4764_v58  ;;  %v573_v0 = vrot.slane %v4752_v18, 1  ;;  %v576_v53 = vrot.slane %v4768_v1, 1 }
  0x44   : > { %v4781_v59 = vsel %vm502_vm1, %v570_v3, %v571_v12  ;;  %v4784_v54 = vsel %vm502_vm1, %v571_v12, %v573_v0  ;;  %v676_v12 = vrot.slane %v4456_v16, 2  ;;  %v677_v0 = vrot.slane %v4450_v14, 2 }
  0x45   : > { %626 = vrot.lane.b32.xlu1 %v4737_v23, %s4372_s26  ;;  %628 = vrot.lane.b32.xlu0 %v4740_v20, %s4372_s26  ;;  %v4774_v20 = vsel %vm343_vm0, %v387_v13, 0.0  ;;  %8316 = vst [vmem:[#allocation39_spill] sm:$0xff] %v4781_v59  ;;  %8317 = vst [vmem:[#allocation40_spill] sm:$0xff] %v4784_v54  ;;  %v4794_v13 = vsel %vm502_vm1, %v575_v39, %v576_v53  ;;  %v679_v39 = vrot.slane %v4453_v15, 2  ;;  %v684_v15 = vrot.slane %v4470_v24, 2 }
  0x46   : > { %v578_v23 = vrot.slane %v4774_v20, 1  ;;  %8318 = vst [vmem:[#allocation41_spill] sm:$0xff] %v4794_v13  ;;  %v691_v24 = vrot.slane %v4513_v47, 2 }
  0x48   : > { %v4797_v3 = vsel %vm502_vm1, %v576_v53, %v578_v23  ;;  %v681_v23 = vrot.slane %v4459_v17, 2  ;;  %v682_v53 = vrot.slane %v4465_v21, 2 }
  0x49   : > { %630 = vrot.lane.b32.xlu1 %v4761_v11, %s4372_s26  ;;  %632 = vrot.lane.b32.xlu0 %v4764_v58, %s4372_s26  ;;  %8319 = vst [vmem:[#allocation42_spill] sm:$0xff] %v4797_v3 }
  0x4d   : > { %634 = vrot.lane.b32.xlu1 %v4781_v59, %s4372_s26  ;;  %636 = vrot.lane.b32.xlu0 %v4784_v54, %s4372_s26  ;;  %v8320_v59 = vmov 0.0   ;;  %v4810_v54 = vsel %vm673_vm2, %v676_v12, %v677_v0  ;;  %v686_v12 = vrot.slane %v4485_v31, 2 }
  0x4e   : > { %v4806_v58 = vrot.slane %v8320_v59, 2  ;;  %v4822_v59 = vsel %vm673_vm2, %v681_v23, %v682_v53  ;;  %v692_v23 = vrot.slane %v4510_v46, 2 }
  0x4f   : > { %8322 = vst [vmem:[#allocation44_spill] sm:$0xff] %v4822_v59 }
  0x50   : > { %8321 = vst [vmem:[#allocation43_spill] sm:$0xff] %v4806_v58 }
  0x51   : > { %638 = vrot.lane.b32.xlu1 %v4794_v13, %s4372_s26  ;;  %640 = vrot.lane.b32.xlu0 %v4797_v3, %s4372_s26  ;;  %v4819_v3 = vsel %vm673_vm2, %v677_v0, %v679_v39  ;;  %v687_v13 = vrot.slane %v4473_v25, 2  ;;  %v4833_v0 = vsel %vm673_vm2, %v682_v53, %v684_v15  ;;  %v694_v53 = vrot.slane %v4516_v48, 2 }
  0x52   : > { %v696_v15 = vrot.slane %v4533_v56, 2  ;;  %v701_v48 = vrot.slane %v4555_v6, 2 }
  0x53   : > { %v4836_v39 = vsel %vm673_vm2, %v686_v12, %v687_v13  ;;  %v697_v12 = vrot.slane %v4528_v52, 2 }
  0x54   : > { %8323 = vst [vmem:[#allocation45_spill] sm:$0xff] %v4836_v39 }
  0x55   : > { %751 = vrot.lane.b32.xlu1 %v4806_v58, %s4373_s8  ;;  %753 = vrot.lane.b32.xlu0 %v4810_v54, %s4373_s8  ;;  %v689_v58 = vrot.slane %v4499_v37, 2  ;;  %v4848_v37 = vsel %vm673_vm2, %v691_v24, %v692_v23  ;;  %v702_v24 = vrot.slane %v4559_v9, 2 }
  0x56   : > { %8324 = vst [vmem:[#allocation46_spill] sm:$0xff] %v4848_v37 }
  0x59   : > { %755 = vrot.lane.b32.xlu1 %v4819_v3, %s4373_s8  ;;  %757 = vrot.lane.b32.xlu0 %v4822_v59, %s4373_s8  ;;  %v4845_v59 = vsel %vm673_vm2, %v687_v13, %v689_v58  ;;  %v4859_v58 = vsel %vm673_vm2, %v692_v23, %v694_v53  ;;  %v4862_v13 = vsel %vm673_vm2, %v696_v15, %v697_v12  ;;  %v706_v53 = vrot.slane %v4576_v19, 2 }
  0x5a   : > { %8325 = vst [vmem:[#allocation47_spill] sm:$0xff] %v4862_v13  ;;  %v4875_v23 = vsel %vm673_vm2, %v701_v48, %v702_v24  ;;  %v707_v15 = vrot.slane %v4582_v27, 2  ;;  %v712_v48 = vrot.slane %v4599_v41, 2 }
  0x5b   : > { %8326 = vst [vmem:[#allocation48_spill] sm:$0xff] %v4875_v23 }
  0x5d   : > { %759 = vrot.lane.b32.xlu1 %v4833_v0, %s4373_s8  ;;  %761 = vrot.lane.b32.xlu0 %v4836_v39, %s4373_s8  ;;  %v699_v39 = vrot.slane %v4536_v57, 2 }
  0x5f   : > { %v4872_v57 = vsel %vm673_vm2, %v697_v12, %v699_v39  ;;  %v4888_v39 = vsel %vm673_vm2, %v706_v53, %v707_v15  ;;  %v711_v12 = vrot.slane %v4590_v35, 2  ;;  %v717_v53 = vrot.slane %v4625_v60, 2 }
  0x60   : > { %8327 = vst [vmem:[#allocation49_spill] sm:$0xff] %v4888_v39 }
  0x61   : > { %763 = vrot.lane.b32.xlu1 %v4845_v59, %s4373_s8  ;;  %765 = vrot.lane.b32.xlu0 %v4848_v37, %s4373_s8  ;;  %v704_v37 = vrot.slane %v4562_v10, 2 }
  0x63   : > { %v4885_v10 = vsel %vm673_vm2, %v702_v24, %v704_v37  ;;  %v4901_v37 = vsel %vm673_vm2, %v711_v12, %v712_v48  ;;  %v716_v24 = vrot.slane %v4628_v61, 2  ;;  %v722_v12 = vrot.slane %v4651_v33, 2 }
  0x64   : > { %8328 = vst [vmem:[#allocation50_spill] sm:$0xff] %v4901_v37 }
  0x65   : > { %767 = vrot.lane.b32.xlu1 %v4859_v58, %s4373_s8  ;;  %769 = vrot.lane.b32.xlu0 %v4862_v13, %s4373_s8  ;;  %v709_v13 = vrot.slane %v4585_v30, 2 }
  0x67   : > { %v4898_v30 = vsel %vm673_vm2, %v707_v15, %v709_v13  ;;  %v719_v13 = vrot.slane %v4632_v63, 2  ;;  %v721_v15 = vrot.slane %v4654_v36, 2  ;;  %v726_v63 = vrot.slane %v4673_v2, 2 }
  0x69   : > { %771 = vrot.lane.b32.xlu1 %v4872_v57, %s4373_s8  ;;  %773 = vrot.lane.b32.xlu0 %v4875_v23, %s4373_s8  ;;  %v714_v23 = vrot.slane %v4608_v49, 2  ;;  %v4913_v49 = vsel %vm673_vm2, %v716_v24, %v717_v53  ;;  %v727_v24 = vrot.slane %v4677_v7, 2 }
  0x6a   : > { %8329 = vst [vmem:[#allocation51_spill] sm:$0xff] %v4913_v49 }
  0x6d   : > { %775 = vrot.lane.b32.xlu1 %v4885_v10, %s4373_s8  ;;  %777 = vrot.lane.b32.xlu0 %v4888_v39, %s4373_s8  ;;  %v4910_v39 = vsel %vm673_vm2, %v712_v48, %v714_v23  ;;  %v4924_v23 = vsel %vm673_vm2, %v717_v53, %v719_v13  ;;  %v4927_v48 = vsel %vm673_vm2, %v721_v15, %v722_v12  ;;  %v731_v13 = vrot.slane %v4695_v42, 2 }
  0x6e   : > { %8330 = vst [vmem:[#allocation52_spill] sm:$0xff] %v4924_v23  ;;  %8331 = vst [vmem:[#allocation53_spill] sm:$0xff] %v4927_v48  ;;  %v4940_v53 = vsel %vm673_vm2, %v726_v63, %v727_v24  ;;  %v732_v15 = vrot.slane %v4701_v32, 2  ;;  %v737_v63 = vrot.slane %v4725_v44, 2 }
  0x6f   : > { %8332 = vst [vmem:[#allocation54_spill] sm:$0xff] %v4940_v53 }
  0x71   : > { %779 = vrot.lane.b32.xlu1 %v4898_v30, %s4373_s8  ;;  %781 = vrot.lane.b32.xlu0 %v4901_v37, %s4373_s8  ;;  %v724_v37 = vrot.slane %v4657_v40, 2 }
  0x73   : > { %v4937_v40 = vsel %vm673_vm2, %v722_v12, %v724_v37  ;;  %v4953_v37 = vsel %vm673_vm2, %v731_v13, %v732_v15  ;;  %v736_v12 = vrot.slane %v4722_v26, 2  ;;  %v742_v13 = vrot.slane %v4746_v55, 2 }
  0x74   : > { %8334 = vst [vmem:[#allocation56_spill] sm:$0xff] %v4953_v37 }
  0x75   : > { %783 = vrot.lane.b32.xlu1 %v4910_v39, %s4373_s8  ;;  %785 = vrot.lane.b32.xlu0 %v4913_v49, %s4373_s8  ;;  %v729_v49 = vrot.slane %v4680_v8, 2 }
  0x77   : > { %v4950_v8 = vsel %vm673_vm2, %v727_v24, %v729_v49  ;;  %v739_v49 = vrot.slane %v4728_v22, 2  ;;  %v741_v24 = vrot.slane %v4749_v62, 2  ;;  %v746_v22 = vrot.slane %v4771_v43, 2 }
  0x78   : > { %8333 = vst [vmem:[#allocation55_spill] sm:$0xff] %v4950_v8 }
  0x79   : > { %787 = vrot.lane.b32.xlu1 %v4924_v23, %s4373_s8  ;;  %789 = vrot.lane.b32.xlu0 %v4927_v48, %s4373_s8  ;;  %v734_v48 = vrot.slane %v4704_v51, 2  ;;  %v4965_v51 = vsel %vm673_vm2, %v736_v12, %v737_v63  ;;  %v4981_v12 = vsel %vm673_vm2, %v741_v24, %v742_v13 }
  0x7a   : > { %8337 = vst [vmem:[#allocation59_spill] sm:$0xff] %v4981_v12 }
  0x7d   : > { %791 = vrot.lane.b32.xlu1 %v4937_v40, %s4373_s8  ;;  %793 = vrot.lane.b32.xlu0 %v4940_v53, %s4373_s8  ;;  %v4962_v53 = vsel %vm673_vm2, %v732_v15, %v734_v48  ;;  %v744_v48 = vrot.slane %v4752_v18, 2  ;;  %v4978_v15 = vsel %vm673_vm2, %v737_v63, %v739_v49  ;;  %v749_v63 = vrot.slane %v4774_v20, 2 }
  0x7e   : > { %8335 = vst [vmem:[#allocation57_spill] sm:$0xff] %v4962_v53 }
  0x81   : > { %795 = vrot.lane.b32.xlu1 %v4950_v8, %s4373_s8  ;;  %797 = vrot.lane.b32.xlu0 %v4953_v37, %s4373_s8  ;;  %v747_v37 = vrot.slane %v4768_v1, 2 }
  0x82   : > { %v4974_v8 = vpop.permute.xlu0 %580 }
  0x83   : > { %8336 = vst [vmem:[#allocation58_spill] sm:$0xff] %v4974_v8  ;;  %v4990_v8 = vsel %vm673_vm2, %v742_v13, %v744_v48  ;;  %v4993_v18 = vsel %vm673_vm2, %v746_v22, %v747_v37 }
  0x84   : > { %8338 = vst [vmem:[#allocation60_spill] sm:$0xff] %v4993_v18 }
  0x85   : > { %799 = vrot.lane.b32.xlu1 %v4962_v53, %s4373_s8  ;;  %801 = vrot.lane.b32.xlu0 %v4965_v51, %s4373_s8 }
  0x89   : > { %803 = vrot.lane.b32.xlu1 %v4978_v15, %s4373_s8  ;;  %805 = vrot.lane.b32.xlu0 %v4981_v12, %s4373_s8  ;;  %v5005_v12 = vsel %vm673_vm2, %v747_v37, %v749_v63 }
  0x8b   : > { %v4996_v49 = vpop.permute.xlu1 %584  ;;  %v4998_v24 = vpop.permute.xlu0 %582 }
  0x8c   : > { %8339 = vst [vmem:[#allocation61_spill] sm:$0xff] %v4996_v49  ;;  %8340 = vst [vmem:[#allocation62_spill] sm:$0xff] %v4998_v24 }
  0x8d   : > { %807 = vrot.lane.b32.xlu1 %v4990_v8, %s4373_s8  ;;  %809 = vrot.lane.b32.xlu0 %v4993_v18, %s4373_s8 }
  0x8f   : > { %v5007_v13 = vpop.permute.xlu1 %586  ;;  %v5009_v48 = vpop.permute.xlu0 %588 }
  0x90   : > { %8341 = vst [vmem:[#allocation63_spill] sm:$0xff] %v5007_v13  ;;  %8342 = vst [vmem:[#allocation64_spill] sm:$0xff] %v5009_v48 }
  0x91   : > { %811 = vrot.lane.b32.xlu1 %v5005_v12, %s4373_s8  ;;  %845 = vrot.lane.b32.xlu0 %v4456_v16, %s4374_s9  ;;  %v5125_v16 = vld [vmem:[%s4441_s30 + $0xf8] sm:$0xff] }
  0x93   : > { %v5015_v20 = vpop.permute.xlu1 %590  ;;  %v5017_v22 = vpop.permute.xlu0 %592 }
  0x94   : > { %8343 = vst [vmem:[#allocation65_spill] sm:$0xff] %v5015_v20  ;;  %8344 = vst [vmem:[#allocation66_spill] sm:$0xff] %v5017_v22 }
  0x95   : > { %847 = vrot.lane.b32.xlu1 %v4450_v14, %s4374_s9  ;;  %849 = vrot.lane.b32.xlu0 %v4459_v17, %s4374_s9 }
  0x97   : > { %v5023_v37 = vpop.permute.xlu1 %594  ;;  %v5025_v63 = vpop.permute.xlu0 %596 }
  0x98   : > { %8345 = vst [vmem:[#allocation67_spill] sm:$0xff] %v5023_v37  ;;  %8346 = vst [vmem:[#allocation68_spill] sm:$0xff] %v5025_v63 }
  0x99   : > { %851 = vrot.lane.b32.xlu1 %v4465_v21, %s4374_s9  ;;  %853 = vrot.lane.b32.xlu0 %v4485_v31, %s4374_s9 }
  0x9b   : > { %v5031_v48 = vpop.permute.xlu1 %598  ;;  %v5033_v20 = vpop.permute.xlu0 %600 }
  0x9c   : > { %8347 = vst [vmem:[#allocation69_spill] sm:$0xff] %v5031_v48  ;;  %8348 = vst [vmem:[#allocation70_spill] sm:$0xff] %v5033_v20 }
  0x9d   : > { %855 = vrot.lane.b32.xlu1 %v4473_v25, %s4374_s9  ;;  %857 = vrot.lane.b32.xlu0 %v4513_v47, %s4374_s9 }
  0x9f   : > { %v5039_v22 = vpop.permute.xlu1 %602  ;;  %v5041_v37 = vpop.permute.xlu0 %604 }
  0xa0   : > { %8349 = vst [vmem:[#allocation71_spill] sm:$0xff] %v5039_v22  ;;  %8350 = vst [vmem:[#allocation72_spill] sm:$0xff] %v5041_v37 }
  0xa1   : > { %859 = vrot.lane.b32.xlu1 %v4510_v46, %s4374_s9  ;;  %861 = vrot.lane.b32.xlu0 %v4533_v56, %s4374_s9 }
  0xa3   : > { %v5047_v63 = vpop.permute.xlu1 %606  ;;  %v5049_v48 = vpop.permute.xlu0 %608 }
  0xa4   : > { %8351 = vst [vmem:[#allocation73_spill] sm:$0xff] %v5047_v63  ;;  %8352 = vst [vmem:[#allocation74_spill] sm:$0xff] %v5049_v48 }
  0xa5   : > { %863 = vrot.lane.b32.xlu1 %v4528_v52, %s4374_s9  ;;  %865 = vrot.lane.b32.xlu0 %v4555_v6, %s4374_s9 }
  0xa7   : > { %v5055_v20 = vpop.permute.xlu1 %610  ;;  %v5057_v22 = vpop.permute.xlu0 %612 }
  0xa8   : > { %8353 = vst [vmem:[#allocation75_spill] sm:$0xff] %v5055_v20  ;;  %8354 = vst [vmem:[#allocation76_spill] sm:$0xff] %v5057_v22 }
  0xa9   : > { %867 = vrot.lane.b32.xlu1 %v4559_v9, %s4374_s9  ;;  %869 = vrot.lane.b32.xlu0 %v4576_v19, %s4374_s9 }
  0xab   : > { %v5063_v37 = vpop.permute.xlu1 %614  ;;  %v5065_v63 = vpop.permute.xlu0 %616 }
  0xac   : > { %8355 = vst [vmem:[#allocation77_spill] sm:$0xff] %v5063_v37  ;;  %8356 = vst [vmem:[#allocation78_spill] sm:$0xff] %v5065_v63 }
  0xad   : > { %871 = vrot.lane.b32.xlu1 %v4582_v27, %s4374_s9  ;;  %873 = vrot.lane.b32.xlu0 %v4590_v35, %s4374_s9 }
  0xaf   : > { %v5071_v48 = vpop.permute.xlu1 %618  ;;  %v5073_v20 = vpop.permute.xlu0 %620 }
  0xb0   : > { %8357 = vst [vmem:[#allocation79_spill] sm:$0xff] %v5071_v48  ;;  %8358 = vst [vmem:[#allocation80_spill] sm:$0xff] %v5073_v20 }
  0xb1   : > { %875 = vrot.lane.b32.xlu1 %v4599_v41, %s4374_s9  ;;  %877 = vrot.lane.b32.xlu0 %v4628_v61, %s4374_s9 }
  0xb3   : > { %v5079_v22 = vpop.permute.xlu1 %622  ;;  %v5081_v37 = vpop.permute.xlu0 %624 }
  0xb4   : > { %8359 = vst [vmem:[#allocation81_spill] sm:$0xff] %v5079_v22  ;;  %8360 = vst [vmem:[#allocation82_spill] sm:$0xff] %v5081_v37 }
  0xb5   : > { %879 = vrot.lane.b32.xlu1 %v4625_v60, %s4374_s9  ;;  %881 = vrot.lane.b32.xlu0 %v4654_v36, %s4374_s9 }
  0xb7   : > { %v5087_v48 = vpop.permute.xlu1 %626  ;;  %v5089_v20 = vpop.permute.xlu0 %628 }
  0xb8   : > { %8361 = vst [vmem:[#allocation83_spill] sm:$0xff] %v5087_v48  ;;  %8362 = vst [vmem:[#allocation84_spill] sm:$0xff] %v5089_v20 }
  0xb9   : > { %883 = vrot.lane.b32.xlu1 %v4651_v33, %s4374_s9  ;;  %885 = vrot.lane.b32.xlu0 %v4673_v2, %s4374_s9 }
  0xbb   : > { %v5095_v22 = vpop.permute.xlu1 %630  ;;  %v5097_v37 = vpop.permute.xlu0 %632 }
  0xbc   : > { %8363 = vst [vmem:[#allocation85_spill] sm:$0xff] %v5095_v22  ;;  %8364 = vst [vmem:[#allocation86_spill] sm:$0xff] %v5097_v37  ;;  %v309_v37 = vld [vmem:[%s4441_s30 + $0xf0] sm:$0xff] }
  0xbd   : > { %887 = vrot.lane.b32.xlu1 %v4677_v7, %s4374_s9  ;;  %889 = vrot.lane.b32.xlu0 %v4695_v42, %s4374_s9 }
  0xbf   : > { %v5103_v48 = vpop.permute.xlu1 %634  ;;  %v5105_v20 = vpop.permute.xlu0 %636 }
  0xc0   : > { %8365 = vst [vmem:[#allocation87_spill] sm:$0xff] %v5103_v48  ;;  %8366 = vst [vmem:[#allocation88_spill] sm:$0xff] %v5105_v20  ;;  %v389_v48 = vrot.slane %v309_v37, 7 }
  0xc1   : > { %891 = vrot.lane.b32.xlu1 %v4701_v32, %s4374_s9  ;;  %893 = vrot.lane.b32.xlu0 %v4722_v26, %s4374_s9 }
  0xc3   : > { %v5111_v22 = vpop.permute.xlu1 %638  ;;  %v5113_v63 = vpop.permute.xlu0 %640 }
  0xc4   : > { %8367 = vst [vmem:[#allocation89_spill] sm:$0xff] %v5111_v22  ;;  %8368 = vst [vmem:[#allocation90_spill] sm:$0xff] %v5113_v63  ;;  %v5132_v63 = vsel %vm343_vm0, 0.0, %v389_v48  ;;  %v8135_v22 = vrot.slane %v5125_v16, 7 }
  0xc5   : > { %895 = vrot.lane.b32.xlu1 %v4725_v44, %s4374_s9  ;;  %897 = vrot.lane.b32.xlu0 %v4749_v62, %s4374_s9  ;;  %8371 = vst [vmem:[#allocation93_spill] sm:$0xff] %v5132_v63  ;;  %v8401_v62 = vld [vmem:[#allocation19_spill] sm:$0xff] }
  0xc7   : > { %v5120_v13 = vpop.permute.xlu1 %751  ;;  %v5122_v20 = vpop.permute.xlu0 %753 }
  0xc8   : > { %8369 = vst [vmem:[#allocation91_spill] sm:$0xff] %v5120_v13  ;;  %8370 = vst [vmem:[#allocation92_spill] sm:$0xff] %v5122_v20  ;;  %v5146_v20 = vsel %vm343_vm0, %v389_v48, %v8135_v22  ;;  %v8393_v13 = vld [vmem:[#allocation11_spill] sm:$0xff] }
  0xc9   : > { %899 = vrot.lane.b32.xlu1 %v4746_v55, %s4374_s9  ;;  %901 = vrot.lane.b32.xlu0 %v4771_v43, %s4374_s9  ;;  %8374 = vst [vmem:[#allocation96_spill] sm:$0xff] %v5146_v20  ;;  %v8397_v43 = vld [vmem:[#allocation15_spill] sm:$0xff] }
  0xcb   : > { %v5135_v24 = vpop.permute.xlu1 %755  ;;  %v5137_v37 = vpop.permute.xlu0 %757 }
  0xcc   : > { %8372 = vst [vmem:[#allocation94_spill] sm:$0xff] %v5135_v24  ;;  %8373 = vst [vmem:[#allocation95_spill] sm:$0xff] %v5137_v37 }
  0xcd   : > { %903 = vrot.lane.b32.xlu1 %v4768_v1, %s4374_s9  ;;  %905 = vrot.lane.b32.xlu0 %v5132_v63, %s4374_s9 }
  0xcf   : > { %v5148_v14 = vpop.permute.xlu1 %759  ;;  %v5150_v49 = vpop.permute.xlu0 %761 }
  0xd0   : > { %8375 = vst [vmem:[#allocation97_spill] sm:$0xff] %v5148_v14  ;;  %8376 = vst [vmem:[#allocation98_spill] sm:$0xff] %v5150_v49  ;;  %v8389_v49 = vld [vmem:[#allocation9_spill] sm:$0xff] }
  0xd1   : > { %907 = vrot.lane.b32.xlu1 %v5146_v20, %s4374_s9  ;;  %947 = vrot.lane.b32.xlu0 %v4481_v29, %s4375_s10 }
  0xd3   : > { %v5156_v37 = vpop.permute.xlu1 %763  ;;  %v5158_v24 = vpop.permute.xlu0 %765 }
  0xd4   : > { %8377 = vst [vmem:[#allocation99_spill] sm:$0xff] %v5156_v37  ;;  %8378 = vst [vmem:[#allocation100_spill] sm:$0xff] %v5158_v24 }
  0xd5   : > { %949 = vrot.lane.b32.xlu1 %v4478_v28, %s4375_s10  ;;  %951 = vrot.lane.b32.xlu0 %v4494_v34, %s4375_s10 }
  0xd7   : > { %v5164_v48 = vpop.permute.xlu1 %767  ;;  %v5166_v22 = vpop.permute.xlu0 %769 }
  0xd8   : > { %8379 = vst [vmem:[#allocation101_spill] sm:$0xff] %v5164_v48  ;;  %8380 = vst [vmem:[#allocation102_spill] sm:$0xff] %v5166_v22  ;;  %v8385_v22 = vld [vmem:[#allocation5_spill] sm:$0xff] }
  0xd9   : > { %953 = vrot.lane.b32.xlu1 %v4502_v38, %s4375_s10  ;;  %955 = vrot.lane.b32.xlu0 %v4507_v45, %s4375_s10 }
  0xdb   : > { %v5172_v29 = vpop.permute.xlu1 %771  ;;  %v5174_v37 = vpop.permute.xlu0 %773 }
  0xdc   : > { %8381 = vst [vmem:[#allocation103_spill] sm:$0xff] %v5172_v29  ;;  %8382 = vst [vmem:[#allocation104_spill] sm:$0xff] %v5174_v37  ;;  %v8388_v37 = vld [vmem:[#allocation6_spill] sm:$0xff] }
  0xdd   : > { %957 = vrot.lane.b32.xlu1 %v4524_v50, %s4375_s10  ;;  %959 = vrot.lane.b32.xlu0 %v4549_v4, %s4375_s10 }
  0xdf   : > { %v5180_v28 = vpop.permute.xlu1 %775  ;;  %v5182_v48 = vpop.permute.xlu0 %777 }
  0xe0   : > { %8383 = vst [vmem:[#allocation105_spill] sm:$0xff] %v5180_v28  ;;  %8384 = vst [vmem:[#allocation106_spill] sm:$0xff] %v5182_v48  ;;  %v8392_v48 = vld [vmem:[#allocation10_spill] sm:$0xff] }
  0xe1   : > { %961 = vrot.lane.b32.xlu1 %v4552_v5, %s4375_s10  ;;  %963 = vrot.lane.b32.xlu0 %v8385_v22, %s4375_s10 }
  0xe3   : > { %v5188_v24 = vpop.permute.xlu1 %779  ;;  %v5190_v29 = vpop.permute.xlu0 %781 }
  0xe4   : > { %8386 = vst [vmem:[#allocation5_spill] sm:$0xff] %v5188_v24  ;;  %8387 = vst [vmem:[#allocation107_spill] sm:$0xff] %v5190_v29  ;;  %v8396_v29 = vld [vmem:[#allocation12_spill] sm:$0xff] }
  0xe5   : > { %965 = vrot.lane.b32.xlu1 %v8388_v37, %s4375_s10  ;;  %967 = vrot.lane.b32.xlu0 %v8389_v49, %s4375_s10 }
  0xe7   : > { %v5196_v14 = vpop.permute.xlu1 %783  ;;  %v5198_v28 = vpop.permute.xlu0 %785 }
  0xe8   : > { %8390 = vst [vmem:[#allocation6_spill] sm:$0xff] %v5196_v14  ;;  %8391 = vst [vmem:[#allocation9_spill] sm:$0xff] %v5198_v28  ;;  %v8400_v28 = vld [vmem:[#allocation16_spill] sm:$0xff] }
  0xe9   : > { %969 = vrot.lane.b32.xlu1 %v8392_v48, %s4375_s10  ;;  %971 = vrot.lane.b32.xlu0 %v8393_v13, %s4375_s10 }
  0xeb   : > { %v5204_v1 = vpop.permute.xlu1 %787  ;;  %v5206_v24 = vpop.permute.xlu0 %789 }
  0xec   : > { %8394 = vst [vmem:[#allocation10_spill] sm:$0xff] %v5204_v1  ;;  %8395 = vst [vmem:[#allocation108_spill] sm:$0xff] %v5206_v24  ;;  %v8404_v24 = vld [vmem:[#allocation20_spill] sm:$0xff] }
  0xed   : > { %973 = vrot.lane.b32.xlu1 %v8396_v29, %s4375_s10  ;;  %975 = vrot.lane.b32.xlu0 %v8397_v43, %s4375_s10  ;;  %v8405_v29 = vld [vmem:[#allocation23_spill] sm:$0xff] }
  0xef   : > { %v5212_v55 = vpop.permute.xlu1 %791  ;;  %v5214_v14 = vpop.permute.xlu0 %793 }
  0xf0   : > { %8398 = vst [vmem:[#allocation109_spill] sm:$0xff] %v5212_v55  ;;  %8399 = vst [vmem:[#allocation110_spill] sm:$0xff] %v5214_v14  ;;  %v8408_v14 = vld [vmem:[#allocation25_spill] sm:$0xff] }
  0xf1   : > { %977 = vrot.lane.b32.xlu1 %v8400_v28, %s4375_s10  ;;  %979 = vrot.lane.b32.xlu0 %v8401_v62, %s4375_s10  ;;  %v8409_v28 = vld [vmem:[#allocation27_spill] sm:$0xff] }
  0xf3   : > { %v5220_v44 = vpop.permute.xlu1 %795  ;;  %v5222_v1 = vpop.permute.xlu0 %797 }
  0xf4   : > { %8402 = vst [vmem:[#allocation111_spill] sm:$0xff] %v5220_v44  ;;  %8403 = vst [vmem:[#allocation112_spill] sm:$0xff] %v5222_v1  ;;  %v8412_v1 = vld [vmem:[#allocation28_spill] sm:$0xff] }
  0xf5   : > { %981 = vrot.lane.b32.xlu1 %v8404_v24, %s4375_s10  ;;  %983 = vrot.lane.b32.xlu0 %v8405_v29, %s4375_s10  ;;  %v8413_v24 = vld [vmem:[#allocation31_spill] sm:$0xff] }
  0xf7   : > { %v5228_v43 = vpop.permute.xlu1 %799  ;;  %v5230_v55 = vpop.permute.xlu0 %801 }
  0xf8   : > { %8406 = vst [vmem:[#allocation113_spill] sm:$0xff] %v5228_v43  ;;  %8407 = vst [vmem:[#allocation114_spill] sm:$0xff] %v5230_v55  ;;  %v8416_v55 = vld [vmem:[#allocation32_spill] sm:$0xff] }
  0xf9   : > { %985 = vrot.lane.b32.xlu1 %v8408_v14, %s4375_s10  ;;  %987 = vrot.lane.b32.xlu0 %v8409_v28, %s4375_s10 }
  0xfb   : > { %v5236_v62 = vpop.permute.xlu1 %803  ;;  %v5238_v44 = vpop.permute.xlu0 %805 }
  0xfc   : > { %8410 = vst [vmem:[#allocation115_spill] sm:$0xff] %v5236_v62  ;;  %8411 = vst [vmem:[#allocation116_spill] sm:$0xff] %v5238_v44  ;;  %v8419_v44 = vld [vmem:[#allocation36_spill] sm:$0xff] }
  0xfd   : > { %989 = vrot.lane.b32.xlu1 %v8412_v1, %s4375_s10  ;;  %991 = vrot.lane.b32.xlu0 %v8413_v24, %s4375_s10  ;;  %v8420_v1 = vld [vmem:[#allocation39_spill] sm:$0xff] }
  0xff   : > { %v5244_v29 = vpop.permute.xlu1 %807  ;;  %v5246_v43 = vpop.permute.xlu0 %809 }
 0x100   : > { %8414 = vst [vmem:[#allocation117_spill] sm:$0xff] %v5244_v29  ;;  %8415 = vst [vmem:[#allocation118_spill] sm:$0xff] %v5246_v43  ;;  %v942_v29 = vrot.slane %v5132_v63, 1  ;;  %v943_v43 = vrot.slane %v5146_v20, 1 }
 0x101   : > { %993 = vrot.lane.b32.xlu1 %v8416_v55, %s4375_s10  ;;  %995 = vrot.lane.b32.xlu0 %v4761_v11, %s4375_s10  ;;  %v8423_v11 = vrot.slane %v5125_v16, 7  ;;  %v8429_v16 = vld [vmem:[#allocation42_spill] sm:$0xff] }
 0x103   : > { %v5252_v28 = vpop.permute.xlu1 %811  ;;  %v5254_v62 = vpop.permute.xlu0 %845 }
 0x104   : > { %8417 = vst [vmem:[#allocation119_spill] sm:$0xff] %v5252_v28  ;;  %8418 = vst [vmem:[#allocation120_spill] sm:$0xff] %v5254_v62  ;;  %v5269_v28 = vsel %vm343_vm0, %v8423_v11, 0.0  ;;  %v8424_v62 = vld [vmem:[#allocation40_spill] sm:$0xff] }
 0x105   : > { %997 = vrot.lane.b32.xlu1 %v8419_v44, %s4375_s10  ;;  %999 = vrot.lane.b32.xlu0 %v8420_v1, %s4375_s10  ;;  %v8425_v44 = vld [vmem:[#allocation41_spill] sm:$0xff]  ;;  %v5276_v1 = vsel %vm502_vm1, %v942_v29, %v943_v43  ;;  %v945_v14 = vrot.slane %v5269_v28, 1 }
 0x106   : > { %8426 = vst [vmem:[#allocation123_spill] sm:$0xff] %v5276_v1 }
 0x107   : > { %v5262_v24 = vpop.permute.xlu1 %847  ;;  %v5264_v55 = vpop.permute.xlu0 %849  ;;  %v5288_v11 = vsel %vm502_vm1, %v943_v43, %v945_v14  ;;  %v8435_v14 = vld [vmem:[#allocation44_spill] sm:$0xff] }
 0x108   : > { %8421 = vst [vmem:[#allocation121_spill] sm:$0xff] %v5262_v24  ;;  %8422 = vst [vmem:[#allocation122_spill] sm:$0xff] %v5264_v55 }
 0x109   : > { %1001 = vrot.lane.b32.xlu1 %v8424_v62, %s4375_s10  ;;  %1003 = vrot.lane.b32.xlu0 %v8425_v44, %s4375_s10  ;;  %8430 = vst [vmem:[#allocation126_spill] sm:$0xff] %v5288_v11 }
 0x10b   : > { %v5279_v13 = vpop.permute.xlu1 %851  ;;  %v5281_v24 = vpop.permute.xlu0 %853 }
 0x10c   : > { %8427 = vst [vmem:[#allocation124_spill] sm:$0xff] %v5279_v13  ;;  %8428 = vst [vmem:[#allocation125_spill] sm:$0xff] %v5281_v24 }
 0x10d   : > { %1005 = vrot.lane.b32.xlu1 %v8429_v16, %s4375_s10  ;;  %1007 = vrot.lane.b32.xlu0 %v5276_v1, %s4375_s10 }
 0x10f   : > { %v5290_v55 = vpop.permute.xlu1 %855  ;;  %v5292_v44 = vpop.permute.xlu0 %857 }
 0x110   : > { %8431 = vst [vmem:[#allocation127_spill] sm:$0xff] %v5290_v55  ;;  %8432 = vst [vmem:[#allocation128_spill] sm:$0xff] %v5292_v44  ;;  %v8438_v55 = vld [vmem:[#allocation45_spill] sm:$0xff] }
 0x111   : > { %1009 = vrot.lane.b32.xlu1 %v5288_v11, %s4375_s10  ;;  %1048 = vrot.lane.b32.xlu0 %v4810_v54, %s4376_s11 }
 0x113   : > { %v5298_v29 = vpop.permute.xlu1 %859  ;;  %v5300_v24 = vpop.permute.xlu0 %861 }
 0x114   : > { %8433 = vst [vmem:[#allocation129_spill] sm:$0xff] %v5298_v29  ;;  %8434 = vst [vmem:[#allocation130_spill] sm:$0xff] %v5300_v24 }
 0x115   : > { %1050 = vrot.lane.b32.xlu1 %v4819_v3, %s4376_s11  ;;  %1052 = vrot.lane.b32.xlu0 %v8435_v14, %s4376_s11  ;;  %v8441_v3 = vld [vmem:[#allocation46_spill] sm:$0xff] }
 0x117   : > { %v5306_v43 = vpop.permute.xlu1 %863  ;;  %v5308_v44 = vpop.permute.xlu0 %865 }
 0x118   : > { %8436 = vst [vmem:[#allocation44_spill] sm:$0xff] %v5306_v43  ;;  %8437 = vst [vmem:[#allocation131_spill] sm:$0xff] %v5308_v44  ;;  %v8444_v44 = vld [vmem:[#allocation47_spill] sm:$0xff] }
 0x119   : > { %1054 = vrot.lane.b32.xlu1 %v4833_v0, %s4376_s11  ;;  %1056 = vrot.lane.b32.xlu0 %v8438_v55, %s4376_s11 }
 0x11b   : > { %v5314_v54 = vpop.permute.xlu1 %867  ;;  %v5316_v29 = vpop.permute.xlu0 %869 }
 0x11c   : > { %8439 = vst [vmem:[#allocation45_spill] sm:$0xff] %v5314_v54  ;;  %8440 = vst [vmem:[#allocation132_spill] sm:$0xff] %v5316_v29  ;;  %v8447_v29 = vld [vmem:[#allocation48_spill] sm:$0xff] }
 0x11d   : > { %1058 = vrot.lane.b32.xlu1 %v4845_v59, %s4376_s11  ;;  %1060 = vrot.lane.b32.xlu0 %v8441_v3, %s4376_s11 }
 0x11f   : > { %v5322_v24 = vpop.permute.xlu1 %871  ;;  %v5324_v43 = vpop.permute.xlu0 %873 }
 0x120   : > { %8442 = vst [vmem:[#allocation46_spill] sm:$0xff] %v5322_v24  ;;  %8443 = vst [vmem:[#allocation133_spill] sm:$0xff] %v5324_v43  ;;  %v8450_v43 = vld [vmem:[#allocation49_spill] sm:$0xff] }
 0x121   : > { %1062 = vrot.lane.b32.xlu1 %v4859_v58, %s4376_s11  ;;  %1064 = vrot.lane.b32.xlu0 %v8444_v44, %s4376_s11 }
 0x123   : > { %v5330_v11 = vpop.permute.xlu1 %875  ;;  %v5332_v54 = vpop.permute.xlu0 %877 }
 0x124   : > { %8445 = vst [vmem:[#allocation47_spill] sm:$0xff] %v5330_v11  ;;  %8446 = vst [vmem:[#allocation134_spill] sm:$0xff] %v5332_v54  ;;  %v8453_v54 = vld [vmem:[#allocation50_spill] sm:$0xff] }
 0x125   : > { %1066 = vrot.lane.b32.xlu1 %v4872_v57, %s4376_s11  ;;  %1068 = vrot.lane.b32.xlu0 %v8447_v29, %s4376_s11 }
 0x127   : > { %v5338_v1 = vpop.permute.xlu1 %879  ;;  %v5340_v24 = vpop.permute.xlu0 %881 }
 0x128   : > { %8448 = vst [vmem:[#allocation48_spill] sm:$0xff] %v5338_v1  ;;  %8449 = vst [vmem:[#allocation135_spill] sm:$0xff] %v5340_v24  ;;  %v8456_v24 = vld [vmem:[#allocation51_spill] sm:$0xff] }
 0x129   : > { %1070 = vrot.lane.b32.xlu1 %v4885_v10, %s4376_s11  ;;  %1072 = vrot.lane.b32.xlu0 %v8450_v43, %s4376_s11 }
 0x12b   : > { %v5346_v13 = vpop.permute.xlu1 %883  ;;  %v5348_v11 = vpop.permute.xlu0 %885 }
 0x12c   : > { %8451 = vst [vmem:[#allocation49_spill] sm:$0xff] %v5346_v13  ;;  %8452 = vst [vmem:[#allocation136_spill] sm:$0xff] %v5348_v11  ;;  %v8459_v11 = vld [vmem:[#allocation53_spill] sm:$0xff] }
 0x12d   : > { %1074 = vrot.lane.b32.xlu1 %v4898_v30, %s4376_s11  ;;  %1076 = vrot.lane.b32.xlu0 %v8453_v54, %s4376_s11 }
 0x12f   : > { %v5354_v16 = vpop.permute.xlu1 %887  ;;  %v5356_v1 = vpop.permute.xlu0 %889 }
 0x130   : > { %8454 = vst [vmem:[#allocation137_spill] sm:$0xff] %v5354_v16  ;;  %8455 = vst [vmem:[#allocation138_spill] sm:$0xff] %v5356_v1  ;;  %v8462_v1 = vld [vmem:[#allocation54_spill] sm:$0xff] }
 0x131   : > { %1078 = vrot.lane.b32.xlu1 %v4910_v39, %s4376_s11  ;;  %1080 = vrot.lane.b32.xlu0 %v8456_v24, %s4376_s11 }
 0x133   : > { %v5362_v62 = vpop.permute.xlu1 %891  ;;  %v5364_v13 = vpop.permute.xlu0 %893 }
 0x134   : > { %8457 = vst [vmem:[#allocation139_spill] sm:$0xff] %v5362_v62  ;;  %8458 = vst [vmem:[#allocation140_spill] sm:$0xff] %v5364_v13  ;;  %v8465_v13 = vld [vmem:[#allocation55_spill] sm:$0xff] }
 0x135   : > { %1082 = vrot.lane.b32.xlu1 %v4924_v23, %s4376_s11  ;;  %1084 = vrot.lane.b32.xlu0 %v8459_v11, %s4376_s11  ;;  %v8466_v23 = vld [vmem:[#allocation56_spill] sm:$0xff] }
 0x137   : > { %v5370_v54 = vpop.permute.xlu1 %895  ;;  %v5372_v16 = vpop.permute.xlu0 %897 }
 0x138   : > { %8460 = vst [vmem:[#allocation141_spill] sm:$0xff] %v5370_v54  ;;  %8461 = vst [vmem:[#allocation142_spill] sm:$0xff] %v5372_v16 }
 0x139   : > { %1086 = vrot.lane.b32.xlu1 %v4937_v40, %s4376_s11  ;;  %1088 = vrot.lane.b32.xlu0 %v8462_v1, %s4376_s11 }
 0x13b   : > { %v5378_v24 = vpop.permute.xlu1 %899  ;;  %v5380_v62 = vpop.permute.xlu0 %901 }
 0x13c   : > { %8463 = vst [vmem:[#allocation54_spill] sm:$0xff] %v5378_v24  ;;  %8464 = vst [vmem:[#allocation143_spill] sm:$0xff] %v5380_v62  ;;  %v8471_v62 = vld [vmem:[#allocation59_spill] sm:$0xff] }
 0x13d   : > { %1090 = vrot.lane.b32.xlu1 %v8465_v13, %s4376_s11  ;;  %1092 = vrot.lane.b32.xlu0 %v8466_v23, %s4376_s11 }
 0x13f   : > { %v5386_v11 = vpop.permute.xlu1 %903  ;;  %v5388_v54 = vpop.permute.xlu0 %905 }
 0x140   : > { %8467 = vst [vmem:[#allocation55_spill] sm:$0xff] %v5386_v11  ;;  %8468 = vst [vmem:[#allocation144_spill] sm:$0xff] %v5388_v54  ;;  %v1043_v11 = vrot.slane %v5132_v63, 2  ;;  %v1044_v54 = vrot.slane %v5146_v20, 2 }
 0x141   : > { %1094 = vrot.lane.b32.xlu1 %v4962_v53, %s4376_s11  ;;  %1096 = vrot.lane.b32.xlu0 %v4965_v51, %s4376_s11 }
 0x143   : > { %v5394_v16 = vpop.permute.xlu1 %907  ;;  %v5396_v24 = vpop.permute.xlu0 %947 }
 0x144   : > { %8469 = vst [vmem:[#allocation145_spill] sm:$0xff] %v5394_v16  ;;  %8470 = vst [vmem:[#allocation146_spill] sm:$0xff] %v5396_v24  ;;  %v5413_v16 = vsel %vm673_vm2, %v1043_v11, %v1044_v54  ;;  %v1046_v24 = vrot.slane %v5269_v28, 2 }
 0x145   : > { %1098 = vrot.lane.b32.xlu1 %v4978_v15, %s4376_s11  ;;  %1100 = vrot.lane.b32.xlu0 %v8471_v62, %s4376_s11 }
 0x146   : > { %v5425_v20 = vsel %vm673_vm2, %v1044_v54, %v1046_v24 }
 0x147   : > { %v5404_v23 = vpop.permute.xlu1 %949  ;;  %v5406_v53 = vpop.permute.xlu0 %951 }
 0x148   : > { %8472 = vst [vmem:[#allocation147_spill] sm:$0xff] %v5406_v53 }
 0x149   : > { %1102 = vrot.lane.b32.xlu1 %v4990_v8, %s4376_s11  ;;  %1104 = vrot.lane.b32.xlu0 %v4993_v18, %s4376_s11 }
 0x14b   : > { %v5416_v62 = vpop.permute.xlu1 %953  ;;  %v5418_v63 = vpop.permute.xlu0 %955 }
 0x14d   : > { %1106 = vrot.lane.b32.xlu1 %v5005_v12, %s4376_s11  ;;  %1108 = vrot.lane.b32.xlu0 %v5413_v16, %s4376_s11 }
 0x14f   : > { %v5427_v53 = vpop.permute.xlu1 %957  ;;  %v5429_v18 = vpop.permute.xlu0 %959 }
 0x150   : > { %8473 = vst [vmem:[#allocation148_spill] sm:$0xff] %v5429_v18 }
 0x151   : > { %1110 = vrot.lane.b32.xlu1 %v5425_v20, %s4376_s11  ;;  %1144 = vrot.lane.b32.xlu0 %v4459_v17, %s4377_s12 }
 0x153   : > { %v5435_v28 = vpop.permute.xlu1 %961  ;;  %v5437_v11 = vpop.permute.xlu0 %963 }
 0x154   : > { %8474 = vst [vmem:[#allocation149_spill] sm:$0xff] %v5435_v28  ;;  %8475 = vst [vmem:[#allocation150_spill] sm:$0xff] %v5437_v11 }
 0x155   : > { %1146 = vrot.lane.b32.xlu1 %v4465_v21, %s4377_s12  ;;  %1148 = vrot.lane.b32.xlu0 %v4485_v31, %s4377_s12 }
 0x157   : > { %v5443_v24 = vpop.permute.xlu1 %965  ;;  %v5445_v54 = vpop.permute.xlu0 %967 }
 0x158   : > { %8476 = vst [vmem:[#allocation151_spill] sm:$0xff] %v5443_v24  ;;  %8477 = vst [vmem:[#allocation152_spill] sm:$0xff] %v5445_v54 }
 0x159   : > { %1150 = vrot.lane.b32.xlu1 %v4473_v25, %s4377_s12  ;;  %1152 = vrot.lane.b32.xlu0 %v4513_v47, %s4377_s12 }
 0x15b   : > { %v5451_v18 = vpop.permute.xlu1 %969  ;;  %v5453_v28 = vpop.permute.xlu0 %971 }
 0x15c   : > { %8478 = vst [vmem:[#allocation153_spill] sm:$0xff] %v5451_v18  ;;  %8479 = vst [vmem:[#allocation154_spill] sm:$0xff] %v5453_v28 }
 0x15d   : > { %1154 = vrot.lane.b32.xlu1 %v4510_v46, %s4377_s12  ;;  %1156 = vrot.lane.b32.xlu0 %v4533_v56, %s4377_s12 }
 0x15f   : > { %v5459_v11 = vpop.permute.xlu1 %973  ;;  %v5461_v24 = vpop.permute.xlu0 %975 }
 0x160   : > { %8480 = vst [vmem:[#allocation155_spill] sm:$0xff] %v5459_v11  ;;  %8481 = vst [vmem:[#allocation156_spill] sm:$0xff] %v5461_v24 }
 0x161   : > { %1158 = vrot.lane.b32.xlu1 %v4528_v52, %s4377_s12  ;;  %1160 = vrot.lane.b32.xlu0 %v4555_v6, %s4377_s12 }
 0x163   : > { %v5467_v54 = vpop.permute.xlu1 %977  ;;  %v5469_v18 = vpop.permute.xlu0 %979 }
 0x164   : > { %8482 = vst [vmem:[#allocation157_spill] sm:$0xff] %v5467_v54  ;;  %8483 = vst [vmem:[#allocation158_spill] sm:$0xff] %v5469_v18 }
 0x165   : > { %1162 = vrot.lane.b32.xlu1 %v4559_v9, %s4377_s12  ;;  %1164 = vrot.lane.b32.xlu0 %v4576_v19, %s4377_s12 }
 0x167   : > { %v5475_v28 = vpop.permute.xlu1 %981  ;;  %v5477_v11 = vpop.permute.xlu0 %983 }
 0x168   : > { %8484 = vst [vmem:[#allocation159_spill] sm:$0xff] %v5475_v28  ;;  %8485 = vst [vmem:[#allocation160_spill] sm:$0xff] %v5477_v11  ;;  %v1685_v11 = vld [vmem:[%s8054_s1] sm:$0xff]  ;;  %v1686_v28 = vld [vmem:[%s8054_s1 + $0x8] sm:$0xff] }
 0x169   : > { %1166 = vrot.lane.b32.xlu1 %v4582_v27, %s4377_s12  ;;  %1168 = vrot.lane.b32.xlu0 %v4590_v35, %s4377_s12  ;;  %v4298_v18 = vpack.c.bf16 %v1686_v28, %v1685_v11 }
 0x16b   : > { %v5483_v24 = vpop.permute.xlu1 %985  ;;  %v5485_v54 = vpop.permute.xlu0 %987  ;;  %4299 = vmatprep.subr.bf16.mxu0 %v4298_v18 }
 0x16c   : > { %8486 = vst [vmem:[#allocation161_spill] sm:$0xff] %v5483_v24  ;;  %8487 = vst [vmem:[#allocation162_spill] sm:$0xff] %v5485_v54  ;;  %v1687_v54 = vld [vmem:[%s8054_s1 + $0x10] sm:$0xff]  ;;  %4301 = vmatpush3.bf16.msra.mxu0 %v4298_v18 }
 0x16d   : > { %1170 = vrot.lane.b32.xlu1 %v4599_v41, %s4377_s12  ;;  %1172 = vrot.lane.b32.xlu0 %v4628_v61, %s4377_s12  ;;  %v1688_v61 = vld [vmem:[%s8054_s1 + $0x18] sm:$0xff]  ;;  %v8561_v41 = vld [vmem:[#allocation62_spill] sm:$0xff] }
 0x16e   : > { %v4302_v28 = vpack.c.bf16 %v1688_v61, %v1687_v54  ;;  %v1689_v61 = vld [vmem:[%s8054_s1 + $0x20] sm:$0xf] }
 0x16f   : > { %v5497_v35 = vpop.permute.xlu1 %989  ;;  %v5499_v24 = vpop.permute.xlu0 %991 }
 0x170   : > { %8488 = vst [vmem:[#allocation163_spill] sm:$0xff] %v5497_v35  ;;  %8489 = vst [vmem:[#allocation164_spill] sm:$0xff] %v5499_v24  ;;  %4303 = vmatprep.subr.bf16.mxu0 %v4302_v28 }
 0x171   : > { %1174 = vrot.lane.b32.xlu1 %v4625_v60, %s4377_s12  ;;  %1176 = vrot.lane.b32.xlu0 %v4654_v36, %s4377_s12 }
 0x172   : > { %4305 = vmatpush3.bf16.msra.mxu0 %v4302_v28 }
 0x173   : > { %v5511_v11 = vpop.permute.xlu1 %993  ;;  %v5513_v24 = vpop.permute.xlu0 %995  ;;  %4190 = vmatprep.subr.msk.mxu0 %vm1787_vm3, %v1689_v61 }
 0x174   : > { %8490 = vst [vmem:[#allocation165_spill] sm:$0xff] %v5511_v11  ;;  %8491 = vst [vmem:[#allocation166_spill] sm:$0xff] %v5513_v24  ;;  %v8515_v24 = vld [vmem:[#allocation19_spill] sm:$0xff]  ;;  %v8531_v11 = vld [vmem:[#allocation56_spill] sm:$0xff] }
 0x175   : > { %1178 = vrot.lane.b32.xlu1 %v4651_v33, %s4377_s12  ;;  %1180 = vrot.lane.b32.xlu0 %v4673_v2, %s4377_s12  ;;  %v8538_v33 = vld [vmem:[#allocation33_spill] sm:$0xff] }
 0x176   : > { %4191 = vmatpush3.msk.msra.mxu0 %vm1787_vm3, %v1689_v61 }
 0x177   : > { %v5519_v35 = vpop.permute.xlu1 %997  ;;  %v5521_v36 = vpop.permute.xlu0 %999 }
 0x178   : > { %8492 = vst [vmem:[#allocation167_spill] sm:$0xff] %v5519_v35  ;;  %8493 = vst [vmem:[#allocation168_spill] sm:$0xff] %v5521_v36 }
 0x179   : > { %1182 = vrot.lane.b32.xlu1 %v4677_v7, %s4377_s12  ;;  %1184 = vrot.lane.b32.xlu0 %v4695_v42, %s4377_s12  ;;  %v8533_v7 = vld [vmem:[#allocation30_spill] sm:$0xff] }
 0x17b   : > { %v5532_v18 = vpop.permute.xlu1 %1001  ;;  %v5534_v54 = vpop.permute.xlu0 %1003 }
 0x17c   : > { %8494 = vst [vmem:[#allocation169_spill] sm:$0xff] %v5532_v18  ;;  %8495 = vst [vmem:[#allocation170_spill] sm:$0xff] %v5534_v54 }
 0x17d   : > { %1186 = vrot.lane.b32.xlu1 %v4701_v32, %s4377_s12  ;;  %1188 = vrot.lane.b32.xlu0 %v4722_v26, %s4377_s12  ;;  %v8508_v26 = vld [vmem:[#allocation15_spill] sm:$0xff]  ;;  %v8512_v32 = vld [vmem:[#allocation50_spill] sm:$0xff] }
 0x17f   : > { %v5540_v28 = vpop.permute.xlu1 %1005  ;;  %v5542_v36 = vpop.permute.xlu0 %1007 }
 0x180   : > { %8496 = vst [vmem:[#allocation171_spill] sm:$0xff] %v5540_v28  ;;  %8497 = vst [vmem:[#allocation172_spill] sm:$0xff] %v5542_v36 }
 0x181   : > { %1237 = vrot.lane.b32.xlu1 %v4494_v34, %s4378_s23  ;;  %1239 = vrot.lane.b32.xlu0 %v4502_v38, %s4378_s23 }
 0x183   : > { %v5548_v61 = vpop.permute.xlu1 %1009  ;;  %v5550_v54 = vpop.permute.xlu0 %1048 }
 0x184   : > { %8498 = vst [vmem:[#allocation173_spill] sm:$0xff] %v5548_v61  ;;  %v8502_v61 = vld [vmem:[#allocation11_spill] sm:$0xff] }
 0x185   : > { %1330 = vrot.lane.b32.xlu1 %v8435_v14, %s4379_s28  ;;  %1332 = vrot.lane.b32.xlu0 %v4833_v0, %s4379_s28 }
 0x187   : > { %v5556_v28 = vpop.permute.xlu1 %1050  ;;  %v5558_v36 = vpop.permute.xlu0 %1052 }
 0x189   : > { %1241 = vrot.lane.b32.xlu1 %v4507_v45, %s4378_s23  ;;  %1243 = vrot.lane.b32.xlu0 %v4524_v50, %s4378_s23 }
 0x18b   : > { %v5564_v34 = vpop.permute.xlu1 %1054  ;;  %v5566_v38 = vpop.permute.xlu0 %1056 }
 0x18d   : > { %1334 = vrot.lane.b32.xlu1 %v8438_v55, %s4379_s28  ;;  %1336 = vrot.lane.b32.xlu0 %v4845_v59, %s4379_s28 }
 0x18f   : > { %v5572_v0 = vpop.permute.xlu1 %1058  ;;  %v5574_v14 = vpop.permute.xlu0 %1060 }
 0x191   : > { %1245 = vrot.lane.b32.xlu1 %v4549_v4, %s4378_s23  ;;  %1247 = vrot.lane.b32.xlu0 %v4552_v5, %s4378_s23 }
 0x193   : > { %v5580_v45 = vpop.permute.xlu1 %1062  ;;  %v5582_v50 = vpop.permute.xlu0 %1064 }
 0x195   : > { %1338 = vrot.lane.b32.xlu1 %v8441_v3, %s4379_s28  ;;  %1340 = vrot.lane.b32.xlu0 %v4859_v58, %s4379_s28 }
 0x197   : > { %v5588_v55 = vpop.permute.xlu1 %1066  ;;  %v5590_v59 = vpop.permute.xlu0 %1068 }
 0x199   : > { %1249 = vrot.lane.b32.xlu1 %v8385_v22, %s4378_s23  ;;  %1251 = vrot.lane.b32.xlu0 %v8388_v37, %s4378_s23 }
 0x19b   : > { %v5596_v4 = vpop.permute.xlu1 %1070  ;;  %v5598_v5 = vpop.permute.xlu0 %1072 }
 0x19d   : > { %1342 = vrot.lane.b32.xlu1 %v8444_v44, %s4379_s28  ;;  %1344 = vrot.lane.b32.xlu0 %v4872_v57, %s4379_s28 }
 0x19f   : > { %v5604_v58 = vpop.permute.xlu1 %1074  ;;  %v5606_v3 = vpop.permute.xlu0 %1076 }
 0x1a1   : > { %1253 = vrot.lane.b32.xlu1 %v8389_v49, %s4378_s23  ;;  %1255 = vrot.lane.b32.xlu0 %v8392_v48, %s4378_s23  ;;  %v8503_v49 = vld [vmem:[#allocation12_spill] sm:$0xff] }
 0x1a3   : > { %v5612_v22 = vpop.permute.xlu1 %1078  ;;  %v5614_v37 = vpop.permute.xlu0 %1080 }
 0x1a4   : > { %8499 = vst [vmem:[#allocation174_spill] sm:$0xff] %v5614_v37 }
 0x1a5   : > { %1346 = vrot.lane.b32.xlu1 %v8447_v29, %s4379_s28  ;;  %1348 = vrot.lane.b32.xlu0 %v4885_v10, %s4379_s28 }
 0x1a7   : > { %v5620_v44 = vpop.permute.xlu1 %1082  ;;  %v5622_v57 = vpop.permute.xlu0 %1084 }
 0x1a8   : > { %8500 = vst [vmem:[#allocation175_spill] sm:$0xff] %v5620_v44  ;;  %8501 = vst [vmem:[#allocation176_spill] sm:$0xff] %v5622_v57  ;;  %v8542_v57 = vld [vmem:[#allocation40_spill] sm:$0xff] }
 0x1a9   : > { %1257 = vrot.lane.b32.xlu1 %v8502_v61, %s4378_s23  ;;  %1259 = vrot.lane.b32.xlu0 %v8503_v49, %s4378_s23  ;;  %v8509_v61 = vld [vmem:[#allocation16_spill] sm:$0xff] }
 0x1ab   : > { %v5628_v48 = vpop.permute.xlu1 %1086  ;;  %v5630_v18 = vpop.permute.xlu0 %1088 }
 0x1ac   : > { %8504 = vst [vmem:[#allocation11_spill] sm:$0xff] %v5628_v48  ;;  %8505 = vst [vmem:[#allocation12_spill] sm:$0xff] %v5630_v18 }
 0x1ad   : > { %1350 = vrot.lane.b32.xlu1 %v8450_v43, %s4379_s28  ;;  %1352 = vrot.lane.b32.xlu0 %v4898_v30, %s4379_s28 }
 0x1af   : > { %v5636_v10 = vpop.permute.xlu1 %1090  ;;  %v5638_v29 = vpop.permute.xlu0 %1092 }
 0x1b0   : > { %8506 = vst [vmem:[#allocation177_spill] sm:$0xff] %v5636_v10  ;;  %8507 = vst [vmem:[#allocation178_spill] sm:$0xff] %v5638_v29  ;;  %v8535_v10 = vld [vmem:[#allocation36_spill] sm:$0xff] }
 0x1b1   : > { %1261 = vrot.lane.b32.xlu1 %v8508_v26, %s4378_s23  ;;  %1263 = vrot.lane.b32.xlu0 %v8509_v61, %s4378_s23  ;;  %v8516_v26 = vld [vmem:[#allocation20_spill] sm:$0xff] }
 0x1b3   : > { %v5644_v49 = vpop.permute.xlu1 %1094  ;;  %v5646_v35 = vpop.permute.xlu0 %1096 }
 0x1b4   : > { %8510 = vst [vmem:[#allocation15_spill] sm:$0xff] %v5644_v49  ;;  %8511 = vst [vmem:[#allocation16_spill] sm:$0xff] %v5646_v35  ;;  %v8519_v35 = vld [vmem:[#allocation51_spill] sm:$0xff] }
 0x1b5   : > { %1354 = vrot.lane.b32.xlu1 %v8512_v32, %s4379_s28  ;;  %1356 = vrot.lane.b32.xlu0 %v4910_v39, %s4379_s28  ;;  %v8520_v32 = vld [vmem:[#allocation52_spill] sm:$0xff] }
 0x1b7   : > { %v5652_v30 = vpop.permute.xlu1 %1098  ;;  %v5654_v43 = vpop.permute.xlu0 %1100 }
 0x1b8   : > { %8513 = vst [vmem:[#allocation50_spill] sm:$0xff] %v5652_v30  ;;  %8514 = vst [vmem:[#allocation179_spill] sm:$0xff] %v5654_v43  ;;  %v8523_v43 = vld [vmem:[#allocation23_spill] sm:$0xff] }
 0x1b9   : > { %1265 = vrot.lane.b32.xlu1 %v8515_v24, %s4378_s23  ;;  %1267 = vrot.lane.b32.xlu0 %v8516_v26, %s4378_s23  ;;  %v8524_v24 = vld [vmem:[#allocation25_spill] sm:$0xff] }
 0x1bb   : > { %v5660_v61 = vpop.permute.xlu1 %1102  ;;  %v5662_v42 = vpop.permute.xlu0 %1104 }
 0x1bc   : > { %8517 = vst [vmem:[#allocation19_spill] sm:$0xff] %v5660_v61  ;;  %8518 = vst [vmem:[#allocation20_spill] sm:$0xff] %v5662_v42  ;;  %v8526_v42 = vld [vmem:[#allocation53_spill] sm:$0xff] }
 0x1bd   : > { %1358 = vrot.lane.b32.xlu1 %v8519_v35, %s4379_s28  ;;  %1360 = vrot.lane.b32.xlu0 %v8520_v32, %s4379_s28 }
 0x1bf   : > { %v5668_v39 = vpop.permute.xlu1 %1106  ;;  %v5670_v30 = vpop.permute.xlu0 %1108 }
 0x1c0   : > { %8521 = vst [vmem:[#allocation51_spill] sm:$0xff] %v5668_v39  ;;  %8522 = vst [vmem:[#allocation52_spill] sm:$0xff] %v5670_v30  ;;  %v8527_v30 = vld [vmem:[#allocation27_spill] sm:$0xff] }
 0x1c1   : > { %1269 = vrot.lane.b32.xlu1 %v8523_v43, %s4378_s23  ;;  %1271 = vrot.lane.b32.xlu0 %v8524_v24, %s4378_s23  ;;  %v8528_v43 = vld [vmem:[#allocation28_spill] sm:$0xff]  ;;  %v8529_v39 = vld [vmem:[#allocation31_spill] sm:$0xff] }
 0x1c3   : > { %v5676_v26 = vpop.permute.xlu1 %1110  ;;  %v5678_v61 = vpop.permute.xlu0 %1144 }
 0x1c4   : > { %8525 = vst [vmem:[#allocation23_spill] sm:$0xff] %v5676_v26 }
 0x1c5   : > { %1362 = vrot.lane.b32.xlu1 %v8526_v42, %s4379_s28  ;;  %1364 = vrot.lane.b32.xlu0 %v4937_v40, %s4379_s28 }
 0x1c7   : > { %v5684_v35 = vpop.permute.xlu1 %1146  ;;  %v5686_v32 = vpop.permute.xlu0 %1148 }
 0x1c9   : > { %1273 = vrot.lane.b32.xlu1 %v8527_v30, %s4378_s23  ;;  %1275 = vrot.lane.b32.xlu0 %v8528_v43, %s4378_s23  ;;  %v8530_v30 = vld [vmem:[#allocation32_spill] sm:$0xff] }
 0x1cb   : > { %v5692_v24 = vpop.permute.xlu1 %1150  ;;  %v5694_v26 = vpop.permute.xlu0 %1152 }
 0x1cd   : > { %1366 = vrot.lane.b32.xlu1 %v8462_v1, %s4379_s28  ;;  %1368 = vrot.lane.b32.xlu0 %v8465_v13, %s4379_s28  ;;  %v8532_v1 = vld [vmem:[#allocation57_spill] sm:$0xff] }
 0x1cf   : > { %v5700_v42 = vpop.permute.xlu1 %1154  ;;  %v5702_v40 = vpop.permute.xlu0 %1156 }
 0x1d1   : > { %1277 = vrot.lane.b32.xlu1 %v8529_v39, %s4378_s23  ;;  %1279 = vrot.lane.b32.xlu0 %v8530_v30, %s4378_s23  ;;  %v8534_v39 = vld [vmem:[#allocation35_spill] sm:$0xff] }
 0x1d3   : > { %v5708_v43 = vpop.permute.xlu1 %1158  ;;  %v5710_v49 = vpop.permute.xlu0 %1160 }
 0x1d5   : > { %1370 = vrot.lane.b32.xlu1 %v8531_v11, %s4379_s28  ;;  %1372 = vrot.lane.b32.xlu0 %v8532_v1, %s4379_s28 }
 0x1d7   : > { %v5716_v13 = vpop.permute.xlu1 %1162  ;;  %v5718_v29 = vpop.permute.xlu0 %1164 }
 0x1d9   : > { %1190 = vrot.lane.b32.xlu1 %v8533_v7, %s4377_s12  ;;  %1281 = vrot.lane.b32.xlu0 %v8534_v39, %s4378_s23  ;;  %v8536_v7 = vld [vmem:[#allocation34_spill] sm:$0xff] }
 0x1db   : > { %v5724_v30 = vpop.permute.xlu1 %1166  ;;  %v5726_v2 = vpop.permute.xlu0 %1168 }
 0x1dd   : > { %1283 = vrot.lane.b32.xlu1 %v8535_v10, %s4378_s23  ;;  %1374 = vrot.lane.b32.xlu0 %v4965_v51, %s4379_s28  ;;  %v8539_v10 = vld [vmem:[#allocation39_spill] sm:$0xff] }
 0x1df   : > { %v5732_v11 = vpop.permute.xlu1 %1170  ;;  %v5734_v1 = vpop.permute.xlu0 %1172 }
 0x1e1   : > { %1376 = vrot.lane.b32.xlu1 %v4978_v15, %s4379_s28  ;;  %1192 = vrot.lane.b32.xlu0 %v8536_v7, %s4377_s12  ;;  %v8543_v15 = vld [vmem:[#allocation59_spill] sm:$0xff] }
 0x1e3   : > { %v5740_v39 = vpop.permute.xlu1 %1174  ;;  %v5742_v18 = vpop.permute.xlu0 %1176 }
 0x1e4   : > { %8537 = vst [vmem:[#allocation25_spill] sm:$0xff] %v5742_v18 }
 0x1e5   : > { %1194 = vrot.lane.b32.xlu1 %v8538_v33, %s4377_s12  ;;  %1285 = vrot.lane.b32.xlu0 %v8539_v10, %s4378_s23  ;;  %v8546_v33 = vld [vmem:[#allocation38_spill] sm:$0xff] }
 0x1e7   : > { %v5748_v51 = vpop.permute.xlu1 %1178  ;;  %v5750_v48 = vpop.permute.xlu0 %1180 }
 0x1e8   : > { %8540 = vst [vmem:[#allocation53_spill] sm:$0xff] %v5748_v51  ;;  %8541 = vst [vmem:[#allocation27_spill] sm:$0xff] %v5750_v48  ;;  %v8554_v51 = vld [vmem:[#allocation120_spill] sm:$0xff] }
 0x1e9   : > { %1287 = vrot.lane.b32.xlu1 %v8542_v57, %s4378_s23  ;;  %1378 = vrot.lane.b32.xlu0 %v8543_v15, %s4379_s28  ;;  %v8549_v57 = vld [vmem:[#allocation58_spill] sm:$0xff] }
 0x1ea   : > { %v1424_v15 = vsel %vm1423_vm4, 0.0, %v8549_v57 }
 0x1eb   : > { %v5756_v7 = vpop.permute.xlu1 %1182  ;;  %v5758_v60 = vpop.permute.xlu0 %1184 }
 0x1ec   : > { %8544 = vst [vmem:[#allocation28_spill] sm:$0xff] %v5756_v7  ;;  %8545 = vst [vmem:[#allocation31_spill] sm:$0xff] %v5758_v60  ;;  %v8550_v7 = vld [vmem:[#allocation37_spill] sm:$0xff] }
 0x1ed   : > { %1380 = vrot.lane.b32.xlu1 %v4990_v8, %s4379_s28  ;;  %1196 = vrot.lane.b32.xlu0 %v8546_v33, %s4377_s12  ;;  %v8551_v60 = vld [vmem:[#allocation41_spill] sm:$0xff]  ;;  %v8552_v8 = vld [vmem:[#allocation91_spill] sm:$0xff] }
 0x1ee   : > { %v5776_v33 = vsel %vm1455_vm5, %v1424_v15, %v8552_v8  ;;  %v8557_v8 = vld [vmem:[#allocation42_spill] sm:$0xff] }
 0x1ef   : > { %v5764_v10 = vpop.permute.xlu1 %1186  ;;  %v5766_v48 = vpop.permute.xlu0 %1188  ;;  %8553 = vst [vmem:[#allocation57_spill] sm:$0xff] %v5776_v33 }
 0x1f0   : > { %8547 = vst [vmem:[#allocation32_spill] sm:$0xff] %v5764_v10  ;;  %8548 = vst [vmem:[#allocation56_spill] sm:$0xff] %v5766_v48  ;;  %v1488_v48 = vsel %vm1487_vm6, %v5776_v33, %v8554_v51  ;;  %v8555_v10 = vld [vmem:[#allocation121_spill] sm:$0xff] }
 0x1f1   : > { %1198 = vrot.lane.b32.xlu1 %v8550_v7, %s4377_s12  ;;  %1289 = vrot.lane.b32.xlu0 %v8551_v60, %s4378_s23  ;;  %v1489_v57 = vsel %vm1487_vm6, %v5776_v33, %v8555_v10  ;;  %v8556_v7 = vld [vmem:[#allocation146_spill] sm:$0xff]  ;;  %v8558_v10 = vld [vmem:[#allocation60_spill] sm:$0xff] }
 0x1f2   : > { %v1521_v37 = vsel %vm1520_vm7, %v1488_v48, %v8556_v7  ;;  %v1522_v60 = vsel %vm1520_vm7, %v1489_v57, %v5404_v23 }
 0x1f3   : > { %v1238_v18 = vpop.permute.xlu1 %1237  ;;  %v1240_v44 = vpop.permute.xlu0 %1239  ;;  %v1554_v15 = vsel %vm1553_vm8, %v1521_v37, %v5550_v54  ;;  %v1555_v51 = vsel %vm1553_vm8, %v1522_v60, %v5556_v28 }
 0x1f4   : > { %v1587_v7 = vsel %vm1586_vm9, %v1554_v15, %v5678_v61  ;;  %v1588_v23 = vsel %vm1586_vm9, %v1555_v51, %v5684_v35  ;;  %v8562_v61 = vld [vmem:[#allocation4_spill] sm:$0xff]  ;;  %v8565_v51 = vld [vmem:[#allocation94_spill] sm:$0xff] }
 0x1f5   : > { %1291 = vrot.lane.b32.xlu1 %v8557_v8, %s4378_s23  ;;  %1382 = vrot.lane.b32.xlu0 %v8558_v10, %s4379_s28  ;;  %v1620_v48 = vsel %vm1619_vm10, %v1587_v7, %v1238_v18  ;;  %v1621_v54 = vsel %vm1619_vm10, %v1588_v23, %v1240_v44  ;;  %v8559_v8 = vld [vmem:[#allocation61_spill] sm:$0xff]  ;;  %v8560_v10 = vld [vmem:[#allocation3_spill] sm:$0xff]  ;;  %v1425_v15 = vsel %vm1423_vm4, %v8562_v61, %v8561_v41  ;;  %v8564_v44 = vld [vmem:[#allocation92_spill] sm:$0xff] }
 0x1f6   : > { %v1426_v33 = vsel %vm1423_vm4, %v8560_v10, %v8559_v8  ;;  %v8563_v18 = vld [vmem:[#allocation93_spill] sm:$0xff]  ;;  %v1457_v35 = vsel %vm1455_vm5, %v1425_v15, %v8564_v44  ;;  %v8566_v23 = vld [vmem:[#allocation122_spill] sm:$0xff]  ;;  %v8569_v61 = vld [vmem:[#allocation96_spill] sm:$0xff] }
 0x1f7   : > { %v1331_v37 = vpop.permute.xlu1 %1330  ;;  %v1333_v57 = vpop.permute.xlu0 %1332  ;;  %v1458_v7 = vsel %vm1455_vm5, %v1426_v33, %v8565_v51  ;;  %v8570_v15 = vld [vmem:[#allocation123_spill] sm:$0xff] }
 0x1f8   : > { %v1654_v28 = vsel %vm1652_vm11, %v1621_v54, %v1333_v57  ;;  %v1653_v60 = vsel %vm1652_vm11, %v1620_v48, %v1331_v37  ;;  %v1490_v48 = vsel %vm1487_vm6, %v1457_v35, %v8566_v23  ;;  %v8567_v54 = vld [vmem:[#allocation124_spill] sm:$0xff]  ;;  %v8568_v57 = vld [vmem:[#allocation147_spill] sm:$0xff] }
 0x1f9   : > { %1384 = vrot.lane.b32.xlu1 %v5005_v12, %s4379_s28  ;;  %1200 = vrot.lane.b32.xlu0 %v8563_v18, %s4377_s12  ;;  %v1491_v41 = vsel %vm1487_vm6, %v1458_v7, %v8567_v54  ;;  %v1523_v8 = vsel %vm1520_vm7, %v1490_v48, %v8568_v57  ;;  %v8571_v7 = vld [vmem:[#allocation63_spill] sm:$0xff]  ;;  %v8572_v48 = vld [vmem:[#allocation64_spill] sm:$0xff]  ;;  %v8576_v57 = vld [vmem:[#allocation125_spill] sm:$0xff] }
 0x1fa   : > { %4192 = vmatprep.mubr.msk.f32.mxu0 %vm1690_vm12, %v1653_v60  ;;  %v1524_v10 = vsel %vm1520_vm7, %v1491_v41, %v5416_v62  ;;  %v1556_v33 = vsel %vm1553_vm8, %v1523_v8, %v5558_v36  ;;  %v1427_v23 = vsel %vm1423_vm4, %v4459_v17, %v8571_v7  ;;  %v8574_v54 = vld [vmem:[#allocation95_spill] sm:$0xff] }
 0x1fb   : > { %4193 = vmatmul.mubr.msk.f32.vlgmr.msra.gmra.mrb[0].mxu0 %vm1690_vm12, %v1654_v28  ;;  %v1242_v12 = vpop.permute.xlu1 %1241  ;;  %v1244_v37 = vpop.permute.xlu0 %1243  ;;  %v1557_v60 = vsel %vm1553_vm8, %v1524_v10, %v5564_v34  ;;  %v1589_v28 = vsel %vm1586_vm9, %v1556_v33, %v5686_v32  ;;  %v1428_v32 = vsel %vm1423_vm4, %v4465_v21, %v8572_v48  ;;  %v1459_v41 = vsel %vm1455_vm5, %v1427_v23, %v8574_v54  ;;  %v8577_v8 = vld [vmem:[#allocation127_spill] sm:$0xff] }
 0x1fc   : > { %v1590_v18 = vsel %vm1586_vm9, %v1557_v60, %v5692_v24  ;;  %v1622_v62 = vsel %vm1619_vm10, %v1589_v28, %v1242_v12  ;;  %v8573_v24 = vld [vmem:[#allocation126_spill] sm:$0xff]  ;;  %v8575_v12 = vld [vmem:[#allocation97_spill] sm:$0xff]  ;;  %v1492_v17 = vsel %vm1487_vm6, %v1459_v41, %v8576_v57  ;;  %v8578_v28 = vmov 0.0   ;;  %v8583_v23 = vld [vmem:[#allocation99_spill] sm:$0xff] }
 0x1fd   : > { %1202 = vrot.lane.b32.xlu1 %v8569_v61, %s4377_s12  ;;  %1293 = vrot.lane.b32.xlu0 %v8570_v15, %s4378_s23  ;;  %v1623_v44 = vsel %vm1619_vm10, %v1590_v18, %v1244_v37  ;;  %v1460_v37 = vsel %vm1455_vm5, %v1428_v32, %v8575_v12  ;;  %v8584_v32 = vld [vmem:[#allocation43_spill] sm:$0xff] }
 0x1fe   : > { %v1493_v21 = vsel %vm1487_vm6, %v1460_v37, %v8577_v8  ;;  %v8587_v37 = vld [vmem:[#allocation148_spill] sm:$0xff] }
 0x1ff   : > { %v1335_v36 = vpop.permute.xlu1 %1334  ;;  %v1337_v35 = vpop.permute.xlu0 %1336  ;;  %v1526_v60 = vsel %vm1520_vm7, %v1493_v21, %v5427_v53 }
 0x200   : > { %v1655_v34 = vsel %vm1652_vm11, %v1622_v62, %v1335_v36  ;;  %v1656_v51 = vsel %vm1652_vm11, %v1623_v44, %v1337_v35  ;;  %v1559_v15 = vsel %vm1553_vm8, %v1526_v60, %v5572_v0 }
 0x201   : > { %1295 = vrot.lane.b32.xlu1 %v8573_v24, %s4378_s23  ;;  %1386 = vrot.lane.b32.xlu0 %v5413_v16, %s4379_s28  ;;  %v1525_v16 = vsel %vm1520_vm7, %v1492_v17, %v5418_v63  ;;  %v1592_v63 = vsel %vm1586_vm9, %v1559_v15, %v5700_v42  ;;  %v8581_v42 = vld [vmem:[#allocation2_spill] sm:$0xff]  ;;  %v8588_v17 = vld [vmem:[#allocation149_spill] sm:$0xff] }
 0x202   : > { %4195 = vmatprep.mubr.msk.f32.mxu0 %vm1690_vm12, %v1655_v34  ;;  %v1558_v61 = vsel %vm1553_vm8, %v1525_v16, %v5566_v38  ;;  %v8580_v34 = vld [vmem:[#allocation66_spill] sm:$0xff] }
 0x203   : > { %4196 = vmatmul.mubr.msk.f32.gmra.mrb[2].mxu0 %vm1690_vm12, %v1656_v51  ;;  %v1246_v10 = vpop.permute.xlu1 %1245  ;;  %v1248_v33 = vpop.permute.xlu0 %1247  ;;  %v1591_v18 = vsel %vm1586_vm9, %v1558_v61, %v5694_v26  ;;  %v1430_v26 = vsel %vm1423_vm4, %v4473_v25, %v8580_v34  ;;  %v8582_v51 = vld [vmem:[#allocation98_spill] sm:$0xff]  ;;  %v8586_v25 = vld [vmem:[#allocation129_spill] sm:$0xff] }
 0x204   : > { %v1624_v53 = vsel %vm1619_vm10, %v1591_v18, %v1246_v10  ;;  %v1625_v62 = vsel %vm1619_vm10, %v1592_v63, %v1248_v33  ;;  %v1462_v48 = vsel %vm1455_vm5, %v1430_v26, %v8583_v23  ;;  %v8595_v26 = vld [vmem:[#allocation150_spill] sm:$0xff] }
 0x205   : > { %1388 = vrot.lane.b32.xlu1 %v5425_v20, %s4379_s28  ;;  %1204 = vrot.lane.b32.xlu0 %v8578_v28, %s4377_s12  ;;  %v8579_v20 = vld [vmem:[#allocation65_spill] sm:$0xff]  ;;  %v1495_v54 = vsel %vm1487_vm6, %v1462_v48, %v8586_v25 }
 0x206   : > { %v1429_v35 = vsel %vm1423_vm4, %v4485_v31, %v8579_v20  ;;  %v8585_v31 = vld [vmem:[#allocation128_spill] sm:$0xff]  ;;  %v1528_v8 = vsel %vm1520_vm7, %v1495_v54, %v8588_v17  ;;  %v8600_v17 = vld [vmem:[#allocation103_spill] sm:$0xff] }
 0x207   : > { %v1339_v38 = vpop.permute.xlu1 %1338  ;;  %v1341_v44 = vpop.permute.xlu0 %1340  ;;  %v1461_v7 = vsel %vm1455_vm5, %v1429_v35, %v8582_v51  ;;  %v1561_v10 = vsel %vm1553_vm8, %v1528_v8, %v5580_v45  ;;  %v8594_v20 = vld [vmem:[#allocation44_spill] sm:$0xff] }
 0x208   : > { %v1657_v0 = vsel %vm1652_vm11, %v1624_v53, %v1339_v38  ;;  %v1658_v36 = vsel %vm1652_vm11, %v1625_v62, %v1341_v44  ;;  %v1494_v24 = vsel %vm1487_vm6, %v1461_v7, %v8585_v31  ;;  %v1594_v16 = vsel %vm1586_vm9, %v1561_v10, %v5708_v43  ;;  %v8590_v53 = vld [vmem:[#allocation68_spill] sm:$0xff]  ;;  %v8592_v38 = vld [vmem:[#allocation101_spill] sm:$0xff] }
 0x209   : > { %1297 = vrot.lane.b32.xlu1 %v8581_v42, %s4378_s23  ;;  %4198 = vmatprep.mubr.msk.f32.mxu0 %vm1690_vm12, %v1657_v0  ;;  %v1527_v57 = vsel %vm1520_vm7, %v1494_v24, %v8587_v37  ;;  %v8591_v43 = vld [vmem:[#allocation100_spill] sm:$0xff]  ;;  %v8593_v0 = vld [vmem:[#allocation130_spill] sm:$0xff]  ;;  %v8596_v42 = vld [vmem:[#allocation151_spill] sm:$0xff] }
 0x20a   : > { %1390 = vrot.lane.b32.xlu0 %v8584_v32, %s4379_s28  ;;  %4199 = vmatmul.mubr.msk.f32.gmra.mrb[4].mxu0 %vm1690_vm12, %v1658_v36  ;;  %v1560_v21 = vsel %vm1553_vm8, %v1527_v57, %v5574_v14  ;;  %v8589_v14 = vld [vmem:[#allocation67_spill] sm:$0xff]  ;;  %v8598_v37 = vld [vmem:[#allocation70_spill] sm:$0xff] }
 0x20b   : > { %v1250_v41 = vpop.permute.xlu1 %1249  ;;  %v1252_v12 = vpop.permute.xlu0 %1251  ;;  %v1593_v33 = vsel %vm1586_vm9, %v1560_v21, %v5702_v40  ;;  %v1431_v45 = vsel %vm1423_vm4, %v4513_v47, %v8589_v14  ;;  %v1432_v40 = vsel %vm1423_vm4, %v4510_v46, %v8590_v53  ;;  %v8601_v21 = vld [vmem:[#allocation131_spill] sm:$0xff] }
 0x20c   : > { %v1626_v60 = vsel %vm1619_vm10, %v1593_v33, %v1250_v41  ;;  %v1627_v61 = vsel %vm1619_vm10, %v1594_v16, %v1252_v12  ;;  %v1463_v62 = vsel %vm1455_vm5, %v1431_v45, %v8591_v43  ;;  %v1464_v44 = vsel %vm1455_vm5, %v1432_v40, %v8592_v38  ;;  %v8602_v33 = vld [vmem:[#allocation45_spill] sm:$0xff] }
 0x20d   : > { %v1496_v36 = vsel %vm1487_vm6, %v1463_v62, %v8593_v0  ;;  %v1497_v47 = vsel %vm1487_vm6, %v1464_v44, %v8594_v20  ;;  %v8606_v0 = vld [vmem:[#allocation72_spill] sm:$0xff]  ;;  %v8608_v20 = vld [vmem:[#allocation105_spill] sm:$0xff] }
 0x20e   : > { %v1529_v46 = vsel %vm1520_vm7, %v1496_v36, %v8595_v26  ;;  %v1530_v51 = vsel %vm1520_vm7, %v1497_v47, %v8596_v42  ;;  %v8610_v26 = vld [vmem:[#allocation46_spill] sm:$0xff] }
 0x20f   : > { %v1343_v15 = vpop.permute.xlu1 %1342  ;;  %v1345_v28 = vpop.permute.xlu0 %1344  ;;  %v1562_v7 = vsel %vm1553_vm8, %v1529_v46, %v5582_v50  ;;  %v1563_v23 = vsel %vm1553_vm8, %v1530_v51, %v5588_v55  ;;  %v8597_v50 = vld [vmem:[#allocation69_spill] sm:$0xff]  ;;  %v8611_v51 = vld [vmem:[#allocation154_spill] sm:$0xff] }
 0x210   : > { %v1659_v18 = vsel %vm1652_vm11, %v1626_v60, %v1343_v15  ;;  %v1660_v63 = vsel %vm1652_vm11, %v1627_v61, %v1345_v28  ;;  %v1595_v48 = vsel %vm1586_vm9, %v1562_v7, %v5710_v49  ;;  %v1596_v32 = vsel %vm1586_vm9, %v1563_v23, %v5716_v13  ;;  %v8599_v13 = vld [vmem:[#allocation102_spill] sm:$0xff]  ;;  %v8603_v61 = vld [vmem:[#allocation152_spill] sm:$0xff]  ;;  %v8604_v15 = vld [vmem:[#allocation153_spill] sm:$0xff] }
 0x211   : > { %4201 = vmatprep.mubr.msk.f32.mxu0 %vm1690_vm12, %v1659_v18  ;;  %v1433_v55 = vsel %vm1423_vm4, %v4533_v56, %v8597_v50  ;;  %v1434_v49 = vsel %vm1423_vm4, %v4528_v52, %v8598_v37  ;;  %v8612_v7 = vld [vmem:[#allocation155_spill] sm:$0xff]  ;;  %v8614_v37 = vld [vmem:[#allocation74_spill] sm:$0xff] }
 0x212   : > { %4202 = vmatmul.mubr.msk.f32.gmra.mrb[6].mxu0 %vm1690_vm12, %v1660_v63  ;;  %v1465_v57 = vsel %vm1455_vm5, %v1433_v55, %v8599_v13  ;;  %v1466_v8 = vsel %vm1455_vm5, %v1434_v49, %v8600_v17  ;;  %v8616_v13 = vld [vmem:[#allocation5_spill] sm:$0xff] }
 0x213   : > { %v1254_v35 = vpop.permute.xlu1 %1253  ;;  %v1256_v34 = vpop.permute.xlu0 %1255  ;;  %v1498_v10 = vsel %vm1487_vm6, %v1465_v57, %v8601_v21  ;;  %v1499_v56 = vsel %vm1487_vm6, %v1466_v8, %v8602_v33  ;;  %v8617_v17 = vld [vmem:[#allocation133_spill] sm:$0xff]  ;;  %v8618_v21 = vld [vmem:[#allocation47_spill] sm:$0xff] }
 0x214   : > { %v1628_v31 = vsel %vm1619_vm10, %v1595_v48, %v1254_v35  ;;  %v1629_v24 = vsel %vm1619_vm10, %v1596_v32, %v1256_v34  ;;  %v1531_v52 = vsel %vm1520_vm7, %v1498_v10, %v8603_v61  ;;  %v1532_v28 = vsel %vm1520_vm7, %v1499_v56, %v8604_v15  ;;  %v8609_v35 = vld [vmem:[#allocation132_spill] sm:$0xff] }
 0x215   : > { %v1564_v18 = vsel %vm1553_vm8, %v1531_v52, %v5590_v59  ;;  %v1565_v63 = vsel %vm1553_vm8, %v1532_v28, %v5596_v4  ;;  %v8605_v59 = vld [vmem:[#allocation71_spill] sm:$0xff]  ;;  %v8619_v56 = vld [vmem:[#allocation156_spill] sm:$0xff] }
 0x216   : > { %v1597_v14 = vsel %vm1586_vm9, %v1564_v18, %v5718_v29  ;;  %v1598_v45 = vsel %vm1586_vm9, %v1565_v63, %v5724_v30  ;;  %v1435_v4 = vsel %vm1423_vm4, %v4555_v6, %v8605_v59  ;;  %v1436_v29 = vsel %vm1423_vm4, %v4559_v9, %v8606_v0  ;;  %v8607_v30 = vld [vmem:[#allocation104_spill] sm:$0xff]  ;;  %v8626_v59 = vld [vmem:[#allocation6_spill] sm:$0xff] }
 0x217   : > { %v1347_v25 = vpop.permute.xlu1 %1346  ;;  %v1349_v54 = vpop.permute.xlu0 %1348  ;;  %v1467_v36 = vsel %vm1455_vm5, %v1435_v4, %v8607_v30  ;;  %v1468_v47 = vsel %vm1455_vm5, %v1436_v29, %v8608_v20  ;;  %v8627_v0 = vld [vmem:[#allocation134_spill] sm:$0xff]  ;;  %v8628_v30 = vld [vmem:[#allocation48_spill] sm:$0xff] }
 0x218   : > { %v1661_v41 = vsel %vm1652_vm11, %v1628_v31, %v1347_v25  ;;  %v1662_v12 = vsel %vm1652_vm11, %v1629_v24, %v1349_v54  ;;  %v1500_v34 = vsel %vm1487_vm6, %v1467_v36, %v8609_v35  ;;  %v1501_v6 = vsel %vm1487_vm6, %v1468_v47, %v8610_v26  ;;  %v8629_v35 = vld [vmem:[#allocation158_spill] sm:$0xff]  ;;  %v8630_v26 = vld [vmem:[#allocation159_spill] sm:$0xff] }
 0x219   : > { %4204 = vmatprep.mubr.msk.f32.mxu0 %vm1690_vm12, %v1661_v41  ;;  %v1533_v9 = vsel %vm1520_vm7, %v1500_v34, %v8611_v51  ;;  %v1534_v23 = vsel %vm1520_vm7, %v1501_v6, %v8612_v7  ;;  %v8632_v51 = vld [vmem:[#allocation175_spill] sm:$0xff]  ;;  %v8633_v7 = vld [vmem:[#allocation25_spill] sm:$0xff] }
 0x21a   : > { %4205 = vmatmul.mubr.msk.f32.gmra.mrb[8].mxu0 %vm1690_vm12, %v1662_v12  ;;  %v1566_v48 = vsel %vm1553_vm8, %v1533_v9, %v5598_v5  ;;  %v1567_v32 = vsel %vm1553_vm8, %v1534_v23, %v5604_v58  ;;  %v8613_v5 = vld [vmem:[#allocation73_spill] sm:$0xff] }
 0x21b   : > { %v1258_v16 = vpop.permute.xlu1 %1257  ;;  %v1260_v60 = vpop.permute.xlu0 %1259  ;;  %v1599_v31 = vsel %vm1586_vm9, %v1566_v48, %v5726_v2  ;;  %v1600_v24 = vsel %vm1586_vm9, %v1567_v32, %v5732_v11  ;;  %v1437_v58 = vsel %vm1423_vm4, %v4576_v19, %v8613_v5  ;;  %v1438_v2 = vsel %vm1423_vm4, %v4582_v27, %v8614_v37  ;;  %v8615_v11 = vld [vmem:[#allocation106_spill] sm:$0xff]  ;;  %v8634_v48 = vld [vmem:[#allocation53_spill] sm:$0xff] }
 0x21c   : > { %v1630_v53 = vsel %vm1619_vm10, %v1597_v14, %v1258_v16  ;;  %v1631_v40 = vsel %vm1619_vm10, %v1598_v45, %v1260_v60  ;;  %v1469_v49 = vsel %vm1455_vm5, %v1437_v58, %v8615_v11  ;;  %v1470_v57 = vsel %vm1455_vm5, %v1438_v2, %v8616_v13  ;;  %v8620_v16 = vld [vmem:[#allocation157_spill] sm:$0xff]  ;;  %v8637_v58 = vld [vmem:[#allocation78_spill] sm:$0xff] }
 0x21d   : > { %v1502_v8 = vsel %vm1487_vm6, %v1469_v49, %v8617_v17  ;;  %v1503_v19 = vsel %vm1487_vm6, %v1470_v57, %v8618_v21  ;;  %v8638_v37 = vld [vmem:[#allocation13_spill] sm:$0xff]  ;;  %v8640_v13 = vld [vmem:[#allocation10_spill] sm:$0xff]  ;;  %v8641_v17 = vld [vmem:[#allocation135_spill] sm:$0xff] }
 0x21e   : > { %v1535_v27 = vsel %vm1520_vm7, %v1502_v8, %v8619_v56  ;;  %v1536_v60 = vsel %vm1520_vm7, %v1503_v19, %v8620_v16  ;;  %v1442_v2 = vsel %vm1423_vm4, %v8638_v37, %v8637_v58  ;;  %v8639_v11 = vld [vmem:[#allocation9_spill] sm:$0xff]  ;;  %v8643_v56 = vld [vmem:[#allocation160_spill] sm:$0xff] }
 0x21f   : > { %v1351_v43 = vpop.permute.xlu1 %1350  ;;  %v1353_v62 = vpop.permute.xlu0 %1352  ;;  %v1568_v61 = vsel %vm1553_vm8, %v1535_v27, %v5606_v3  ;;  %v1569_v52 = vsel %vm1553_vm8, %v1536_v60, %v5612_v22  ;;  %v8621_v3 = vld [vmem:[#allocation75_spill] sm:$0xff]  ;;  %v1474_v57 = vsel %vm1455_vm5, %v1442_v2, %v8640_v13  ;;  %v8642_v21 = vld [vmem:[#allocation49_spill] sm:$0xff] }
 0x220   : > { %v1663_v38 = vsel %vm1652_vm11, %v1630_v53, %v1351_v43  ;;  %v1664_v44 = vsel %vm1652_vm11, %v1631_v40, %v1353_v62  ;;  %v1601_v15 = vsel %vm1586_vm9, %v1568_v61, %v5734_v1  ;;  %v1602_v28 = vsel %vm1586_vm9, %v1569_v52, %v5740_v39  ;;  %v8622_v43 = vld [vmem:[#allocation7_spill] sm:$0xff]  ;;  %v8623_v62 = vld [vmem:[#allocation76_spill] sm:$0xff]  ;;  %v8644_v16 = vld [vmem:[#allocation161_spill] sm:$0xff] }
 0x221   : > { %4207 = vmatprep.mubr.msk.f32.mxu0 %vm1690_vm12, %v1663_v38  ;;  %v1439_v22 = vsel %vm1423_vm4, %v8622_v43, %v8621_v3  ;;  %v8624_v38 = vld [vmem:[#allocation8_spill] sm:$0xff]  ;;  %v8625_v39 = vld [vmem:[#allocation107_spill] sm:$0xff]  ;;  %v1507_v19 = vsel %vm1487_vm6, %v1474_v57, %v8642_v21  ;;  %v8663_v37 = vld [vmem:[#allocation81_spill] sm:$0xff] }
 0x222   : > { %4208 = vmatmul.mubr.msk.f32.gmra.mrb[10].mxu0 %vm1690_vm12, %v1664_v44  ;;  %v1440_v1 = vsel %vm1423_vm4, %v8624_v38, %v8623_v62  ;;  %v1471_v44 = vsel %vm1455_vm5, %v1439_v22, %v8625_v39  ;;  %v1540_v60 = vsel %vm1520_vm7, %v1507_v19, %v8644_v16  ;;  %v8645_v61 = vld [vmem:[#allocation176_spill] sm:$0xff]  ;;  %v8649_v38 = vld [vmem:[#allocation79_spill] sm:$0xff]  ;;  %v8664_v2 = vld [vmem:[#allocation21_spill] sm:$0xff] }
 0x223   : > { %v1262_v46 = vpop.permute.xlu1 %1261  ;;  %v1264_v42 = vpop.permute.xlu0 %1263  ;;  %v1472_v4 = vsel %vm1455_vm5, %v1440_v1, %v8626_v59  ;;  %v1504_v29 = vsel %vm1487_vm6, %v1471_v44, %v8627_v0  ;;  %v8650_v1 = vld [vmem:[#allocation18_spill] sm:$0xff]  ;;  %v8651_v44 = vld [vmem:[#allocation80_spill] sm:$0xff]  ;;  %v8652_v59 = vld [vmem:[#allocation17_spill] sm:$0xff] }
 0x224   : > { %v1632_v25 = vsel %vm1619_vm10, %v1599_v31, %v1262_v46  ;;  %v1633_v54 = vsel %vm1619_vm10, %v1600_v24, %v1264_v42  ;;  %v1505_v36 = vsel %vm1487_vm6, %v1472_v4, %v8628_v30  ;;  %v1537_v34 = vsel %vm1520_vm7, %v1504_v29, %v8629_v35  ;;  %v8631_v46 = vld [vmem:[#allocation174_spill] sm:$0xff]  ;;  %v8653_v0 = vld [vmem:[#allocation108_spill] sm:$0xff]  ;;  %v8654_v30 = vld [vmem:[#allocation109_spill] sm:$0xff] }
 0x225   : > { %v1538_v6 = vsel %vm1520_vm7, %v1505_v36, %v8630_v26  ;;  %v1570_v42 = vsel %vm1553_vm8, %v1537_v34, %v8631_v46  ;;  %v1443_v39 = vsel %vm1423_vm4, %v8650_v1, %v8649_v38  ;;  %v1444_v4 = vsel %vm1423_vm4, %v8652_v59, %v8651_v44  ;;  %v8656_v35 = vld [vmem:[#allocation137_spill] sm:$0xff]  ;;  %v8657_v46 = vld [vmem:[#allocation162_spill] sm:$0xff]  ;;  %v8667_v19 = vld [vmem:[#allocation164_spill] sm:$0xff] }
 0x226   : > { %v1571_v9 = vsel %vm1553_vm8, %v1538_v6, %v8632_v51  ;;  %v1603_v23 = vsel %vm1586_vm9, %v1570_v42, %v8633_v7  ;;  %v1475_v29 = vsel %vm1455_vm5, %v1443_v39, %v8653_v0  ;;  %v1476_v36 = vsel %vm1455_vm5, %v1444_v4, %v8654_v30  ;;  %v8658_v51 = vld [vmem:[#allocation163_spill] sm:$0xff]  ;;  %v8659_v7 = vld [vmem:[#allocation12_spill] sm:$0xff]  ;;  %v8666_v57 = vld [vmem:[#allocation138_spill] sm:$0xff] }
 0x227   : > { %v1355_v41 = vpop.permute.xlu1 %1354  ;;  %v1357_v12 = vpop.permute.xlu0 %1356  ;;  %v1604_v32 = vsel %vm1586_vm9, %v1571_v9, %v8634_v48  ;;  %v1509_v34 = vsel %vm1487_vm6, %v1476_v36, %v8656_v35  ;;  %v8660_v48 = vld [vmem:[#allocation177_spill] sm:$0xff]  ;;  %v8670_v16 = vld [vmem:[#allocation178_spill] sm:$0xff]  ;;  %v8676_v4 = vld [vmem:[#allocation83_spill] sm:$0xff] }
 0x228   : > { %v1665_v50 = vsel %vm1652_vm11, %v1632_v25, %v1355_v41  ;;  %v1666_v55 = vsel %vm1652_vm11, %v1633_v54, %v1357_v12  ;;  %v1542_v9 = vsel %vm1520_vm7, %v1509_v34, %v8658_v51  ;;  %v8677_v0 = vld [vmem:[#allocation24_spill] sm:$0xff] }
 0x229   : > { %4210 = vmatprep.mubr.msk.f32.mxu0 %vm1690_vm12, %v1665_v50  ;;  %v8635_v50 = vld [vmem:[#allocation77_spill] sm:$0xff]  ;;  %v8678_v30 = vld [vmem:[#allocation112_spill] sm:$0xff] }
 0x22a   : > { %4211 = vmatmul.mubr.msk.f32.gmra.mrb[12].mxu0 %vm1690_vm12, %v1666_v55  ;;  %v8636_v55 = vld [vmem:[#allocation14_spill] sm:$0xff] }
 0x22b   : > { %v1266_v10 = vpop.permute.xlu1 %1265  ;;  %v1268_v33 = vpop.permute.xlu0 %1267  ;;  %v1441_v5 = vsel %vm1423_vm4, %v8636_v55, %v8635_v50 }
 0x22c   : > { %v1634_v18 = vsel %vm1619_vm10, %v1601_v15, %v1266_v10  ;;  %v1635_v63 = vsel %vm1619_vm10, %v1602_v28, %v1268_v33  ;;  %v1473_v49 = vsel %vm1455_vm5, %v1441_v5, %v8639_v11  ;;  %v8646_v15 = vld [vmem:[#allocation11_spill] sm:$0xff]  ;;  %v1445_v11 = vsel %vm1423_vm4, %v8664_v2, %v8663_v37 }
 0x22d   : > { %v1506_v8 = vsel %vm1487_vm6, %v1473_v49, %v8641_v17  ;;  %v1573_v28 = vsel %vm1553_vm8, %v1540_v60, %v8646_v15  ;;  %v8665_v49 = vld [vmem:[#allocation110_spill] sm:$0xff]  ;;  %v8672_v15 = vld [vmem:[#allocation56_spill] sm:$0xff] }
 0x22e   : > { %v1539_v27 = vsel %vm1520_vm7, %v1506_v8, %v8643_v56  ;;  %v1477_v13 = vsel %vm1455_vm5, %v1445_v11, %v8665_v49  ;;  %v8669_v56 = vld [vmem:[#allocation22_spill] sm:$0xff] }
 0x22f   : > { %v1359_v14 = vpop.permute.xlu1 %1358  ;;  %v1361_v45 = vpop.permute.xlu0 %1360  ;;  %v1572_v52 = vsel %vm1553_vm8, %v1539_v27, %v8645_v61  ;;  %v1510_v17 = vsel %vm1487_vm6, %v1477_v13, %v8666_v57  ;;  %v8671_v61 = vld [vmem:[#allocation111_spill] sm:$0xff]  ;;  %v8688_v57 = vld [vmem:[#allocation85_spill] sm:$0xff] }
 0x230   : > { %v1667_v53 = vsel %vm1652_vm11, %v1634_v18, %v1359_v14  ;;  %v1668_v40 = vsel %vm1652_vm11, %v1635_v63, %v1361_v45  ;;  %v8647_v18 = vld [vmem:[#allocation27_spill] sm:$0xff]  ;;  %v8648_v14 = vld [vmem:[#allocation28_spill] sm:$0xff] }
 0x231   : > { %4213 = vmatprep.mubr.msk.f32.mxu0 %vm1690_vm12, %v1667_v53  ;;  %v1605_v63 = vsel %vm1586_vm9, %v1572_v52, %v8647_v18  ;;  %v1606_v45 = vsel %vm1586_vm9, %v1573_v28, %v8648_v14  ;;  %v8673_v18 = vld [vmem:[#allocation139_spill] sm:$0xff] }
 0x232   : > { %4214 = vmatmul.mubr.msk.f32.gmra.mrb[14].mxu0 %vm1690_vm12, %v1668_v40 }
 0x233   : > { %v1270_v20 = vpop.permute.xlu1 %1269  ;;  %v1272_v47 = vpop.permute.xlu0 %1271 }
 0x234   : > { %v1636_v31 = vsel %vm1619_vm10, %v1603_v23, %v1270_v20  ;;  %v1637_v24 = vsel %vm1619_vm10, %v1604_v32, %v1272_v47  ;;  %v8655_v20 = vld [vmem:[#allocation136_spill] sm:$0xff]  ;;  %v1575_v32 = vsel %vm1553_vm8, %v1542_v9, %v8660_v48 }
 0x235   : > { %v1508_v47 = vsel %vm1487_vm6, %v1475_v29, %v8655_v20  ;;  %v1447_v29 = vsel %vm1423_vm4, %v8677_v0, %v8676_v4  ;;  %v8679_v20 = vld [vmem:[#allocation140_spill] sm:$0xff] }
 0x236   : > { %v1541_v42 = vsel %vm1520_vm7, %v1508_v47, %v8657_v46  ;;  %v1479_v36 = vsel %vm1455_vm5, %v1447_v29, %v8678_v30  ;;  %v8681_v46 = vld [vmem:[#allocation84_spill] sm:$0xff] }
 0x237   : > { %v1363_v25 = vpop.permute.xlu1 %1362  ;;  %v1365_v54 = vpop.permute.xlu0 %1364  ;;  %v1574_v23 = vsel %vm1553_vm8, %v1541_v42, %v8659_v7  ;;  %v1512_v47 = vsel %vm1487_vm6, %v1479_v36, %v8679_v20  ;;  %v8682_v42 = vld [vmem:[#allocation26_spill] sm:$0xff]  ;;  %v8683_v9 = vld [vmem:[#allocation16_spill] sm:$0xff]  ;;  %v8700_v36 = vld [vmem:[#allocation87_spill] sm:$0xff] }
 0x238   : > { %v1669_v41 = vsel %vm1652_vm11, %v1636_v31, %v1363_v25  ;;  %v1670_v12 = vsel %vm1652_vm11, %v1637_v24, %v1365_v54  ;;  %v8661_v31 = vld [vmem:[#allocation31_spill] sm:$0xff]  ;;  %v8662_v25 = vld [vmem:[#allocation32_spill] sm:$0xff]  ;;  %v1448_v51 = vsel %vm1423_vm4, %v8682_v42, %v8681_v46  ;;  %v8701_v20 = vld [vmem:[#allocation34_spill] sm:$0xff] }
 0x239   : > { %4216 = vmatprep.mubr.msk.f32.mxu0 %vm1690_vm12, %v1669_v41  ;;  %v1607_v24 = vsel %vm1586_vm9, %v1574_v23, %v8661_v31  ;;  %v1608_v54 = vsel %vm1586_vm9, %v1575_v32, %v8662_v25  ;;  %v8684_v23 = vld [vmem:[#allocation113_spill] sm:$0xff] }
 0x23a   : > { %4217 = vmatmul.mubr.msk.f32.gmra.mrb[16].mxu0 %vm1690_vm12, %v1670_v12  ;;  %v1480_v48 = vsel %vm1455_vm5, %v1448_v51, %v8684_v23  ;;  %v8685_v31 = vld [vmem:[#allocation141_spill] sm:$0xff]  ;;  %v8704_v51 = vld [vmem:[#allocation170_spill] sm:$0xff] }
 0x23b   : > { %v1274_v10 = vpop.permute.xlu1 %1273  ;;  %v1276_v33 = vpop.permute.xlu0 %1275  ;;  %v8706_v23 = vld [vmem:[#allocation33_spill] sm:$0xff] }
 0x23c   : > { %v1638_v53 = vsel %vm1619_vm10, %v1605_v63, %v1274_v10  ;;  %v1639_v40 = vsel %vm1619_vm10, %v1606_v45, %v1276_v33  ;;  %v1543_v10 = vsel %vm1520_vm7, %v1510_v17, %v8667_v19  ;;  %v8668_v33 = vld [vmem:[#allocation82_spill] sm:$0xff]  ;;  %v8689_v17 = vld [vmem:[#allocation29_spill] sm:$0xff] }
 0x23d   : > { %v1446_v27 = vsel %vm1423_vm4, %v8669_v56, %v8668_v33  ;;  %v1576_v60 = vsel %vm1553_vm8, %v1543_v10, %v8670_v16  ;;  %v8691_v10 = vld [vmem:[#allocation142_spill] sm:$0xff]  ;;  %v8692_v16 = vld [vmem:[#allocation168_spill] sm:$0xff] }
 0x23e   : > { %v1478_v52 = vsel %vm1455_vm5, %v1446_v27, %v8671_v61  ;;  %v1609_v28 = vsel %vm1586_vm9, %v1576_v60, %v8672_v15  ;;  %v8693_v61 = vld [vmem:[#allocation86_spill] sm:$0xff] }
 0x23f   : > { %v1367_v3 = vpop.permute.xlu1 %1366  ;;  %v1369_v43 = vpop.permute.xlu0 %1368  ;;  %v1511_v63 = vsel %vm1487_vm6, %v1478_v52, %v8673_v18  ;;  %v8694_v52 = vld [vmem:[#allocation30_spill] sm:$0xff] }
 0x240   : > { %v1671_v22 = vsel %vm1652_vm11, %v1638_v53, %v1367_v3  ;;  %v1672_v62 = vsel %vm1652_vm11, %v1639_v40, %v1369_v43  ;;  %v8674_v40 = vld [vmem:[#allocation165_spill] sm:$0xff]  ;;  %v1450_v15 = vsel %vm1423_vm4, %v8694_v52, %v8693_v61 }
 0x241   : > { %4219 = vmatprep.mubr.msk.f32.mxu0 %vm1690_vm12, %v1671_v22  ;;  %v1544_v3 = vsel %vm1520_vm7, %v1511_v63, %v8674_v40  ;;  %v8675_v22 = vld [vmem:[#allocation15_spill] sm:$0xff] }
 0x242   : > { %4220 = vmatmul.mubr.msk.f32.gmra.mrb[18].mxu0 %vm1690_vm12, %v1672_v62  ;;  %v1577_v62 = vsel %vm1553_vm8, %v1544_v3, %v8675_v22  ;;  %v8696_v63 = vld [vmem:[#allocation115_spill] sm:$0xff] }
 0x243   : > { %v1278_v26 = vpop.permute.xlu1 %1277  ;;  %v1280_v6 = vpop.permute.xlu0 %1279 }
 0x244   : > { %v1640_v41 = vsel %vm1619_vm10, %v1607_v24, %v1278_v26  ;;  %v1641_v12 = vsel %vm1619_vm10, %v1608_v54, %v1280_v6  ;;  %v8680_v26 = vld [vmem:[#allocation166_spill] sm:$0xff]  ;;  %v1513_v24 = vsel %vm1487_vm6, %v1480_v48, %v8685_v31 }
 0x245   : > { %v1545_v6 = vsel %vm1520_vm7, %v1512_v47, %v8680_v26  ;;  %v1451_v47 = vsel %vm1423_vm4, %v8701_v20, %v8700_v36  ;;  %v8703_v26 = vld [vmem:[#allocation143_spill] sm:$0xff]  ;;  %v6312_v36 = vld [vmem:[%s8055_s2] ss:$0 sm:$0xff] }
 0x246   : > { %v1578_v7 = vsel %vm1553_vm8, %v1545_v6, %v8683_v9 }
 0x247   : > { %v1371_v50 = vpop.permute.xlu1 %1370  ;;  %v1373_v55 = vpop.permute.xlu0 %1372 }
 0x248   : > { %v1673_v5 = vsel %vm1652_vm11, %v1640_v41, %v1371_v50  ;;  %v1674_v58 = vsel %vm1652_vm11, %v1641_v12, %v1373_v55  ;;  %v8686_v12 = vld [vmem:[#allocation167_spill] sm:$0xff] }
 0x249   : > { %4222 = vmatprep.mubr.msk.f32.mxu0 %vm1690_vm12, %v1673_v5  ;;  %v1546_v50 = vsel %vm1520_vm7, %v1513_v24, %v8686_v12  ;;  %v8687_v5 = vld [vmem:[#allocation50_spill] sm:$0xff]  ;;  %v8708_v24 = vld [vmem:[#allocation117_spill] sm:$0xff] }
 0x24a   : > { %4223 = vmatmul.mubr.msk.f32.gmra.mrb[20].mxu0 %vm1690_vm12, %v1674_v58  ;;  %v1579_v58 = vsel %vm1553_vm8, %v1546_v50, %v8687_v5 }
 0x24b   : > { %v1191_v8 = vpop.permute.xlu1 %1190  ;;  %v1282_v21 = vpop.permute.xlu0 %1281 }
 0x24c   : > { %v1642_v14 = vsel %vm1619_vm10, %v1609_v28, %v1282_v21  ;;  %v1610_v38 = vsel %vm1586_vm9, %v1577_v62, %v1191_v8  ;;  %v1449_v8 = vsel %vm1423_vm4, %v8689_v17, %v8688_v57  ;;  %v8690_v21 = vld [vmem:[#allocation114_spill] sm:$0xff]  ;;  %v8695_v28 = vld [vmem:[#allocation179_spill] sm:$0xff]  ;;  %v8698_v62 = vld [vmem:[#allocation169_spill] sm:$0xff] }
 0x24d   : > { %v1481_v19 = vsel %vm1455_vm5, %v1449_v8, %v8690_v21  ;;  %v8713_v57 = vld [vmem:[#allocation38_spill] sm:$0xff]  ;;  %v8715_v21 = vld [vmem:[#allocation37_spill] sm:$0xff] }
 0x24e   : > { %v1514_v33 = vsel %vm1487_vm6, %v1481_v19, %v8691_v10  ;;  %v8714_v8 = vld [vmem:[#allocation90_spill] sm:$0xff] }
 0x24f   : > { %v1284_v45 = vpop.permute.xlu1 %1283  ;;  %v1375_v53 = vpop.permute.xlu0 %1374  ;;  %v1547_v60 = vsel %vm1520_vm7, %v1514_v33, %v8692_v16  ;;  %v1454_v19 = vsel %vm1423_vm4, %v8715_v21, %v8714_v8  ;;  %v8716_v33 = vld [vmem:[#allocation118_spill] sm:$0xff] }
 0x250   : > { %v1675_v43 = vsel %vm1652_vm11, %v1642_v14, %v1375_v53  ;;  %v1643_v1 = vsel %vm1619_vm10, %v1610_v38, %v1284_v45  ;;  %v1580_v18 = vsel %vm1553_vm8, %v1547_v60, %v8695_v28  ;;  %v1482_v14 = vsel %vm1455_vm5, %v1450_v15, %v8696_v63  ;;  %v8697_v53 = vld [vmem:[#allocation54_spill] sm:$0xff]  ;;  %v8719_v15 = vld [vmem:[#allocation144_spill] sm:$0xff] }
 0x251   : > { %4225 = vmatprep.mubr.msk.f32.mxu0 %vm1690_vm12, %v1675_v43  ;;  %v1515_v40 = vsel %vm1487_vm6, %v1482_v14, %v8697_v53 }
 0x252   : > { %v1548_v38 = vsel %vm1520_vm7, %v1515_v40, %v8698_v62  ;;  %v8722_v40 = vld [vmem:[#allocation173_spill] sm:$0xff]  ;;  %v8724_v62 = vld [vmem:[#allocation23_spill] sm:$0xff] }
 0x253   : > { %v1377_v39 = vpop.permute.xlu1 %1376  ;;  %v1193_v44 = vpop.permute.xlu0 %1192 }
 0x254   : > { %v1676_v59 = vsel %vm1652_vm11, %v1643_v1, %v1377_v39  ;;  %v1611_v32 = vsel %vm1586_vm9, %v1578_v7, %v1193_v44  ;;  %v8699_v39 = vld [vmem:[#allocation19_spill] sm:$0xff]  ;;  %v8705_v7 = vld [vmem:[#allocation88_spill] sm:$0xff] }
 0x255   : > { %4226 = vmatmul.mubr.msk.f32.gmra.mrb[22].mxu0 %vm1690_vm12, %v1676_v59  ;;  %v1581_v44 = vsel %vm1553_vm8, %v1548_v38, %v8699_v39  ;;  %v1452_v48 = vsel %vm1423_vm4, %v8706_v23, %v8705_v7 }
 0x257   : > { %v1195_v35 = vpop.permute.xlu1 %1194  ;;  %v1286_v34 = vpop.permute.xlu0 %1285 }
 0x258   : > { %v1644_v25 = vsel %vm1619_vm10, %v1611_v32, %v1286_v34  ;;  %v1612_v37 = vsel %vm1586_vm9, %v1579_v58, %v1195_v35  ;;  %v8702_v35 = vld [vmem:[#allocation116_spill] sm:$0xff]  ;;  %v8710_v58 = vld [vmem:[#allocation171_spill] sm:$0xff] }
 0x259   : > { %v1483_v34 = vsel %vm1455_vm5, %v1451_v47, %v8702_v35  ;;  %v8707_v32 = vld [vmem:[#allocation20_spill] sm:$0xff]  ;;  %v6317_v47 = vld [vmem:[%s8056_s3] ss:$0 sm:$0xff] }
 0x25a   : > { %v1516_v6 = vsel %vm1487_vm6, %v1483_v34, %v8703_v26 }
 0x25b   : > { %v1288_v54 = vpop.permute.xlu1 %1287  ;;  %v1379_v41 = vpop.permute.xlu0 %1378  ;;  %v1549_v9 = vsel %vm1520_vm7, %v1516_v6, %v8704_v51 }
 0x25c   : > { %v1677_v55 = vsel %vm1652_vm11, %v1644_v25, %v1379_v41  ;;  %v1645_v2 = vsel %vm1619_vm10, %v1612_v37, %v1288_v54  ;;  %v1582_v31 = vsel %vm1553_vm8, %v1549_v9, %v8707_v32  ;;  %v1484_v25 = vsel %vm1455_vm5, %v1452_v48, %v8708_v24  ;;  %v8709_v41 = vld [vmem:[#allocation55_spill] sm:$0xff] }
 0x25d   : > { %4228 = vmatprep.mubr.msk.f32.mxu0 %vm1690_vm12, %v1677_v55  ;;  %v1517_v12 = vsel %vm1487_vm6, %v1484_v25, %v8709_v41 }
 0x25e   : > { %v1550_v37 = vsel %vm1520_vm7, %v1517_v12, %v8710_v58 }
 0x25f   : > { %v1381_v11 = vpop.permute.xlu1 %1380  ;;  %v1197_v49 = vpop.permute.xlu0 %1196 }
 0x260   : > { %v1678_v13 = vsel %vm1652_vm11, %v1645_v2, %v1381_v11  ;;  %v1613_v45 = vsel %vm1586_vm9, %v1580_v18, %v1197_v49  ;;  %v8711_v11 = vld [vmem:[#allocation51_spill] sm:$0xff]  ;;  %v8720_v18 = vld [vmem:[#allocation145_spill] sm:$0xff] }
 0x261   : > { %4229 = vmatmul.mubr.msk.f32.gmra.mrb[24].mxu0 %vm1690_vm12, %v1678_v13  ;;  %v1583_v49 = vsel %vm1553_vm8, %v1550_v37, %v8711_v11  ;;  %v8712_v13 = vld [vmem:[#allocation89_spill] sm:$0xff] }
 0x262   : > { %v1453_v17 = vsel %vm1423_vm4, %v8713_v57, %v8712_v13 }
 0x263   : > { %v1199_v56 = vpop.permute.xlu1 %1198  ;;  %v1290_v27 = vpop.permute.xlu0 %1289 }
 0x264   : > { %v1646_v3 = vsel %vm1619_vm10, %v1613_v45, %v1290_v27  ;;  %v1614_v59 = vsel %vm1586_vm9, %v1581_v44, %v1199_v56  ;;  %v1485_v56 = vsel %vm1455_vm5, %v1453_v17, %v8716_v33  ;;  %v8717_v27 = vld [vmem:[#allocation119_spill] sm:$0xff]  ;;  %v8721_v45 = vld [vmem:[#allocation172_spill] sm:$0xff] }
 0x265   : > { %v1486_v16 = vsel %vm1455_vm5, %v1454_v19, %v8717_v27  ;;  %v1518_v28 = vsel %vm1487_vm6, %v1485_v56, %v8719_v15 }
 0x266   : > { %v1519_v63 = vsel %vm1487_vm6, %v1486_v16, %v8720_v18  ;;  %v1551_v53 = vsel %vm1520_vm7, %v1518_v28, %v8721_v45 }
 0x267   : > { %v1292_v43 = vpop.permute.xlu1 %1291  ;;  %v1383_v22 = vpop.permute.xlu0 %1382 }
 0x268   : > { %v1679_v1 = vsel %vm1652_vm11, %v1646_v3, %v1383_v22  ;;  %v1647_v4 = vsel %vm1619_vm10, %v1614_v59, %v1292_v43  ;;  %v1552_v3 = vsel %vm1520_vm7, %v1519_v63, %v8722_v40  ;;  %v8723_v43 = vld [vmem:[#allocation52_spill] sm:$0xff] }
 0x269   : > { %4231 = vmatprep.mubr.msk.f32.mxu0 %vm1690_vm12, %v1679_v1  ;;  %v1584_v22 = vsel %vm1553_vm8, %v1551_v53, %v8723_v43  ;;  %v1585_v38 = vsel %vm1553_vm8, %v1552_v3, %v8724_v62 }
 0x26b   : > { %v1385_v0 = vpop.permute.xlu1 %1384  ;;  %v1201_v29 = vpop.permute.xlu0 %1200 }
 0x26c   : > { %v1680_v30 = vsel %vm1652_vm11, %v1647_v4, %v1385_v0  ;;  %v1615_v54 = vsel %vm1586_vm9, %v1582_v31, %v1201_v29 }
 0x26d   : > { %4232 = vmatmul.mubr.msk.f32.gmra.mrb[26].mxu0 %vm1690_vm12, %v1680_v30 }
 0x26f   : > { %v1203_v46 = vpop.permute.xlu1 %1202  ;;  %v1294_v42 = vpop.permute.xlu0 %1293 }
 0x270   : > { %v1648_v50 = vsel %vm1619_vm10, %v1615_v54, %v1294_v42  ;;  %v1616_v10 = vsel %vm1586_vm9, %v1583_v49, %v1203_v46 }
 0x273   : > { %v1296_v55 = vpop.permute.xlu1 %1295  ;;  %v1387_v5 = vpop.permute.xlu0 %1386 }
 0x274   : > { %v1681_v2 = vsel %vm1652_vm11, %v1648_v50, %v1387_v5  ;;  %v1649_v60 = vsel %vm1619_vm10, %v1616_v10, %v1296_v55 }
 0x275   : > { %4234 = vmatprep.mubr.msk.f32.mxu0 %vm1690_vm12, %v1681_v2 }
 0x277   : > { %v1389_v61 = vpop.permute.xlu1 %1388  ;;  %v6275_v52 = vpop.permute.xlu0 %1204 }
 0x278   : > { %8718 = vst [vmem:[#allocation35_spill] sm:$0xff] %v6275_v52  ;;  %v1682_v14 = vsel %vm1652_vm11, %v1649_v60, %v1389_v61  ;;  %v1617_v39 = vsel %vm1586_vm9, %v1584_v22, %v6275_v52  ;;  %v1618_v44 = vsel %vm1586_vm9, %v1585_v38, %v6275_v52 }
 0x279   : > { %4235 = vmatmul.mubr.msk.f32.gmra.mrb[28].mxu0 %vm1690_vm12, %v1682_v14 }
 0x27b   : > { %v6291_v1 = vpop.permute.xlu1 %1297 }
 0x27c   : > { %8725 = vst [vmem:[#allocation36_spill] sm:$0xff] %v6291_v1  ;;  %v6297_v59 = vpop.permute.xlu0 %1390  ;;  %v1650_v4 = vsel %vm1619_vm10, %v1617_v39, %v6291_v1  ;;  %v1651_v0 = vsel %vm1619_vm10, %v1618_v44, %v6291_v1 }
 0x27d   : > { %8726 = vst [vmem:[#allocation39_spill] sm:$0xff] %v6297_v59  ;;  %v1683_v29 = vsel %vm1652_vm11, %v1650_v4, %v6297_v59  ;;  %v1684_v30 = vsel %vm1652_vm11, %v1651_v0, %v6297_v59 }
 0x27e   : > { %4237 = vmatprep.mubr.msk.f32.mxu0 %vm1690_vm12, %v1683_v29 }
 0x27f   : > { %4238 = vmatmul.mubr.msk.f32.gmra.mrb[30].mxu0 %vm1690_vm12, %v1684_v30 }
 0x2ce   : > { %v4194_v20 = vpop.f32.mrb[0].mxu0 }
 0x2cf   : > { %v2024_v35 = vmul.f32 %v4194_v20, %v6312_v36  ;;  %v1857_v34 = vpop.f32.mrb[1].mxu0 }
 0x2d0   : > { %v2023_v26 = vmul.f32 %v6312_v36, %v1857_v34 }
 0x2d1   : > { %v2063_v6 = vadd.f32 %v6317_v47, %v2024_v35 }
 0x2d2   : > { %v2062_v46 = vadd.f32 %v6317_v47, %v2023_v26 }
 0x2d3   : > { %v2095_v42 = vmax.f32 %v2063_v6, 0.0 }
 0x2d4   : > { %v2094_v51 = vmax.f32 %v2062_v46, 0.0 }
 0x2d5   : > { %v2159_v9 = vrot.slane %v2095_v42, 7 }
 0x2d6   : > { %v2158_v7 = vrot.slane %v2094_v51, 7  ;;  %v4197_v23 = vpop.f32.mrb[2].mxu0 }
 0x2d7   : > { %v6324_v48 = vsel %vm343_vm0, %v2159_v9, 0.0  ;;  %v2026_v32 = vmul.f32 %v4197_v23, %v6312_v36  ;;  %v1867_v31 = vpop.f32.mrb[3].mxu0 }
 0x2d8   : > { %v2318_v24 = vrot.slane %v6324_v48, 1  ;;  %v6329_v25 = vsel %vm343_vm0, %v2158_v7, %v2159_v9  ;;  %v6332_v54 = vsel %vm343_vm0, 0.0, %v2158_v7  ;;  %v2025_v12 = vmul.f32 %v6312_v36, %v1867_v31 }
 0x2d9   : > { %v2065_v41 = vadd.f32 %v6317_v47, %v2026_v32  ;;  %v2316_v50 = vrot.slane %v6329_v25, 1  ;;  %v2315_v55 = vrot.slane %v6332_v54, 1 }
 0x2da   : > { %v2064_v58 = vadd.f32 %v6317_v47, %v2025_v12 }
 0x2db   : > { %v2097_v5 = vmax.f32 %v2065_v41, 0.0  ;;  %v6340_v37 = vsel %vm502_vm1, %v2316_v50, %v2318_v24  ;;  %v6343_v2 = vsel %vm502_vm1, %v2315_v55, %v2316_v50 }
 0x2dc   : > { %2392 = vrot.lane.b32.xlu0 %v6340_v37, %s4372_s26  ;;  %2390 = vrot.lane.b32.xlu1 %v6343_v2, %s4372_s26  ;;  %v2096_v49 = vmax.f32 %v2064_v58, 0.0 }
 0x2dd   : > { %v2162_v11 = vrot.slane %v2097_v5, 7  ;;  %v4200_v13 = vpop.f32.mrb[4].mxu0 }
 0x2de   : > { %v2028_v57 = vmul.f32 %v4200_v13, %v6312_v36  ;;  %v1877_v17 = vpop.f32.mrb[5].mxu0  ;;  %v2161_v21 = vrot.slane %v2096_v49, 7 }
 0x2df   : > { %v6351_v8 = vsel %vm343_vm0, %v2162_v11, 0.0  ;;  %v2027_v19 = vmul.f32 %v6312_v36, %v1877_v17 }
 0x2e0   : > { %v2323_v10 = vrot.slane %v6351_v8, 1  ;;  %v2067_v33 = vadd.f32 %v6317_v47, %v2028_v57  ;;  %v6357_v56 = vsel %vm343_vm0, %v2161_v21, %v2162_v11  ;;  %v6360_v27 = vsel %vm343_vm0, 0.0, %v2161_v21 }
 0x2e1   : > { %v2066_v16 = vadd.f32 %v6317_v47, %v2027_v19  ;;  %v2321_v61 = vrot.slane %v6357_v56, 1  ;;  %v2320_v15 = vrot.slane %v6360_v27, 1 }
 0x2e2   : > { %v2099_v60 = vmax.f32 %v2067_v33, 0.0 }
 0x2e3   : > { %v2098_v28 = vmax.f32 %v2066_v16, 0.0  ;;  %v6366_v63 = vsel %vm502_vm1, %v2321_v61, %v2323_v10  ;;  %v6369_v14 = vsel %vm502_vm1, %v2320_v15, %v2321_v61 }
 0x2e4   : > { %v2165_v18 = vrot.slane %v2099_v60, 7  ;;  %8727 = vst [vmem:[#allocation40_spill] sm:$0xff] %v6366_v63  ;;  %8728 = vst [vmem:[#allocation59_spill] sm:$0xff] %v6369_v14  ;;  %2396 = vrot.lane.b32.xlu0 %v6366_v63, %s4372_s26  ;;  %2394 = vrot.lane.b32.xlu1 %v6369_v14, %s4372_s26 }
 0x2e5   : > { %v2164_v45 = vrot.slane %v2098_v28, 7  ;;  %v4203_v53 = vpop.f32.mrb[6].mxu0 }
 0x2e6   : > { %v6376_v40 = vsel %vm343_vm0, %v2165_v18, 0.0  ;;  %v2030_v3 = vmul.f32 %v4203_v53, %v6312_v36  ;;  %v1887_v43 = vpop.f32.mrb[7].mxu0 }
 0x2e7   : > { %v2328_v22 = vrot.slane %v6376_v40, 1  ;;  %v6381_v62 = vsel %vm343_vm0, %v2164_v45, %v2165_v18  ;;  %v6384_v38 = vsel %vm343_vm0, 0.0, %v2164_v45  ;;  %v2029_v44 = vmul.f32 %v6312_v36, %v1887_v43 }
 0x2e8   : > { %v2069_v39 = vadd.f32 %v6317_v47, %v2030_v3  ;;  %v2326_v4 = vrot.slane %v6381_v62, 1  ;;  %v2325_v0 = vrot.slane %v6384_v38, 1  ;;  %v2490_v63 = vrot.slane %v6384_v38, 2 }
 0x2e9   : > { %v2068_v30 = vadd.f32 %v6317_v47, %v2029_v44 }
 0x2ea   : > { %v2101_v29 = vmax.f32 %v2069_v39, 0.0  ;;  %v6392_v20 = vsel %vm502_vm1, %v2326_v4, %v2328_v22  ;;  %v6395_v35 = vsel %vm502_vm1, %v2325_v0, %v2326_v4 }
 0x2eb   : > { %8729 = vst [vmem:[#allocation58_spill] sm:$0xff] %v6392_v20  ;;  %8730 = vst [vmem:[#allocation41_spill] sm:$0xff] %v6395_v35  ;;  %2400 = vrot.lane.b32.xlu0 %v6392_v20, %s4372_s26  ;;  %2398 = vrot.lane.b32.xlu1 %v6395_v35, %s4372_s26  ;;  %v2100_v26 = vmax.f32 %v2068_v30, 0.0 }
 0x2ec   : > { %v2168_v34 = vrot.slane %v2101_v29, 7 }
 0x2ed   : > { %v4206_v6 = vpop.f32.mrb[8].mxu0  ;;  %v2167_v42 = vrot.slane %v2100_v26, 7 }
 0x2ee   : > { %v6402_v46 = vsel %vm343_vm0, %v2168_v34, 0.0  ;;  %v2032_v51 = vmul.f32 %v4206_v6, %v6312_v36  ;;  %v1897_v9 = vpop.f32.mrb[9].mxu0 }
 0x2ef   : > { %v2333_v7 = vrot.slane %v6402_v46, 1  ;;  %v2031_v23 = vmul.f32 %v6312_v36, %v1897_v9  ;;  %v6408_v32 = vsel %vm343_vm0, %v2167_v42, %v2168_v34  ;;  %v6411_v31 = vsel %vm343_vm0, 0.0, %v2167_v42 }
 0x2f0   : > { %v2071_v24 = vadd.f32 %v6317_v47, %v2032_v51  ;;  %v2331_v12 = vrot.slane %v6408_v32, 1  ;;  %v2330_v50 = vrot.slane %v6411_v31, 1 }
 0x2f1   : > { %v2070_v41 = vadd.f32 %v6317_v47, %v2031_v23 }
 0x2f2   : > { %v2103_v55 = vmax.f32 %v2071_v24, 0.0  ;;  %v6418_v58 = vsel %vm502_vm1, %v2331_v12, %v2333_v7  ;;  %v6421_v11 = vsel %vm502_vm1, %v2330_v50, %v2331_v12 }
 0x2f3   : > { %v2102_v5 = vmax.f32 %v2070_v41, 0.0  ;;  %8731 = vst [vmem:[#allocation91_spill] sm:$0xff] %v6418_v58  ;;  %8732 = vst [vmem:[#allocation120_spill] sm:$0xff] %v6421_v11  ;;  %2404 = vrot.lane.b32.xlu0 %v6418_v58, %s4372_s26  ;;  %2402 = vrot.lane.b32.xlu1 %v6421_v11, %s4372_s26 }
 0x2f4   : > { %v2171_v49 = vrot.slane %v2103_v55, 7 }
 0x2f5   : > { %v2170_v13 = vrot.slane %v2102_v5, 7  ;;  %v4209_v57 = vpop.f32.mrb[10].mxu0 }
 0x2f6   : > { %v6428_v17 = vsel %vm343_vm0, %v2171_v49, 0.0  ;;  %v2034_v21 = vmul.f32 %v4209_v57, %v6312_v36  ;;  %v1907_v19 = vpop.f32.mrb[11].mxu0 }
 0x2f7   : > { %v2338_v10 = vrot.slane %v6428_v17, 1  ;;  %v6433_v33 = vsel %vm343_vm0, %v2170_v13, %v2171_v49  ;;  %v6436_v16 = vsel %vm343_vm0, 0.0, %v2170_v13  ;;  %v2033_v61 = vmul.f32 %v6312_v36, %v1907_v19 }
 0x2f8   : > { %8733 = vst [vmem:[#allocation121_spill] sm:$0xff] %v6433_v33  ;;  %8734 = vst [vmem:[#allocation146_spill] sm:$0xff] %v6436_v16  ;;  %v2073_v60 = vadd.f32 %v6317_v47, %v2034_v21  ;;  %v2336_v15 = vrot.slane %v6433_v33, 1  ;;  %v2335_v28 = vrot.slane %v6436_v16, 1 }
 0x2f9   : > { %v2072_v45 = vadd.f32 %v6317_v47, %v2033_v61 }
 0x2fa   : > { %v2105_v18 = vmax.f32 %v2073_v60, 0.0  ;;  %v6444_v53 = vsel %vm502_vm1, %v2336_v15, %v2338_v10  ;;  %v6447_v3 = vsel %vm502_vm1, %v2335_v28, %v2336_v15 }
 0x2fb   : > { %8735 = vst [vmem:[#allocation42_spill] sm:$0xff] %v6444_v53  ;;  %8736 = vst [vmem:[#allocation60_spill] sm:$0xff] %v6447_v3  ;;  %2408 = vrot.lane.b32.xlu0 %v6444_v53, %s4372_s26  ;;  %2406 = vrot.lane.b32.xlu1 %v6447_v3, %s4372_s26  ;;  %v2104_v22 = vmax.f32 %v2072_v45, 0.0 }
 0x2fc   : > { %v2174_v43 = vrot.slane %v2105_v18, 7 }
 0x2fd   : > { %v4212_v39 = vpop.f32.mrb[12].mxu0  ;;  %v2173_v4 = vrot.slane %v2104_v22, 7 }
 0x2fe   : > { %v6454_v44 = vsel %vm343_vm0, %v2174_v43, 0.0  ;;  %v2036_v0 = vmul.f32 %v4212_v39, %v6312_v36  ;;  %v1917_v29 = vpop.f32.mrb[13].mxu0 }
 0x2ff   : > { %v2343_v30 = vrot.slane %v6454_v44, 1  ;;  %v2035_v34 = vmul.f32 %v6312_v36, %v1917_v29  ;;  %v6460_v26 = vsel %vm343_vm0, %v2173_v4, %v2174_v43  ;;  %v6463_v6 = vsel %vm343_vm0, 0.0, %v2173_v4 }
 0x300   : > { %8737 = vst [vmem:[#allocation61_spill] sm:$0xff] %v6460_v26  ;;  %8738 = vst [vmem:[#allocation3_spill] sm:$0xff] %v6463_v6  ;;  %v2075_v42 = vadd.f32 %v6317_v47, %v2036_v0  ;;  %v2341_v9 = vrot.slane %v6460_v26, 1  ;;  %v2340_v7 = vrot.slane %v6463_v6, 1 }
 0x301   : > { %v2074_v51 = vadd.f32 %v6317_v47, %v2035_v34 }
 0x302   : > { %v2107_v23 = vmax.f32 %v2075_v42, 0.0  ;;  %v6470_v41 = vsel %vm502_vm1, %v2341_v9, %v2343_v30  ;;  %v6473_v12 = vsel %vm502_vm1, %v2340_v7, %v2341_v9 }
 0x303   : > { %v2106_v24 = vmax.f32 %v2074_v51, 0.0  ;;  %8739 = vst [vmem:[#allocation62_spill] sm:$0xff] %v6470_v41  ;;  %8740 = vst [vmem:[#allocation4_spill] sm:$0xff] %v6473_v12  ;;  %2412 = vrot.lane.b32.xlu0 %v6470_v41, %s4372_s26  ;;  %2410 = vrot.lane.b32.xlu1 %v6473_v12, %s4372_s26 }
 0x304   : > { %v2177_v50 = vrot.slane %v2107_v23, 7 }
 0x305   : > { %v2176_v55 = vrot.slane %v2106_v24, 7  ;;  %v4215_v5 = vpop.f32.mrb[14].mxu0 }
 0x306   : > { %v6480_v49 = vsel %vm343_vm0, %v2177_v50, 0.0  ;;  %v2038_v13 = vmul.f32 %v4215_v5, %v6312_v36  ;;  %v1927_v57 = vpop.f32.mrb[15].mxu0 }
 0x307   : > { %v2348_v21 = vrot.slane %v6480_v49, 1  ;;  %v6485_v19 = vsel %vm343_vm0, %v2176_v55, %v2177_v50  ;;  %v6488_v10 = vsel %vm343_vm0, 0.0, %v2176_v55  ;;  %v2037_v61 = vmul.f32 %v6312_v36, %v1927_v57 }
 0x308   : > { %8741 = vst [vmem:[#allocation93_spill] sm:$0xff] %v6485_v19  ;;  %8742 = vst [vmem:[#allocation92_spill] sm:$0xff] %v6488_v10  ;;  %v2077_v60 = vadd.f32 %v6317_v47, %v2038_v13  ;;  %v2346_v15 = vrot.slane %v6485_v19, 1  ;;  %v2345_v28 = vrot.slane %v6488_v10, 1 }
 0x309   : > { %v2076_v45 = vadd.f32 %v6317_v47, %v2037_v61 }
 0x30a   : > { %v2109_v18 = vmax.f32 %v2077_v60, 0.0  ;;  %v6496_v43 = vsel %vm502_vm1, %v2346_v15, %v2348_v21  ;;  %v6499_v22 = vsel %vm502_vm1, %v2345_v28, %v2346_v15 }
 0x30b   : > { %8743 = vst [vmem:[#allocation94_spill] sm:$0xff] %v6496_v43  ;;  %8744 = vst [vmem:[#allocation122_spill] sm:$0xff] %v6499_v22  ;;  %2416 = vrot.lane.b32.xlu0 %v6496_v43, %s4372_s26  ;;  %2414 = vrot.lane.b32.xlu1 %v6499_v22, %s4372_s26  ;;  %v2108_v4 = vmax.f32 %v2076_v45, 0.0 }
 0x30c   : > { %v2180_v39 = vrot.slane %v2109_v18, 7 }
 0x30d   : > { %v4218_v0 = vpop.f32.mrb[16].mxu0  ;;  %v2179_v30 = vrot.slane %v2108_v4, 7 }
 0x30e   : > { %v6506_v29 = vsel %vm343_vm0, %v2180_v39, 0.0  ;;  %v2040_v34 = vmul.f32 %v4218_v0, %v6312_v36  ;;  %v1937_v42 = vpop.f32.mrb[17].mxu0 }
 0x30f   : > { %v2353_v51 = vrot.slane %v6506_v29, 1  ;;  %v2039_v9 = vmul.f32 %v6312_v36, %v1937_v42  ;;  %v6512_v7 = vsel %vm343_vm0, %v2179_v30, %v2180_v39  ;;  %v6515_v23 = vsel %vm343_vm0, 0.0, %v2179_v30 }
 0x310   : > { %v2079_v24 = vadd.f32 %v6317_v47, %v2040_v34  ;;  %v2351_v55 = vrot.slane %v6512_v7, 1  ;;  %v2350_v5 = vrot.slane %v6515_v23, 1 }
 0x311   : > { %v2078_v50 = vadd.f32 %v6317_v47, %v2039_v9 }
 0x312   : > { %v2111_v13 = vmax.f32 %v2079_v24, 0.0  ;;  %v6522_v21 = vsel %vm502_vm1, %v2351_v55, %v2353_v51  ;;  %v6525_v60 = vsel %vm502_vm1, %v2350_v5, %v2351_v55 }
 0x313   : > { %v2110_v57 = vmax.f32 %v2078_v50, 0.0  ;;  %8745 = vst [vmem:[#allocation124_spill] sm:$0xff] %v6522_v21  ;;  %8746 = vst [vmem:[#allocation147_spill] sm:$0xff] %v6525_v60  ;;  %2420 = vrot.lane.b32.xlu0 %v6522_v21, %s4372_s26  ;;  %2418 = vrot.lane.b32.xlu1 %v6525_v60, %s4372_s26 }
 0x314   : > { %v2183_v61 = vrot.slane %v2111_v13, 7 }
 0x315   : > { %v2182_v15 = vrot.slane %v2110_v57, 7  ;;  %v4221_v28 = vpop.f32.mrb[18].mxu0 }
 0x316   : > { %v6532_v18 = vsel %vm343_vm0, %v2183_v61, 0.0  ;;  %v2042_v45 = vmul.f32 %v4221_v28, %v6312_v36  ;;  %v1947_v39 = vpop.f32.mrb[19].mxu0 }
 0x317   : > { %v2358_v4 = vrot.slane %v6532_v18, 1  ;;  %v6537_v0 = vsel %vm343_vm0, %v2182_v15, %v2183_v61  ;;  %v6540_v30 = vsel %vm343_vm0, 0.0, %v2182_v15  ;;  %v2041_v42 = vmul.f32 %v6312_v36, %v1947_v39 }
 0x318   : > { %v2081_v34 = vadd.f32 %v6317_v47, %v2042_v45  ;;  %v2356_v51 = vrot.slane %v6537_v0, 1  ;;  %v2355_v9 = vrot.slane %v6540_v30, 1 }
 0x319   : > { %v2080_v50 = vadd.f32 %v6317_v47, %v2041_v42 }
 0x31a   : > { %v2113_v24 = vmax.f32 %v2081_v34, 0.0  ;;  %v6548_v55 = vsel %vm502_vm1, %v2356_v51, %v2358_v4  ;;  %v6551_v5 = vsel %vm502_vm1, %v2355_v9, %v2356_v51 }
 0x31b   : > { %8747 = vst [vmem:[#allocation96_spill] sm:$0xff] %v6548_v55  ;;  %8748 = vst [vmem:[#allocation123_spill] sm:$0xff] %v6551_v5  ;;  %2424 = vrot.lane.b32.xlu0 %v6548_v55, %s4372_s26  ;;  %2422 = vrot.lane.b32.xlu1 %v6551_v5, %s4372_s26  ;;  %v2112_v57 = vmax.f32 %v2080_v50, 0.0 }
 0x31c   : > { %v2186_v13 = vrot.slane %v2113_v24, 7 }
 0x31d   : > { %v4224_v61 = vpop.f32.mrb[20].mxu0  ;;  %v2185_v28 = vrot.slane %v2112_v57, 7 }
 0x31e   : > { %v6558_v15 = vsel %vm343_vm0, %v2186_v13, 0.0  ;;  %v2044_v45 = vmul.f32 %v4224_v61, %v6312_v36  ;;  %v1957_v39 = vpop.f32.mrb[21].mxu0 }
 0x31f   : > { %v2363_v4 = vrot.slane %v6558_v15, 1  ;;  %v2043_v34 = vmul.f32 %v6312_v36, %v1957_v39  ;;  %v6564_v42 = vsel %vm343_vm0, %v2185_v28, %v2186_v13  ;;  %v6567_v51 = vsel %vm343_vm0, 0.0, %v2185_v28 }
 0x320   : > { %8749 = vst [vmem:[#allocation63_spill] sm:$0xff] %v6564_v42  ;;  %v2083_v9 = vadd.f32 %v6317_v47, %v2044_v45  ;;  %v2361_v50 = vrot.slane %v6564_v42, 1  ;;  %v2360_v57 = vrot.slane %v6567_v51, 1 }
 0x321   : > { %v2082_v24 = vadd.f32 %v6317_v47, %v2043_v34 }
 0x322   : > { %v2115_v61 = vmax.f32 %v2083_v9, 0.0  ;;  %v6574_v1 = vsel %vm502_vm1, %v2361_v50, %v2363_v4  ;;  %v6577_v39 = vsel %vm502_vm1, %v2360_v57, %v2361_v50 }
 0x323   : > { %v2114_v59 = vmax.f32 %v2082_v24, 0.0  ;;  %8750 = vst [vmem:[#allocation64_spill] sm:$0xff] %v6574_v1  ;;  %8751 = vst [vmem:[#allocation126_spill] sm:$0xff] %v6577_v39  ;;  %2428 = vrot.lane.b32.xlu0 %v6574_v1, %s4372_s26  ;;  %2426 = vrot.lane.b32.xlu1 %v6577_v39, %s4372_s26 }
 0x324   : > { %v2189_v13 = vrot.slane %v2115_v61, 7 }
 0x325   : > { %v2188_v28 = vrot.slane %v2114_v59, 7 }
 0x326   : > { %v6584_v45 = vsel %vm343_vm0, %v2189_v13, 0.0 }
 0x327   : > { %v2368_v34 = vrot.slane %v6584_v45, 1  ;;  %v6588_v9 = vsel %vm343_vm0, %v2188_v28, %v2189_v13  ;;  %v6591_v4 = vsel %vm343_vm0, 0.0, %v2188_v28 }
 0x328   : > { %v4227_v24 = vpop.f32.mrb[22].mxu0  ;;  %v2366_v50 = vrot.slane %v6588_v9, 1  ;;  %v2365_v57 = vrot.slane %v6591_v4, 1 }
 0x329   : > { %v2046_v61 = vmul.f32 %v4227_v24, %v6312_v36  ;;  %v1967_v52 = vpop.f32.mrb[23].mxu0 }
 0x32a   : > { %v2045_v59 = vmul.f32 %v6312_v36, %v1967_v52  ;;  %v6598_v1 = vsel %vm502_vm1, %v2366_v50, %v2368_v34  ;;  %v6601_v39 = vsel %vm502_vm1, %v2365_v57, %v2366_v50 }
 0x32b   : > { %8752 = vst [vmem:[#allocation95_spill] sm:$0xff] %v6598_v1  ;;  %8753 = vst [vmem:[#allocation97_spill] sm:$0xff] %v6601_v39  ;;  %v2085_v13 = vadd.f32 %v6317_v47, %v2046_v61  ;;  %2432 = vrot.lane.b32.xlu0 %v6598_v1, %s4372_s26  ;;  %2430 = vrot.lane.b32.xlu1 %v6601_v39, %s4372_s26 }
 0x32c   : > { %v2084_v28 = vadd.f32 %v6317_v47, %v2045_v59 }
 0x32d   : > { %v2117_v24 = vmax.f32 %v2085_v13, 0.0 }
 0x32e   : > { %v2116_v55 = vmax.f32 %v2084_v28, 0.0 }
 0x32f   : > { %v2192_v5 = vrot.slane %v2117_v24, 7 }
 0x330   : > { %v2191_v52 = vrot.slane %v2116_v55, 7 }
 0x331   : > { %v6610_v34 = vsel %vm343_vm0, %v2192_v5, 0.0 }
 0x332   : > { %v2373_v50 = vrot.slane %v6610_v34, 1  ;;  %v6614_v57 = vsel %vm343_vm0, %v2191_v52, %v2192_v5  ;;  %v6617_v61 = vsel %vm343_vm0, 0.0, %v2191_v52 }
 0x333   : > { %8754 = vst [vmem:[#allocation125_spill] sm:$0xff] %v6614_v57  ;;  %8755 = vst [vmem:[#allocation127_spill] sm:$0xff] %v6617_v61  ;;  %v2371_v1 = vrot.slane %v6614_v57, 1  ;;  %v2370_v39 = vrot.slane %v6617_v61, 1 }
 0x334   : > { %v4230_v59 = vpop.f32.mrb[24].mxu0 }
 0x335   : > { %v2048_v13 = vmul.f32 %v4230_v59, %v6312_v36  ;;  %v1977_v28 = vpop.f32.mrb[25].mxu0  ;;  %v6623_v55 = vsel %vm502_vm1, %v2371_v1, %v2373_v50  ;;  %v6626_v24 = vsel %vm502_vm1, %v2370_v39, %v2371_v1 }
 0x336   : > { %8756 = vst [vmem:[#allocation65_spill] sm:$0xff] %v6623_v55  ;;  %8757 = vst [vmem:[#allocation66_spill] sm:$0xff] %v6626_v24  ;;  %v2047_v5 = vmul.f32 %v6312_v36, %v1977_v28  ;;  %2436 = vrot.lane.b32.xlu0 %v6623_v55, %s4372_s26  ;;  %2434 = vrot.lane.b32.xlu1 %v6626_v24, %s4372_s26 }
 0x337   : > { %v2087_v52 = vadd.f32 %v6317_v47, %v2048_v13 }
 0x338   : > { %v2086_v21 = vadd.f32 %v6317_v47, %v2047_v5 }
 0x339   : > { %v2119_v59 = vmax.f32 %v2087_v52, 0.0 }
 0x33a   : > { %v2118_v60 = vmax.f32 %v2086_v21, 0.0 }
 0x33b   : > { %v2195_v43 = vrot.slane %v2119_v59, 7 }
 0x33c   : > { %v2194_v50 = vrot.slane %v2118_v60, 7 }
 0x33d   : > { %v6636_v22 = vsel %vm343_vm0, %v2195_v43, 0.0 }
 0x33e   : > { %v2378_v1 = vrot.slane %v6636_v22, 1  ;;  %v6640_v39 = vsel %vm343_vm0, %v2194_v50, %v2195_v43  ;;  %v6643_v28 = vsel %vm343_vm0, 0.0, %v2194_v50 }
 0x33f   : > { %8758 = vst [vmem:[#allocation2_spill] sm:$0xff] %v6640_v39  ;;  %8759 = vst [vmem:[#allocation98_spill] sm:$0xff] %v6643_v28  ;;  %v2376_v55 = vrot.slane %v6640_v39, 1  ;;  %v2375_v13 = vrot.slane %v6643_v28, 1 }
 0x340   : > { %v4233_v5 = vpop.f32.mrb[26].mxu0 }
 0x341   : > { %v2050_v21 = vmul.f32 %v4233_v5, %v6312_v36  ;;  %v1987_v52 = vpop.f32.mrb[27].mxu0  ;;  %v6649_v60 = vsel %vm502_vm1, %v2376_v55, %v2378_v1  ;;  %v6652_v59 = vsel %vm502_vm1, %v2375_v13, %v2376_v55 }
 0x342   : > { %8760 = vst [vmem:[#allocation99_spill] sm:$0xff] %v6649_v60  ;;  %8761 = vst [vmem:[#allocation43_spill] sm:$0xff] %v6652_v59  ;;  %v2049_v43 = vmul.f32 %v6312_v36, %v1987_v52  ;;  %2440 = vrot.lane.b32.xlu0 %v6649_v60, %s4372_s26  ;;  %2438 = vrot.lane.b32.xlu1 %v6652_v59, %s4372_s26 }
 0x343   : > { %v2089_v50 = vadd.f32 %v6317_v47, %v2050_v21 }
 0x344   : > { %v2088_v24 = vadd.f32 %v6317_v47, %v2049_v43 }
 0x345   : > { %v2121_v5 = vmax.f32 %v2089_v50, 0.0 }
 0x346   : > { %v2120_v41 = vmax.f32 %v2088_v24, 0.0 }
 0x347   : > { %v2198_v12 = vrot.slane %v2121_v5, 7 }
 0x348   : > { %v2197_v1 = vrot.slane %v2120_v41, 7 }
 0x349   : > { %v6662_v53 = vsel %vm343_vm0, %v2198_v12, 0.0 }
 0x34a   : > { %v2383_v55 = vrot.slane %v6662_v53, 1  ;;  %v6666_v13 = vsel %vm343_vm0, %v2197_v1, %v2198_v12  ;;  %v6669_v52 = vsel %vm343_vm0, 0.0, %v2197_v1 }
 0x34b   : > { %8762 = vst [vmem:[#allocation128_spill] sm:$0xff] %v6666_v13  ;;  %8763 = vst [vmem:[#allocation129_spill] sm:$0xff] %v6669_v52  ;;  %v2381_v60 = vrot.slane %v6666_v13, 1  ;;  %v2380_v21 = vrot.slane %v6669_v52, 1 }
 0x34c   : > { %v4236_v43 = vpop.f32.mrb[28].mxu0 }
 0x34d   : > { %v2052_v24 = vmul.f32 %v4236_v43, %v6312_v36  ;;  %v1997_v50 = vpop.f32.mrb[29].mxu0  ;;  %v6675_v41 = vsel %vm502_vm1, %v2381_v60, %v2383_v55  ;;  %v6678_v5 = vsel %vm502_vm1, %v2380_v21, %v2381_v60 }
 0x34e   : > { %8764 = vst [vmem:[#allocation148_spill] sm:$0xff] %v6675_v41  ;;  %8765 = vst [vmem:[#allocation149_spill] sm:$0xff] %v6678_v5  ;;  %v2051_v12 = vmul.f32 %v6312_v36, %v1997_v50  ;;  %2444 = vrot.lane.b32.xlu0 %v6675_v41, %s4372_s26  ;;  %2442 = vrot.lane.b32.xlu1 %v6678_v5, %s4372_s26 }
 0x34f   : > { %v2091_v1 = vadd.f32 %v6317_v47, %v2052_v24 }
 0x350   : > { %v2090_v59 = vadd.f32 %v6317_v47, %v2051_v12 }
 0x351   : > { %v2123_v43 = vmax.f32 %v2091_v1, 0.0  ;;  %v2483_v1 = vrot.slane %v6324_v48, 2 }
 0x352   : > { %v2122_v3 = vmax.f32 %v2090_v59, 0.0  ;;  %v4239_v58 = vpop.f32.mrb[30].mxu0 }
 0x353   : > { %v2201_v55 = vrot.slane %v2123_v43, 7  ;;  %v2054_v11 = vmul.f32 %v4239_v58, %v6312_v36  ;;  %v2007_v60 = vpop.f32.mrb[31].mxu0  ;;  %v2481_v43 = vrot.slane %v6329_v25, 2 }
 0x354   : > { %v2200_v21 = vrot.slane %v2122_v3, 7  ;;  %v2053_v50 = vmul.f32 %v6312_v36, %v2007_v60 }
 0x355   : > { %v6690_v20 = vsel %vm343_vm0, %v2201_v55, 0.0  ;;  %v2093_v41 = vadd.f32 %v6317_v47, %v2054_v11  ;;  %v2480_v11 = vrot.slane %v6332_v54, 2 }
 0x356   : > { %v2388_v5 = vrot.slane %v6690_v20, 1  ;;  %v6695_v24 = vsel %vm343_vm0, %v2200_v21, %v2201_v55  ;;  %v6698_v59 = vsel %vm343_vm0, 0.0, %v2200_v21  ;;  %v2092_v58 = vadd.f32 %v6317_v47, %v2053_v50 }
 0x357   : > { %8766 = vst [vmem:[#allocation67_spill] sm:$0xff] %v6695_v24  ;;  %8767 = vst [vmem:[#allocation68_spill] sm:$0xff] %v6698_v59  ;;  %v2125_v12 = vmax.f32 %v2093_v41, 0.0  ;;  %v2386_v3 = vrot.slane %v6695_v24, 1  ;;  %v2385_v36 = vrot.slane %v6698_v59, 1  ;;  %v2488_v47 = vrot.slane %v6351_v8, 2 }
 0x358   : > { %v2124_v35 = vmax.f32 %v2092_v58, 0.0  ;;  %v2486_v50 = vrot.slane %v6357_v56, 2  ;;  %v2485_v58 = vrot.slane %v6360_v27, 2 }
 0x359   : > { %v2204_v60 = vrot.slane %v2125_v12, 7  ;;  %v6707_v55 = vsel %vm502_vm1, %v2386_v3, %v2388_v5  ;;  %v6710_v21 = vsel %vm502_vm1, %v2385_v36, %v2386_v3  ;;  %v6720_v12 = vsel %vm673_vm2, %v2481_v43, %v2483_v1 }
 0x35a   : > { %8768 = vst [vmem:[#allocation100_spill] sm:$0xff] %v6707_v55  ;;  %8769 = vst [vmem:[#allocation101_spill] sm:$0xff] %v6710_v21  ;;  %2448 = vrot.lane.b32.xlu0 %v6707_v55, %s4372_s26  ;;  %2446 = vrot.lane.b32.xlu1 %v6710_v21, %s4372_s26  ;;  %v2203_v41 = vrot.slane %v2124_v35, 7  ;;  %v6723_v5 = vsel %vm673_vm2, %v2480_v11, %v2481_v43  ;;  %v6739_v43 = vsel %vm673_vm2, %v2486_v50, %v2488_v47 }
 0x35b   : > { %v2284_v48 = vsel %vm343_vm0, %v2204_v60, 0.0  ;;  %v2491_v21 = vrot.slane %v6381_v62, 2 }
 0x35c   : > { %v2746_v3 = vrot.slane %v2284_v48, 1  ;;  %v2847_v36 = vrot.slane %v2284_v48, 2  ;;  %v6727_v55 = vsel %vm343_vm0, 0.0, %v2203_v41  ;;  %v6730_v8 = vsel %vm343_vm0, %v2203_v41, %v2204_v60 }
 0x35d   : > { %8770 = vst [vmem:[#allocation130_spill] sm:$0xff] %v6727_v55  ;;  %8771 = vst [vmem:[#allocation44_spill] sm:$0xff] %v6730_v8  ;;  %v2743_v35 = vrot.slane %v6727_v55, 1  ;;  %v2844_v1 = vrot.slane %v6727_v55, 2  ;;  %v2744_v11 = vrot.slane %v6730_v8, 1  ;;  %v2845_v48 = vrot.slane %v6730_v8, 2 }
 0x35e   : > { %2557 = vrot.lane.b32.xlu0 %v6720_v12, %s4373_s8  ;;  %2555 = vrot.lane.b32.xlu1 %v6723_v5, %s4373_s8  ;;  %v2493_v60 = vrot.slane %v6376_v40, 2  ;;  %v6745_v41 = vsel %vm673_vm2, %v2485_v58, %v2486_v50  ;;  %v2498_v40 = vrot.slane %v6402_v46, 2  ;;  %v2496_v50 = vrot.slane %v6408_v32, 2 }
 0x35f   : > { %v6750_v14 = vsel %vm502_vm1, %v2743_v35, %v2744_v11  ;;  %v6753_v55 = vsel %vm502_vm1, %v2744_v11, %v2746_v3  ;;  %v6756_v47 = vsel %vm673_vm2, %v2844_v1, %v2845_v48  ;;  %v6759_v8 = vsel %vm673_vm2, %v2845_v48, %v2847_v36 }
 0x360   : > { %8772 = vst [vmem:[#allocation150_spill] sm:$0xff] %v6750_v14  ;;  %8773 = vst [vmem:[#allocation151_spill] sm:$0xff] %v6753_v55  ;;  %v6768_v58 = vsel %vm673_vm2, %v2491_v21, %v2493_v60  ;;  %v6771_v3 = vsel %vm673_vm2, %v2490_v63, %v2491_v21  ;;  %v2495_v35 = vrot.slane %v6411_v31, 2  ;;  %v6779_v36 = vsel %vm673_vm2, %v2496_v50, %v2498_v40 }
 0x361   : > { %8774 = vst [vmem:[#allocation69_spill] sm:$0xff] %v6756_v47  ;;  %8775 = vst [vmem:[#allocation70_spill] sm:$0xff] %v6759_v8  ;;  %v2503_v46 = vrot.slane %v6428_v17, 2  ;;  %v2501_v11 = vrot.slane %v6433_v33, 2  ;;  %v2500_v63 = vrot.slane %v6436_v16, 2  ;;  %v2508_v21 = vrot.slane %v6454_v44, 2 }
 0x362   : > { %2561 = vrot.lane.b32.xlu0 %v6739_v43, %s4373_s8  ;;  %2559 = vrot.lane.b32.xlu1 %v6745_v41, %s4373_s8  ;;  %v6783_v1 = vsel %vm673_vm2, %v2495_v35, %v2496_v50  ;;  %v2506_v48 = vrot.slane %v6460_v26, 2  ;;  %v2505_v40 = vrot.slane %v6463_v6, 2  ;;  %v2513_v44 = vrot.slane %v6480_v49, 2 }
 0x363   : > { %v6794_v60 = vsel %vm673_vm2, %v2501_v11, %v2503_v46  ;;  %v6797_v17 = vsel %vm673_vm2, %v2500_v63, %v2501_v11  ;;  %v2511_v46 = vrot.slane %v6485_v19, 2  ;;  %v2510_v11 = vrot.slane %v6488_v10, 2 }
 0x364   : > { %v6805_v50 = vsel %vm673_vm2, %v2506_v48, %v2508_v21  ;;  %v6809_v35 = vsel %vm673_vm2, %v2505_v40, %v2506_v48  ;;  %v2518_v63 = vrot.slane %v6506_v29, 2  ;;  %v2516_v21 = vrot.slane %v6512_v7, 2 }
 0x365   : > { %v6820_v8 = vsel %vm673_vm2, %v2511_v46, %v2513_v44  ;;  %v6823_v49 = vsel %vm673_vm2, %v2510_v11, %v2511_v46  ;;  %v2515_v48 = vrot.slane %v6515_v23, 2  ;;  %v2523_v29 = vrot.slane %v6532_v18, 2 }
 0x366   : > { %2565 = vrot.lane.b32.xlu0 %v6768_v58, %s4373_s8  ;;  %2563 = vrot.lane.b32.xlu1 %v6771_v3, %s4373_s8  ;;  %v6831_v40 = vsel %vm673_vm2, %v2516_v21, %v2518_v63  ;;  %v2521_v44 = vrot.slane %v6537_v0, 2  ;;  %v2520_v46 = vrot.slane %v6540_v30, 2  ;;  %v2528_v11 = vrot.slane %v6558_v15, 2 }
 0x367   : > { %v6835_v47 = vsel %vm673_vm2, %v2515_v48, %v2516_v21  ;;  %v2526_v63 = vrot.slane %v6564_v42, 2  ;;  %v2525_v21 = vrot.slane %v6567_v51, 2  ;;  %v2533_v15 = vrot.slane %v6584_v45, 2 }
 0x368   : > { %v6846_v55 = vsel %vm673_vm2, %v2521_v44, %v2523_v29  ;;  %v6849_v18 = vsel %vm673_vm2, %v2520_v46, %v2521_v44  ;;  %v2531_v29 = vrot.slane %v6588_v9, 2  ;;  %v2530_v44 = vrot.slane %v6591_v4, 2 }
 0x369   : > { %v6857_v48 = vsel %vm673_vm2, %v2526_v63, %v2528_v11  ;;  %v6861_v14 = vsel %vm673_vm2, %v2525_v21, %v2526_v63  ;;  %v2538_v46 = vrot.slane %v6610_v34, 2  ;;  %v2536_v11 = vrot.slane %v6614_v57, 2 }
 0x36a   : > { %2569 = vrot.lane.b32.xlu0 %v6779_v36, %s4373_s8  ;;  %2567 = vrot.lane.b32.xlu1 %v6783_v1, %s4373_s8  ;;  %v6872_v42 = vsel %vm673_vm2, %v2531_v29, %v2533_v15  ;;  %v6875_v45 = vsel %vm673_vm2, %v2530_v44, %v2531_v29  ;;  %v2535_v63 = vrot.slane %v6617_v61, 2  ;;  %v2543_v34 = vrot.slane %v6636_v22, 2 }
 0x36b   : > { %8776 = vst [vmem:[#allocation102_spill] sm:$0xff] %v6872_v42  ;;  %v6883_v21 = vsel %vm673_vm2, %v2536_v11, %v2538_v46  ;;  %v2541_v15 = vrot.slane %v6640_v39, 2  ;;  %v2540_v29 = vrot.slane %v6643_v28, 2  ;;  %v2548_v44 = vrot.slane %v6662_v53, 2 }
 0x36c   : > { %8777 = vst [vmem:[#allocation103_spill] sm:$0xff] %v6883_v21  ;;  %v6887_v57 = vsel %vm673_vm2, %v2535_v63, %v2536_v11  ;;  %v2546_v46 = vrot.slane %v6666_v13, 2  ;;  %v2545_v11 = vrot.slane %v6669_v52, 2  ;;  %v2553_v53 = vrot.slane %v6690_v20, 2  ;;  %v6923_v52 = vpop.permute.xlu0 %2392 }
 0x36d   : > { %8778 = vst [vmem:[#allocation131_spill] sm:$0xff] %v6887_v57  ;;  %v6898_v61 = vsel %vm673_vm2, %v2541_v15, %v2543_v34  ;;  %v6901_v22 = vsel %vm673_vm2, %v2540_v29, %v2541_v15  ;;  %v2551_v34 = vrot.slane %v6695_v24, 2  ;;  %v2550_v15 = vrot.slane %v6698_v59, 2  ;;  %v6921_v29 = vpop.permute.xlu1 %2390 }
 0x36e   : > { %2573 = vrot.lane.b32.xlu0 %v6794_v60, %s4373_s8  ;;  %2571 = vrot.lane.b32.xlu1 %v6797_v17, %s4373_s8  ;;  %8779 = vst [vmem:[#allocation45_spill] sm:$0xff] %v6898_v61  ;;  %8780 = vst [vmem:[#allocation152_spill] sm:$0xff] %v6901_v22  ;;  %v6909_v63 = vsel %vm673_vm2, %v2546_v46, %v2548_v44  ;;  %v6913_v13 = vsel %vm673_vm2, %v2545_v11, %v2546_v46 }
 0x36f   : > { %8781 = vst [vmem:[#allocation153_spill] sm:$0xff] %v6909_v63  ;;  %8782 = vst [vmem:[#allocation71_spill] sm:$0xff] %v6913_v13  ;;  %v6926_v44 = vsel %vm673_vm2, %v2551_v34, %v2553_v53  ;;  %v6929_v20 = vsel %vm673_vm2, %v2550_v15, %v2551_v34 }
 0x370   : > { %8783 = vst [vmem:[#allocation72_spill] sm:$0xff] %v6926_v44  ;;  %8784 = vst [vmem:[#allocation104_spill] sm:$0xff] %v6929_v20  ;;  %v6937_v11 = vpop.permute.xlu0 %2396 }
 0x371   : > { %v6935_v46 = vpop.permute.xlu1 %2394 }
 0x372   : > { %2577 = vrot.lane.b32.xlu0 %v6805_v50, %s4373_s8  ;;  %2575 = vrot.lane.b32.xlu1 %v6809_v35, %s4373_s8 }
 0x374   : > { %v6945_v34 = vpop.permute.xlu0 %2400 }
 0x375   : > { %v6943_v53 = vpop.permute.xlu1 %2398 }
 0x376   : > { %2581 = vrot.lane.b32.xlu0 %v6820_v8, %s4373_s8  ;;  %2579 = vrot.lane.b32.xlu1 %v6823_v49, %s4373_s8 }
 0x379   : > { %v6951_v15 = vpop.permute.xlu1 %2402 }
 0x37a   : > { %2585 = vrot.lane.b32.xlu0 %v6831_v40, %s4373_s8  ;;  %2583 = vrot.lane.b32.xlu1 %v6835_v47, %s4373_s8 }
 0x37e   : > { %2589 = vrot.lane.b32.xlu0 %v6846_v55, %s4373_s8  ;;  %2587 = vrot.lane.b32.xlu1 %v6849_v18, %s4373_s8 }
 0x382   : > { %2593 = vrot.lane.b32.xlu0 %v6857_v48, %s4373_s8  ;;  %2591 = vrot.lane.b32.xlu1 %v6861_v14, %s4373_s8 }
 0x386   : > { %2597 = vrot.lane.b32.xlu0 %v6872_v42, %s4373_s8  ;;  %2595 = vrot.lane.b32.xlu1 %v6875_v45, %s4373_s8 }
 0x38a   : > { %2601 = vrot.lane.b32.xlu0 %v6883_v21, %s4373_s8  ;;  %2599 = vrot.lane.b32.xlu1 %v6887_v57, %s4373_s8  ;;  %v8817_v21 = vld [vmem:[#allocation120_spill] sm:$0xff] }
 0x38e   : > { %2605 = vrot.lane.b32.xlu0 %v6898_v61, %s4373_s8  ;;  %2603 = vrot.lane.b32.xlu1 %v6901_v22, %s4373_s8 }
 0x392   : > { %2609 = vrot.lane.b32.xlu0 %v6909_v63, %s4373_s8  ;;  %2607 = vrot.lane.b32.xlu1 %v6913_v13, %s4373_s8 }
 0x396   : > { %2613 = vrot.lane.b32.xlu0 %v6926_v44, %s4373_s8  ;;  %2611 = vrot.lane.b32.xlu1 %v6929_v20, %s4373_s8  ;;  %v6953_v44 = vpop.permute.xlu0 %2404  ;;  %v6959_v20 = vpop.permute.xlu1 %2406 }
 0x397   : > { %8785 = vst [vmem:[#allocation105_spill] sm:$0xff] %v6959_v20 }
 0x39a   : > { %2648 = vrot.lane.b32.xlu0 %v6329_v25, %s4374_s9  ;;  %2646 = vrot.lane.b32.xlu1 %v6332_v54, %s4374_s9  ;;  %v6961_v24 = vpop.permute.xlu0 %2408  ;;  %v6967_v59 = vpop.permute.xlu1 %2410 }
 0x39b   : > { %8786 = vst [vmem:[#allocation132_spill] sm:$0xff] %v6961_v24  ;;  %8787 = vst [vmem:[#allocation46_spill] sm:$0xff] %v6967_v59 }
 0x39e   : > { %2652 = vrot.lane.b32.xlu0 %v6357_v56, %s4374_s9  ;;  %2650 = vrot.lane.b32.xlu1 %v6360_v27, %s4374_s9  ;;  %v6969_v63 = vpop.permute.xlu0 %2412  ;;  %v6975_v13 = vpop.permute.xlu1 %2414 }
 0x39f   : > { %8788 = vst [vmem:[#allocation154_spill] sm:$0xff] %v6969_v63  ;;  %8789 = vst [vmem:[#allocation155_spill] sm:$0xff] %v6975_v13 }
 0x3a2   : > { %2656 = vrot.lane.b32.xlu0 %v6381_v62, %s4374_s9  ;;  %2654 = vrot.lane.b32.xlu1 %v6384_v38, %s4374_s9  ;;  %v6977_v61 = vpop.permute.xlu0 %2416  ;;  %v6983_v22 = vpop.permute.xlu1 %2418 }
 0x3a3   : > { %8790 = vst [vmem:[#allocation73_spill] sm:$0xff] %v6977_v61  ;;  %8791 = vst [vmem:[#allocation74_spill] sm:$0xff] %v6983_v22  ;;  %v3468_v22 = vld [vmem:[%s8057_s4 + $0x8] sm:$0xff] }
 0x3a6   : > { %2660 = vrot.lane.b32.xlu0 %v6408_v32, %s4374_s9  ;;  %2658 = vrot.lane.b32.xlu1 %v6411_v31, %s4374_s9  ;;  %v6985_v39 = vpop.permute.xlu0 %2420  ;;  %v6991_v63 = vpop.permute.xlu1 %2422 }
 0x3a7   : > { %8792 = vst [vmem:[#allocation106_spill] sm:$0xff] %v6985_v39  ;;  %8793 = vst [vmem:[#allocation5_spill] sm:$0xff] %v6991_v63  ;;  %v3467_v39 = vld [vmem:[%s8057_s4] sm:$0xff] }
 0x3a8   : > { %v4306_v61 = vpack.c.bf16 %v3468_v22, %v3467_v39 }
 0x3aa   : > { %2664 = vrot.lane.b32.xlu0 %v6433_v33, %s4374_s9  ;;  %2662 = vrot.lane.b32.xlu1 %v6436_v16, %s4374_s9  ;;  %v6993_v13 = vpop.permute.xlu0 %2424  ;;  %v7005_v28 = vpop.permute.xlu1 %2426 }
 0x3ab   : > { %8794 = vst [vmem:[#allocation133_spill] sm:$0xff] %v6993_v13  ;;  %8795 = vst [vmem:[#allocation47_spill] sm:$0xff] %v7005_v28  ;;  %4307 = vmatprep.subr.bf16.mxu1 %v4306_v61 }
 0x3ac   : > { %4309 = vmatpush3.bf16.msra.mxu1 %v4306_v61  ;;  %v3471_v61 = vld [vmem:[%s8057_s4 + $0x20] sm:$0xf] }
 0x3ae   : > { %2668 = vrot.lane.b32.xlu0 %v6460_v26, %s4374_s9  ;;  %2666 = vrot.lane.b32.xlu1 %v6463_v6, %s4374_s9  ;;  %v7007_v63 = vpop.permute.xlu0 %2428  ;;  %v7019_v39 = vpop.permute.xlu1 %2430 }
 0x3af   : > { %8796 = vst [vmem:[#allocation156_spill] sm:$0xff] %v7007_v63  ;;  %8797 = vst [vmem:[#allocation157_spill] sm:$0xff] %v7019_v39 }
 0x3b2   : > { %2672 = vrot.lane.b32.xlu0 %v6485_v19, %s4374_s9  ;;  %2670 = vrot.lane.b32.xlu1 %v6488_v10, %s4374_s9  ;;  %v7021_v22 = vpop.permute.xlu0 %2432 }
 0x3b3   : > { %8798 = vst [vmem:[#allocation75_spill] sm:$0xff] %v7021_v22 }
 0x3b6   : > { %2750 = vrot.lane.b32.xlu0 %v6340_v37, %s4375_s10  ;;  %2748 = vrot.lane.b32.xlu1 %v6343_v2, %s4375_s10  ;;  %v3469_v37 = vld [vmem:[%s8057_s4 + $0x10] sm:$0xff]  ;;  %v3470_v2 = vld [vmem:[%s8057_s4 + $0x18] sm:$0xff] }
 0x3b7   : > { %v4310_v63 = vpack.c.bf16 %v3470_v2, %v3469_v37  ;;  %v8801_v37 = vld [vmem:[#allocation59_spill] sm:$0xff] }
 0x3b9   : > { %4311 = vmatprep.subr.bf16.mxu1 %v4310_v63 }
 0x3ba   : > { %2851 = vrot.lane.b32.xlu0 %v6720_v12, %s4376_s11  ;;  %2849 = vrot.lane.b32.xlu1 %v6723_v5, %s4376_s11  ;;  %v7030_v12 = vpop.permute.xlu1 %2434  ;;  %v7032_v5 = vpop.permute.xlu0 %2436 }
 0x3bb   : > { %8799 = vst [vmem:[#allocation7_spill] sm:$0xff] %v7030_v12  ;;  %8800 = vst [vmem:[#allocation76_spill] sm:$0xff] %v7032_v5  ;;  %4313 = vmatpush3.bf16.msra.mxu1 %v4310_v63  ;;  %v8804_v5 = vld [vmem:[#allocation40_spill] sm:$0xff] }
 0x3bc   : > { %4248 = vmatprep.subr.msk.mxu1 %vm1787_vm3, %v3471_v61 }
 0x3be   : > { %2947 = vrot.lane.b32.xlu0 %v6357_v56, %s4377_s12  ;;  %2945 = vrot.lane.b32.xlu1 %v6360_v27, %s4377_s12  ;;  %v7039_v2 = vpop.permute.xlu1 %2438  ;;  %v7041_v22 = vpop.permute.xlu0 %2440 }
 0x3bf   : > { %8802 = vst [vmem:[#allocation8_spill] sm:$0xff] %v7039_v2  ;;  %8803 = vst [vmem:[#allocation107_spill] sm:$0xff] %v7041_v22  ;;  %4249 = vmatpush3.msk.msra.mxu1 %vm1787_vm3, %v3471_v61 }
 0x3c2   : > { %2752 = vrot.lane.b32.xlu0 %v8801_v37, %s4375_s10  ;;  %3035 = vrot.lane.b32.xlu1 %v8801_v37, %s4378_s23  ;;  %v7048_v63 = vpop.permute.xlu1 %2442  ;;  %v7050_v12 = vpop.permute.xlu0 %2444 }
 0x3c3   : > { %8805 = vst [vmem:[#allocation6_spill] sm:$0xff] %v7048_v63  ;;  %8806 = vst [vmem:[#allocation134_spill] sm:$0xff] %v7050_v12 }
 0x3c6   : > { %3125 = vrot.lane.b32.xlu0 %v6745_v41, %s4379_s28  ;;  %3037 = vrot.lane.b32.xlu1 %v8804_v5, %s4378_s23 }
 0x3ca   : > { %2853 = vrot.lane.b32.xlu0 %v6745_v41, %s4376_s11  ;;  %2754 = vrot.lane.b32.xlu1 %v8804_v5, %s4375_s10 }
 0x3cc   : > { %v7056_v37 = vpop.permute.xlu1 %2446  ;;  %v7058_v22 = vpop.permute.xlu0 %2448 }
 0x3cd   : > { %8807 = vst [vmem:[#allocation48_spill] sm:$0xff] %v7056_v37  ;;  %8808 = vst [vmem:[#allocation158_spill] sm:$0xff] %v7058_v22  ;;  %v8809_v22 = vld [vmem:[#allocation41_spill] sm:$0xff]  ;;  %v8810_v37 = vld [vmem:[#allocation58_spill] sm:$0xff] }
 0x3ce   : > { %2855 = vrot.lane.b32.xlu0 %v6739_v43, %s4376_s11  ;;  %3127 = vrot.lane.b32.xlu1 %v6739_v43, %s4379_s28 }
 0x3d0   : > { %v7064_v61 = vpop.permute.xlu1 %2555  ;;  %v7066_v63 = vpop.permute.xlu0 %2557 }
 0x3d2   : > { %2951 = vrot.lane.b32.xlu0 %v6381_v62, %s4377_s12  ;;  %2949 = vrot.lane.b32.xlu1 %v6384_v38, %s4377_s12 }
 0x3d4   : > { %v7072_v41 = vpop.permute.xlu1 %2559  ;;  %v7074_v5 = vpop.permute.xlu0 %2561 }
 0x3d6   : > { %2756 = vrot.lane.b32.xlu0 %v8809_v22, %s4375_s10  ;;  %3039 = vrot.lane.b32.xlu1 %v8809_v22, %s4378_s23 }
 0x3d8   : > { %v7080_v43 = vpop.permute.xlu1 %2563  ;;  %v7082_v12 = vpop.permute.xlu0 %2565 }
 0x3da   : > { %3129 = vrot.lane.b32.xlu0 %v6771_v3, %s4379_s28  ;;  %3041 = vrot.lane.b32.xlu1 %v8810_v37, %s4378_s23 }
 0x3dc   : > { %v7088_v2 = vpop.permute.xlu1 %2567  ;;  %v7090_v39 = vpop.permute.xlu0 %2569 }
 0x3de   : > { %2758 = vrot.lane.b32.xlu1 %v8810_v37, %s4375_s10  ;;  %2857 = vrot.lane.b32.xlu0 %v6771_v3, %s4376_s11 }
 0x3e0   : > { %v7096_v22 = vpop.permute.xlu1 %2571  ;;  %v7098_v28 = vpop.permute.xlu0 %2573 }
 0x3e1   : > { %8811 = vst [vmem:[#allocation159_spill] sm:$0xff] %v7096_v22  ;;  %8812 = vst [vmem:[#allocation174_spill] sm:$0xff] %v7098_v28  ;;  %v8843_v28 = vld [vmem:[#allocation122_spill] sm:$0xff] }
 0x3e2   : > { %3131 = vrot.lane.b32.xlu1 %v6768_v58, %s4379_s28  ;;  %2859 = vrot.lane.b32.xlu0 %v6768_v58, %s4376_s11 }
 0x3e4   : > { %v7104_v13 = vpop.permute.xlu1 %2575  ;;  %v7106_v59 = vpop.permute.xlu0 %2577 }
 0x3e5   : > { %8813 = vst [vmem:[#allocation175_spill] sm:$0xff] %v7104_v13  ;;  %8814 = vst [vmem:[#allocation25_spill] sm:$0xff] %v7106_v59  ;;  %v8820_v59 = vld [vmem:[#allocation91_spill] sm:$0xff] }
 0x3e6   : > { %2953 = vrot.lane.b32.xlu1 %v6411_v31, %s4377_s12  ;;  %2955 = vrot.lane.b32.xlu0 %v6408_v32, %s4377_s12 }
 0x3e8   : > { %v7112_v3 = vpop.permute.xlu1 %2579  ;;  %v7114_v37 = vpop.permute.xlu0 %2581 }
 0x3e9   : > { %8815 = vst [vmem:[#allocation53_spill] sm:$0xff] %v7112_v3  ;;  %8816 = vst [vmem:[#allocation77_spill] sm:$0xff] %v7114_v37 }
 0x3ea   : > { %3043 = vrot.lane.b32.xlu1 %v8817_v21, %s4378_s23  ;;  %2760 = vrot.lane.b32.xlu0 %v8817_v21, %s4375_s10 }
 0x3ec   : > { %v7120_v58 = vpop.permute.xlu1 %2583  ;;  %v7122_v13 = vpop.permute.xlu0 %2585 }
 0x3ed   : > { %8818 = vst [vmem:[#allocation14_spill] sm:$0xff] %v7120_v58  ;;  %8819 = vst [vmem:[#allocation78_spill] sm:$0xff] %v7122_v13 }
 0x3ee   : > { %3045 = vrot.lane.b32.xlu1 %v8820_v59, %s4378_s23  ;;  %3133 = vrot.lane.b32.xlu0 %v6783_v1, %s4379_s28 }
 0x3f0   : > { %v7128_v57 = vpop.permute.xlu1 %2587  ;;  %v7130_v3 = vpop.permute.xlu0 %2589 }
 0x3f1   : > { %8821 = vst [vmem:[#allocation13_spill] sm:$0xff] %v7128_v57  ;;  %8822 = vst [vmem:[#allocation9_spill] sm:$0xff] %v7130_v3 }
 0x3f2   : > { %2762 = vrot.lane.b32.xlu1 %v8820_v59, %s4375_s10  ;;  %2861 = vrot.lane.b32.xlu0 %v6783_v1, %s4376_s11 }
 0x3f4   : > { %v7136_v21 = vpop.permute.xlu1 %2591  ;;  %v7138_v58 = vpop.permute.xlu0 %2593 }
 0x3f5   : > { %8823 = vst [vmem:[#allocation10_spill] sm:$0xff] %v7136_v21  ;;  %8824 = vst [vmem:[#allocation135_spill] sm:$0xff] %v7138_v58  ;;  %v8829_v58 = vld [vmem:[#allocation60_spill] sm:$0xff] }
 0x3f6   : > { %3135 = vrot.lane.b32.xlu1 %v6779_v36, %s4379_s28  ;;  %2863 = vrot.lane.b32.xlu0 %v6779_v36, %s4376_s11 }
 0x3f8   : > { %v7144_v13 = vpop.permute.xlu1 %2595  ;;  %v7146_v57 = vpop.permute.xlu0 %2597 }
 0x3f9   : > { %8825 = vst [vmem:[#allocation49_spill] sm:$0xff] %v7144_v13  ;;  %8826 = vst [vmem:[#allocation160_spill] sm:$0xff] %v7146_v57  ;;  %v8832_v57 = vld [vmem:[#allocation42_spill] sm:$0xff] }
 0x3fa   : > { %2957 = vrot.lane.b32.xlu1 %v6436_v16, %s4377_s12  ;;  %2959 = vrot.lane.b32.xlu0 %v6433_v33, %s4377_s12 }
 0x3fc   : > { %v7152_v59 = vpop.permute.xlu1 %2599  ;;  %v7154_v1 = vpop.permute.xlu0 %2601 }
 0x3fd   : > { %8827 = vst [vmem:[#allocation161_spill] sm:$0xff] %v7152_v59  ;;  %8828 = vst [vmem:[#allocation176_spill] sm:$0xff] %v7154_v1 }
 0x3fe   : > { %3047 = vrot.lane.b32.xlu1 %v8829_v58, %s4378_s23  ;;  %2764 = vrot.lane.b32.xlu0 %v8829_v58, %s4375_s10 }
 0x400   : > { %v7160_v36 = vpop.permute.xlu1 %2603  ;;  %v7162_v13 = vpop.permute.xlu0 %2605 }
 0x401   : > { %8830 = vst [vmem:[#allocation11_spill] sm:$0xff] %v7160_v36  ;;  %8831 = vst [vmem:[#allocation27_spill] sm:$0xff] %v7162_v13 }
 0x402   : > { %3049 = vrot.lane.b32.xlu1 %v8832_v57, %s4378_s23  ;;  %3137 = vrot.lane.b32.xlu0 %v6797_v17, %s4379_s28 }
 0x404   : > { %v7168_v21 = vpop.permute.xlu1 %2607  ;;  %v7170_v59 = vpop.permute.xlu0 %2609 }
 0x405   : > { %8833 = vst [vmem:[#allocation28_spill] sm:$0xff] %v7168_v21  ;;  %8834 = vst [vmem:[#allocation79_spill] sm:$0xff] %v7170_v59 }
 0x406   : > { %2766 = vrot.lane.b32.xlu1 %v8832_v57, %s4375_s10  ;;  %2865 = vrot.lane.b32.xlu0 %v6797_v17, %s4376_s11 }
 0x408   : > { %v7176_v58 = vpop.permute.xlu1 %2611  ;;  %v7178_v36 = vpop.permute.xlu0 %2613 }
 0x409   : > { %8835 = vst [vmem:[#allocation18_spill] sm:$0xff] %v7176_v58  ;;  %8836 = vst [vmem:[#allocation80_spill] sm:$0xff] %v7178_v36  ;;  %v8837_v36 = vld [vmem:[#allocation4_spill] sm:$0xff]  ;;  %v8838_v58 = vld [vmem:[#allocation62_spill] sm:$0xff] }
 0x40a   : > { %3139 = vrot.lane.b32.xlu1 %v6794_v60, %s4379_s28  ;;  %2867 = vrot.lane.b32.xlu0 %v6794_v60, %s4376_s11 }
 0x40c   : > { %v2647_v13 = vpop.permute.xlu1 %2646  ;;  %v2649_v21 = vpop.permute.xlu0 %2648 }
 0x40e   : > { %2961 = vrot.lane.b32.xlu1 %v6463_v6, %s4377_s12  ;;  %2963 = vrot.lane.b32.xlu0 %v6460_v26, %s4377_s12 }
 0x410   : > { %v7188_v57 = vpop.permute.xlu1 %2650  ;;  %v7190_v17 = vpop.permute.xlu0 %2652 }
 0x412   : > { %3051 = vrot.lane.b32.xlu1 %v8837_v36, %s4378_s23  ;;  %2768 = vrot.lane.b32.xlu0 %v8837_v36, %s4375_s10 }
 0x414   : > { %v7196_v59 = vpop.permute.xlu1 %2654  ;;  %v7198_v60 = vpop.permute.xlu0 %2656 }
 0x416   : > { %3053 = vrot.lane.b32.xlu1 %v8838_v58, %s4378_s23  ;;  %3141 = vrot.lane.b32.xlu0 %v6809_v35, %s4379_s28 }
 0x418   : > { %v7204_v1 = vpop.permute.xlu1 %2658  ;;  %v7206_v3 = vpop.permute.xlu0 %2660 }
 0x41a   : > { %2770 = vrot.lane.b32.xlu1 %v8838_v58, %s4375_s10  ;;  %2869 = vrot.lane.b32.xlu0 %v6809_v35, %s4376_s11 }
 0x41c   : > { %v7212_v36 = vpop.permute.xlu1 %2662  ;;  %v7214_v37 = vpop.permute.xlu0 %2664 }
 0x41e   : > { %3143 = vrot.lane.b32.xlu1 %v6805_v50, %s4379_s28  ;;  %2871 = vrot.lane.b32.xlu0 %v6805_v50, %s4376_s11 }
 0x420   : > { %v7220_v26 = vpop.permute.xlu1 %2666  ;;  %v7222_v6 = vpop.permute.xlu0 %2668 }
 0x421   : > { %8839 = vst [vmem:[#allocation17_spill] sm:$0xff] %v7220_v26  ;;  %8840 = vst [vmem:[#allocation108_spill] sm:$0xff] %v7222_v6  ;;  %v8844_v6 = vld [vmem:[#allocation94_spill] sm:$0xff] }
 0x422   : > { %2965 = vrot.lane.b32.xlu1 %v6488_v10, %s4377_s12  ;;  %2967 = vrot.lane.b32.xlu0 %v6485_v19, %s4377_s12 }
 0x424   : > { %v7228_v35 = vpop.permute.xlu1 %2670  ;;  %v7230_v58 = vpop.permute.xlu0 %2672 }
 0x425   : > { %8841 = vst [vmem:[#allocation109_spill] sm:$0xff] %v7228_v35  ;;  %8842 = vst [vmem:[#allocation136_spill] sm:$0xff] %v7230_v58 }
 0x426   : > { %3055 = vrot.lane.b32.xlu1 %v8843_v28, %s4378_s23  ;;  %2772 = vrot.lane.b32.xlu0 %v8843_v28, %s4375_s10  ;;  %v8845_v28 = vld [vmem:[#allocation57_spill] sm:$0xff] }
 0x427   : > { %v3275_v24 = vsel %vm1487_vm6, %v8845_v28, %v2647_v13 }
 0x428   : > { %v2749_v50 = vpop.permute.xlu1 %2748  ;;  %v2751_v33 = vpop.permute.xlu0 %2750 }
 0x429   : > { %v3307_v16 = vsel %vm1520_vm7, %v3275_v24, %v2749_v50  ;;  %v8846_v24 = vld [vmem:[#allocation147_spill] sm:$0xff] }
 0x42a   : > { %3057 = vrot.lane.b32.xlu1 %v8844_v6, %s4378_s23  ;;  %3145 = vrot.lane.b32.xlu0 %v6823_v49, %s4379_s28 }
 0x42c   : > { %v2850_v10 = vpop.permute.xlu1 %2849  ;;  %v2852_v19 = vpop.permute.xlu0 %2851 }
 0x42e   : > { %2774 = vrot.lane.b32.xlu1 %v8844_v6, %s4375_s10  ;;  %2873 = vrot.lane.b32.xlu0 %v6823_v49, %s4376_s11  ;;  %v3339_v6 = vsel %vm1553_vm8, %v3307_v16, %v2850_v10  ;;  %v3276_v16 = vsel %vm1487_vm6, %v8845_v28, %v2649_v21  ;;  %v8847_v28 = vld [vmem:[#allocation124_spill] sm:$0xff] }
 0x430   : > { %v2946_v58 = vpop.permute.xlu1 %2945  ;;  %v2948_v35 = vpop.permute.xlu0 %2947 }
 0x431   : > { %v3371_v49 = vsel %vm1586_vm9, %v3339_v6, %v2946_v58  ;;  %v3308_v58 = vsel %vm1520_vm7, %v3276_v16, %v2751_v33 }
 0x432   : > { %3147 = vrot.lane.b32.xlu1 %v6820_v8, %s4379_s28  ;;  %2875 = vrot.lane.b32.xlu0 %v6820_v8, %s4376_s11 }
 0x434   : > { %v3036_v26 = vpop.permute.xlu1 %3035  ;;  %v2753_v22 = vpop.permute.xlu0 %2752 }
 0x435   : > { %v3403_v20 = vsel %vm1619_vm10, %v3371_v49, %v3036_v26  ;;  %v3340_v26 = vsel %vm1553_vm8, %v3308_v58, %v2852_v19 }
 0x436   : > { %2969 = vrot.lane.b32.xlu1 %v6515_v23, %s4377_s12  ;;  %2674 = vrot.lane.b32.xlu0 %v6515_v23, %s4374_s9 }
 0x438   : > { %v3038_v8 = vpop.permute.xlu1 %3037  ;;  %v3126_v42 = vpop.permute.xlu0 %3125 }
 0x439   : > { %v3435_v13 = vsel %vm1652_vm11, %v3403_v20, %v3126_v42  ;;  %v3372_v42 = vsel %vm1586_vm9, %v3340_v26, %v2948_v35  ;;  %v3215_v35 = vsel %vm1423_vm4, %v6332_v54, %v6921_v29 }
 0x43a   : > { %2971 = vrot.lane.b32.xlu1 %v6512_v7, %s4377_s12  ;;  %3059 = vrot.lane.b32.xlu0 %v8846_v24, %s4378_s23  ;;  %v3404_v20 = vsel %vm1619_vm10, %v3372_v42, %v3038_v8  ;;  %v3245_v8 = vsel %vm1455_vm5, %v3215_v35, %v7064_v61  ;;  %v8849_v35 = vld [vmem:[#allocation96_spill] sm:$0xff] }
 0x43b   : > { %4250 = vmatprep.mubr.msk.f32.mxu1 %vm1690_vm12, %v3435_v13  ;;  %v3277_v13 = vsel %vm1487_vm6, %v3245_v8, %v7188_v57 }
 0x43c   : > { %v2755_v10 = vpop.permute.xlu1 %2754  ;;  %v2854_v50 = vpop.permute.xlu0 %2853  ;;  %v3309_v58 = vsel %vm1520_vm7, %v3277_v13, %v2753_v22  ;;  %v3216_v22 = vsel %vm1423_vm4, %v6329_v25, %v6923_v52  ;;  %v8848_v52 = vld [vmem:[#allocation123_spill] sm:$0xff] }
 0x43d   : > { %v3341_v26 = vsel %vm1553_vm8, %v3309_v58, %v2854_v50 }
 0x43e   : > { %2676 = vrot.lane.b32.xlu1 %v6512_v7, %s4374_s9  ;;  %2776 = vrot.lane.b32.xlu0 %v8846_v24, %s4375_s10 }
 0x440   : > { %v3128_v6 = vpop.permute.xlu1 %3127  ;;  %v2856_v49 = vpop.permute.xlu0 %2855 }
 0x441   : > { %v3436_v21 = vsel %vm1652_vm11, %v3404_v20, %v3128_v6 }
 0x442   : > { %3061 = vrot.lane.b32.xlu1 %v8847_v28, %s4378_s23  ;;  %3149 = vrot.lane.b32.xlu0 %v6835_v47, %s4379_s28 }
 0x443   : > { %4251 = vmatmul.mubr.msk.f32.vlgmr.msra.gmra.mrb[0].mxu1 %vm1690_vm12, %v3436_v21 }
 0x444   : > { %v2950_v33 = vpop.permute.xlu1 %2949  ;;  %v2952_v19 = vpop.permute.xlu0 %2951 }
 0x445   : > { %v3373_v54 = vsel %vm1586_vm9, %v3341_v26, %v2950_v33 }
 0x446   : > { %2778 = vrot.lane.b32.xlu1 %v8847_v28, %s4375_s10  ;;  %2877 = vrot.lane.b32.xlu0 %v6835_v47, %s4376_s11 }
 0x448   : > { %v3040_v24 = vpop.permute.xlu1 %3039  ;;  %v2757_v16 = vpop.permute.xlu0 %2756 }
 0x449   : > { %v3405_v47 = vsel %vm1619_vm10, %v3373_v54, %v3040_v24 }
 0x44a   : > { %3151 = vrot.lane.b32.xlu1 %v6831_v40, %s4379_s28  ;;  %2879 = vrot.lane.b32.xlu0 %v6831_v40, %s4376_s11  ;;  %v3246_v40 = vsel %vm1455_vm5, %v3216_v22, %v7066_v63 }
 0x44b   : > { %v3278_v50 = vsel %vm1487_vm6, %v3246_v40, %v7190_v17 }
 0x44c   : > { %v3042_v29 = vpop.permute.xlu1 %3041  ;;  %v3130_v61 = vpop.permute.xlu0 %3129  ;;  %v3310_v6 = vsel %vm1520_vm7, %v3278_v50, %v2755_v10  ;;  %v8850_v50 = vld [vmem:[#allocation63_spill] sm:$0xff] }
 0x44d   : > { %v3437_v57 = vsel %vm1652_vm11, %v3405_v47, %v3130_v61  ;;  %v3342_v25 = vsel %vm1553_vm8, %v3310_v6, %v2856_v49 }
 0x44e   : > { %2973 = vrot.lane.b32.xlu1 %v6540_v30, %s4377_s12  ;;  %2678 = vrot.lane.b32.xlu0 %v6540_v30, %s4374_s9  ;;  %v3374_v21 = vsel %vm1586_vm9, %v3342_v25, %v2952_v19  ;;  %v3217_v19 = vsel %vm1423_vm4, %v6360_v27, %v6935_v46  ;;  %v3219_v25 = vsel %vm1423_vm4, %v6384_v38, %v6943_v53  ;;  %v8852_v38 = vld [vmem:[#allocation64_spill] sm:$0xff] }
 0x44f   : > { %4253 = vmatprep.mubr.msk.f32.mxu1 %vm1690_vm12, %v3437_v57  ;;  %v3406_v63 = vsel %vm1619_vm10, %v3374_v21, %v3042_v29  ;;  %v3247_v8 = vsel %vm1455_vm5, %v3217_v19, %v7072_v41  ;;  %v3220_v19 = vsel %vm1423_vm4, %v6381_v62, %v6945_v34 }
 0x450   : > { %v2759_v42 = vpop.permute.xlu1 %2758  ;;  %v2858_v20 = vpop.permute.xlu0 %2857  ;;  %v3279_v13 = vsel %vm1487_vm6, %v3247_v8, %v7196_v59 }
 0x451   : > { %v3311_v26 = vsel %vm1520_vm7, %v3279_v13, %v2757_v16  ;;  %v3218_v16 = vsel %vm1423_vm4, %v6357_v56, %v6937_v11 }
 0x452   : > { %2975 = vrot.lane.b32.xlu1 %v6537_v0, %s4377_s12  ;;  %3063 = vrot.lane.b32.xlu0 %v8848_v52, %s4378_s23  ;;  %v3343_v54 = vsel %vm1553_vm8, %v3311_v26, %v2858_v20 }
 0x454   : > { %v3132_v28 = vpop.permute.xlu1 %3131  ;;  %v2860_v33 = vpop.permute.xlu0 %2859 }
 0x455   : > { %v3438_v17 = vsel %vm1652_vm11, %v3406_v63, %v3132_v28 }
 0x456   : > { %2680 = vrot.lane.b32.xlu1 %v6537_v0, %s4374_s9  ;;  %2780 = vrot.lane.b32.xlu0 %v8848_v52, %s4375_s10  ;;  %v3249_v52 = vsel %vm1455_vm5, %v3219_v25, %v7080_v43 }
 0x457   : > { %4254 = vmatmul.mubr.msk.f32.gmra.mrb[2].mxu1 %vm1690_vm12, %v3438_v17  ;;  %v3281_v21 = vsel %vm1487_vm6, %v3249_v52, %v7204_v1  ;;  %v8856_v52 = vld [vmem:[#allocation105_spill] sm:$0xff] }
 0x458   : > { %v2954_v10 = vpop.permute.xlu1 %2953  ;;  %v2956_v49 = vpop.permute.xlu0 %2955 }
 0x459   : > { %v3375_v27 = vsel %vm1586_vm9, %v3343_v54, %v2954_v10 }
 0x45a   : > { %3065 = vrot.lane.b32.xlu1 %v8849_v35, %s4378_s23  ;;  %3153 = vrot.lane.b32.xlu0 %v6849_v18, %s4379_s28 }
 0x45c   : > { %v3044_v24 = vpop.permute.xlu1 %3043  ;;  %v2761_v58 = vpop.permute.xlu0 %2760 }
 0x45d   : > { %v3407_v46 = vsel %vm1619_vm10, %v3375_v27, %v3044_v24 }
 0x45e   : > { %2782 = vrot.lane.b32.xlu1 %v8849_v35, %s4375_s10  ;;  %2881 = vrot.lane.b32.xlu0 %v6849_v18, %s4376_s11  ;;  %v3248_v18 = vsel %vm1455_vm5, %v3218_v16, %v7074_v5  ;;  %v3250_v35 = vsel %vm1455_vm5, %v3220_v19, %v7082_v12  ;;  %v8862_v19 = vld [vmem:[#allocation66_spill] sm:$0xff] }
 0x45f   : > { %v3280_v29 = vsel %vm1487_vm6, %v3248_v18, %v7198_v60  ;;  %v3282_v8 = vsel %vm1487_vm6, %v3250_v35, %v7206_v3 }
 0x460   : > { %v3046_v41 = vpop.permute.xlu1 %3045  ;;  %v3134_v47 = vpop.permute.xlu0 %3133  ;;  %v3312_v22 = vsel %vm1520_vm7, %v3280_v29, %v2759_v42  ;;  %v8851_v42 = vld [vmem:[#allocation126_spill] sm:$0xff] }
 0x461   : > { %v3439_v59 = vsel %vm1652_vm11, %v3407_v46, %v3134_v47  ;;  %v3344_v56 = vsel %vm1553_vm8, %v3312_v22, %v2860_v33  ;;  %v3313_v33 = vsel %vm1520_vm7, %v3281_v21, %v2761_v58  ;;  %v8853_v46 = vld [vmem:[#allocation97_spill] sm:$0xff]  ;;  %v8854_v22 = vld [vmem:[#allocation95_spill] sm:$0xff] }
 0x462   : > { %3155 = vrot.lane.b32.xlu1 %v6846_v55, %s4379_s28  ;;  %2883 = vrot.lane.b32.xlu0 %v6846_v55, %s4376_s11  ;;  %v3376_v55 = vsel %vm1586_vm9, %v3344_v56, %v2956_v49 }
 0x463   : > { %4256 = vmatprep.mubr.msk.f32.mxu1 %vm1690_vm12, %v3439_v59  ;;  %v3408_v11 = vsel %vm1619_vm10, %v3376_v55, %v3046_v41 }
 0x464   : > { %v2763_v61 = vpop.permute.xlu1 %2762  ;;  %v2862_v57 = vpop.permute.xlu0 %2861 }
 0x465   : > { %v3345_v17 = vsel %vm1553_vm8, %v3313_v33, %v2862_v57  ;;  %v3314_v58 = vsel %vm1520_vm7, %v3282_v8, %v2763_v61  ;;  %v3222_v57 = vsel %vm1423_vm4, %v6408_v32, %v6953_v44 }
 0x466   : > { %2977 = vrot.lane.b32.xlu1 %v6567_v51, %s4377_s12  ;;  %2682 = vrot.lane.b32.xlu0 %v6567_v51, %s4374_s9  ;;  %v3252_v56 = vsel %vm1455_vm5, %v3222_v57, %v7090_v39 }
 0x467   : > { %v3284_v55 = vsel %vm1487_vm6, %v3252_v56, %v7214_v37  ;;  %v8870_v56 = vld [vmem:[#allocation46_spill] sm:$0xff] }
 0x468   : > { %v3136_v5 = vpop.permute.xlu1 %3135  ;;  %v2864_v40 = vpop.permute.xlu0 %2863 }
 0x469   : > { %v3440_v60 = vsel %vm1652_vm11, %v3408_v11, %v3136_v5  ;;  %v3346_v62 = vsel %vm1553_vm8, %v3314_v58, %v2864_v40 }
 0x46a   : > { %2979 = vrot.lane.b32.xlu1 %v8850_v50, %s4377_s12  ;;  %3067 = vrot.lane.b32.xlu0 %v8851_v42, %s4378_s23 }
 0x46b   : > { %4257 = vmatmul.mubr.msk.f32.gmra.mrb[4].mxu1 %vm1690_vm12, %v3440_v60 }
 0x46c   : > { %v2958_v20 = vpop.permute.xlu1 %2957  ;;  %v2960_v6 = vpop.permute.xlu0 %2959 }
 0x46d   : > { %v3377_v53 = vsel %vm1586_vm9, %v3345_v17, %v2958_v20  ;;  %v8855_v20 = vld [vmem:[#allocation102_spill] sm:$0xff]  ;;  %v8860_v17 = vld [vmem:[#allocation17_spill] sm:$0xff] }
 0x46e   : > { %2684 = vrot.lane.b32.xlu1 %v8850_v50, %s4374_s9  ;;  %2784 = vrot.lane.b32.xlu0 %v8851_v42, %s4375_s10 }
 0x470   : > { %v3048_v63 = vpop.permute.xlu1 %3047  ;;  %v2765_v28 = vpop.permute.xlu0 %2764 }
 0x471   : > { %v3409_v10 = vsel %vm1619_vm10, %v3377_v53, %v3048_v63  ;;  %v8858_v63 = vld [vmem:[#allocation127_spill] sm:$0xff] }
 0x472   : > { %3069 = vrot.lane.b32.xlu1 %v8852_v38, %s4378_s23  ;;  %3157 = vrot.lane.b32.xlu0 %v6861_v14, %s4379_s28 }
 0x474   : > { %v3050_v43 = vpop.permute.xlu1 %3049  ;;  %v3138_v49 = vpop.permute.xlu0 %3137 }
 0x475   : > { %v3441_v1 = vsel %vm1652_vm11, %v3409_v10, %v3138_v49 }
 0x476   : > { %2786 = vrot.lane.b32.xlu1 %v8852_v38, %s4375_s10  ;;  %2885 = vrot.lane.b32.xlu0 %v6861_v14, %s4376_s11  ;;  %v3378_v14 = vsel %vm1586_vm9, %v3346_v62, %v2960_v6  ;;  %v8863_v62 = vld [vmem:[#allocation132_spill] sm:$0xff] }
 0x477   : > { %4259 = vmatprep.mubr.msk.f32.mxu1 %vm1690_vm12, %v3441_v1  ;;  %v3410_v34 = vsel %vm1619_vm10, %v3378_v14, %v3050_v43  ;;  %v8861_v1 = vld [vmem:[#allocation125_spill] sm:$0xff] }
 0x478   : > { %v2767_v13 = vpop.permute.xlu1 %2766  ;;  %v2866_v24 = vpop.permute.xlu0 %2865  ;;  %v8864_v14 = vld [vmem:[#allocation121_spill] sm:$0xff] }
 0x479   : > { %v3316_v40 = vsel %vm1520_vm7, %v3284_v55, %v2767_v13  ;;  %v8871_v55 = vld [vmem:[#allocation3_spill] sm:$0xff] }
 0x47a   : > { %3159 = vrot.lane.b32.xlu1 %v6857_v48, %s4379_s28  ;;  %2887 = vrot.lane.b32.xlu0 %v6857_v48, %s4376_s11  ;;  %v3221_v48 = vsel %vm1423_vm4, %v6411_v31, %v6951_v15 }
 0x47b   : > { %v3251_v41 = vsel %vm1455_vm5, %v3221_v48, %v7088_v2 }
 0x47c   : > { %v3140_v12 = vpop.permute.xlu1 %3139  ;;  %v2868_v26 = vpop.permute.xlu0 %2867  ;;  %v3283_v47 = vsel %vm1487_vm6, %v3251_v41, %v7212_v36 }
 0x47d   : > { %v3442_v3 = vsel %vm1652_vm11, %v3410_v34, %v3140_v12  ;;  %v3315_v18 = vsel %vm1520_vm7, %v3283_v47, %v2765_v28  ;;  %v3348_v32 = vsel %vm1553_vm8, %v3316_v40, %v2868_v26  ;;  %v8859_v28 = vld [vmem:[#allocation159_spill] sm:$0xff]  ;;  %v3224_v34 = vsel %vm1423_vm4, %v8864_v14, %v8863_v62  ;;  %v8865_v12 = vld [vmem:[#allocation174_spill] sm:$0xff]  ;;  %v8867_v47 = vld [vmem:[#allocation65_spill] sm:$0xff] }
 0x47e   : > { %2981 = vrot.lane.b32.xlu1 %v6591_v4, %s4377_s12  ;;  %2686 = vrot.lane.b32.xlu0 %v6591_v4, %s4374_s9  ;;  %v3347_v29 = vsel %vm1553_vm8, %v3315_v18, %v2866_v24  ;;  %v3254_v26 = vsel %vm1455_vm5, %v3224_v34, %v8865_v12  ;;  %v8873_v40 = vld [vmem:[#allocation175_spill] sm:$0xff]  ;;  %v8882_v62 = vld [vmem:[#allocation152_spill] sm:$0xff] }
 0x47f   : > { %4260 = vmatmul.mubr.msk.f32.gmra.mrb[6].mxu1 %vm1690_vm12, %v3442_v3  ;;  %v8866_v3 = vld [vmem:[#allocation108_spill] sm:$0xff] }
 0x480   : > { %v2962_v54 = vpop.permute.xlu1 %2961  ;;  %v2964_v27 = vpop.permute.xlu0 %2963 }
 0x481   : > { %v3379_v31 = vsel %vm1586_vm9, %v3347_v29, %v2962_v54  ;;  %v3380_v44 = vsel %vm1586_vm9, %v3348_v32, %v2964_v27  ;;  %v3286_v54 = vsel %vm1487_vm6, %v3254_v26, %v8866_v3 }
 0x482   : > { %2983 = vrot.lane.b32.xlu1 %v6588_v9, %s4377_s12  ;;  %3071 = vrot.lane.b32.xlu0 %v8853_v46, %s4378_s23 }
 0x484   : > { %v3052_v59 = vpop.permute.xlu1 %3051  ;;  %v2769_v16 = vpop.permute.xlu0 %2768 }
 0x485   : > { %v3411_v15 = vsel %vm1619_vm10, %v3379_v31, %v3052_v59  ;;  %v8868_v59 = vld [vmem:[#allocation131_spill] sm:$0xff] }
 0x486   : > { %2688 = vrot.lane.b32.xlu1 %v6588_v9, %s4374_s9  ;;  %2788 = vrot.lane.b32.xlu0 %v8853_v46, %s4375_s10 }
 0x488   : > { %v3054_v2 = vpop.permute.xlu1 %3053  ;;  %v3142_v61 = vpop.permute.xlu0 %3141 }
 0x489   : > { %v3443_v36 = vsel %vm1652_vm11, %v3411_v15, %v3142_v61  ;;  %v3412_v39 = vsel %vm1619_vm10, %v3380_v44, %v3054_v2  ;;  %v8874_v44 = vld [vmem:[#allocation109_spill] sm:$0xff] }
 0x48a   : > { %3073 = vrot.lane.b32.xlu1 %v8854_v22, %s4378_s23  ;;  %3161 = vrot.lane.b32.xlu0 %v6875_v45, %s4379_s28 }
 0x48b   : > { %4262 = vmatprep.mubr.msk.f32.mxu1 %vm1690_vm12, %v3443_v36  ;;  %v8869_v36 = vld [vmem:[#allocation103_spill] sm:$0xff] }
 0x48c   : > { %v2771_v11 = vpop.permute.xlu1 %2770  ;;  %v2870_v5 = vpop.permute.xlu0 %2869 }
 0x48d   : > { %v3318_v46 = vsel %vm1520_vm7, %v3286_v54, %v2771_v11  ;;  %v3225_v11 = vsel %vm1423_vm4, %v8871_v55, %v8870_v56  ;;  %v8888_v56 = vld [vmem:[#allocation128_spill] sm:$0xff]  ;;  %v8889_v55 = vld [vmem:[#allocation149_spill] sm:$0xff] }
 0x48e   : > { %2790 = vrot.lane.b32.xlu1 %v8854_v22, %s4375_s10  ;;  %2889 = vrot.lane.b32.xlu0 %v6875_v45, %s4376_s11  ;;  %v8857_v45 = vld [vmem:[#allocation146_spill] sm:$0xff]  ;;  %v3255_v32 = vsel %vm1455_vm5, %v3225_v11, %v8873_v40 }
 0x48f   : > { %v3223_v21 = vsel %vm1423_vm4, %v8857_v45, %v8856_v52 }
 0x490   : > { %v3144_v60 = vpop.permute.xlu1 %3143  ;;  %v2872_v42 = vpop.permute.xlu0 %2871  ;;  %v3253_v33 = vsel %vm1455_vm5, %v3223_v21, %v8859_v28 }
 0x491   : > { %v3444_v37 = vsel %vm1652_vm11, %v3412_v39, %v3144_v60  ;;  %v3285_v38 = vsel %vm1487_vm6, %v3253_v33, %v8860_v17  ;;  %v3350_v41 = vsel %vm1553_vm8, %v3318_v46, %v2872_v42  ;;  %v3287_v39 = vsel %vm1487_vm6, %v3255_v32, %v8874_v44  ;;  %v8877_v17 = vld [vmem:[#allocation154_spill] sm:$0xff] }
 0x492   : > { %3163 = vrot.lane.b32.xlu1 %v8855_v20, %s4379_s28  ;;  %2891 = vrot.lane.b32.xlu0 %v8855_v20, %s4376_s11  ;;  %v3317_v43 = vsel %vm1520_vm7, %v3285_v38, %v2769_v16  ;;  %v8878_v38 = vld [vmem:[#allocation61_spill] sm:$0xff] }
 0x493   : > { %4263 = vmatmul.mubr.msk.f32.gmra.mrb[8].mxu1 %vm1690_vm12, %v3444_v37  ;;  %v3349_v49 = vsel %vm1553_vm8, %v3317_v43, %v2870_v5  ;;  %v8872_v5 = vld [vmem:[#allocation98_spill] sm:$0xff] }
 0x494   : > { %v2966_v6 = vpop.permute.xlu1 %2965  ;;  %v2968_v25 = vpop.permute.xlu0 %2967 }
 0x495   : > { %v3381_v35 = vsel %vm1586_vm9, %v3349_v49, %v2966_v6  ;;  %v3382_v16 = vsel %vm1586_vm9, %v3350_v41, %v2968_v25  ;;  %v8875_v6 = vld [vmem:[#allocation2_spill] sm:$0xff]  ;;  %v8876_v25 = vld [vmem:[#allocation43_spill] sm:$0xff]  ;;  %v8880_v49 = vld [vmem:[#allocation136_spill] sm:$0xff] }
 0x496   : > { %2985 = vrot.lane.b32.xlu1 %v8858_v63, %s4377_s12  ;;  %2690 = vrot.lane.b32.xlu0 %v8858_v63, %s4374_s9 }
 0x498   : > { %v3056_v53 = vpop.permute.xlu1 %3055  ;;  %v2773_v10 = vpop.permute.xlu0 %2772 }
 0x499   : > { %v3413_v8 = vsel %vm1619_vm10, %v3381_v35, %v3056_v53  ;;  %v3319_v37 = vsel %vm1520_vm7, %v3287_v39, %v2773_v10  ;;  %v3226_v53 = vsel %vm1423_vm4, %v8878_v38, %v8877_v17  ;;  %v8879_v10 = vld [vmem:[#allocation25_spill] sm:$0xff]  ;;  %v8893_v17 = vld [vmem:[#allocation148_spill] sm:$0xff]  ;;  %v8894_v38 = vld [vmem:[#allocation71_spill] sm:$0xff] }
 0x49a   : > { %2987 = vrot.lane.b32.xlu1 %v8861_v1, %s4377_s12  ;;  %3075 = vrot.lane.b32.xlu0 %v8862_v19, %s4378_s23  ;;  %v3256_v43 = vsel %vm1455_vm5, %v3226_v53, %v8879_v10  ;;  %v8890_v39 = vld [vmem:[#allocation73_spill] sm:$0xff] }
 0x49c   : > { %v3058_v13 = vpop.permute.xlu1 %3057  ;;  %v3146_v24 = vpop.permute.xlu0 %3145 }
 0x49d   : > { %v3445_v58 = vsel %vm1652_vm11, %v3413_v8, %v3146_v24  ;;  %v3414_v18 = vsel %vm1619_vm10, %v3382_v16, %v3058_v13 }
 0x49e   : > { %2692 = vrot.lane.b32.xlu1 %v8861_v1, %s4374_s9  ;;  %2792 = vrot.lane.b32.xlu0 %v8862_v19, %s4375_s10  ;;  %v3288_v19 = vsel %vm1487_vm6, %v3256_v43, %v8880_v49 }
 0x49f   : > { %4265 = vmatprep.mubr.msk.f32.mxu1 %vm1690_vm12, %v3445_v58  ;;  %v8881_v58 = vld [vmem:[#allocation99_spill] sm:$0xff] }
 0x4a0   : > { %v2775_v27 = vpop.permute.xlu1 %2774  ;;  %v2874_v48 = vpop.permute.xlu0 %2873 }
 0x4a1   : > { %v3351_v20 = vsel %vm1553_vm8, %v3319_v37, %v2874_v48  ;;  %v3320_v13 = vsel %vm1520_vm7, %v3288_v19, %v2775_v27  ;;  %v8883_v48 = vld [vmem:[#allocation45_spill] sm:$0xff] }
 0x4a2   : > { %3077 = vrot.lane.b32.xlu1 %v8867_v47, %s4378_s23  ;;  %3165 = vrot.lane.b32.xlu0 %v8868_v59, %s4379_s28  ;;  %v8891_v37 = vld [vmem:[#allocation93_spill] sm:$0xff] }
 0x4a4   : > { %v3148_v29 = vpop.permute.xlu1 %3147  ;;  %v2876_v31 = vpop.permute.xlu0 %2875 }
 0x4a5   : > { %v3446_v15 = vsel %vm1652_vm11, %v3414_v18, %v3148_v29  ;;  %v3352_v24 = vsel %vm1553_vm8, %v3320_v13, %v2876_v31  ;;  %v8886_v18 = vld [vmem:[#allocation129_spill] sm:$0xff] }
 0x4a6   : > { %2794 = vrot.lane.b32.xlu1 %v8867_v47, %s4375_s10  ;;  %2893 = vrot.lane.b32.xlu0 %v8868_v59, %s4376_s11  ;;  %v8884_v47 = vld [vmem:[#allocation155_spill] sm:$0xff]  ;;  %v8885_v59 = vld [vmem:[#allocation92_spill] sm:$0xff]  ;;  %v8887_v29 = vld [vmem:[#allocation53_spill] sm:$0xff] }
 0x4a7   : > { %4266 = vmatmul.mubr.msk.f32.gmra.mrb[10].mxu1 %vm1690_vm12, %v3446_v15  ;;  %v3227_v16 = vsel %vm1423_vm4, %v8885_v59, %v8884_v47 }
 0x4a8   : > { %v2970_v2 = vpop.permute.xlu1 %2969  ;;  %v2675_v61 = vpop.permute.xlu0 %2674  ;;  %v3257_v31 = vsel %vm1455_vm5, %v3227_v16, %v8887_v29 }
 0x4a9   : > { %v3383_v52 = vsel %vm1586_vm9, %v3351_v20, %v2970_v2  ;;  %v3289_v15 = vsel %vm1487_vm6, %v3257_v31, %v2675_v61  ;;  %v8892_v20 = vld [vmem:[#allocation77_spill] sm:$0xff]  ;;  %v8901_v31 = vld [vmem:[#allocation106_spill] sm:$0xff] }
 0x4aa   : > { %3167 = vrot.lane.b32.xlu1 %v8869_v36, %s4379_s28  ;;  %2895 = vrot.lane.b32.xlu0 %v8869_v36, %s4376_s11 }
 0x4ac   : > { %v2972_v57 = vpop.permute.xlu1 %2971  ;;  %v3060_v22 = vpop.permute.xlu0 %3059 }
 0x4ad   : > { %v3415_v45 = vsel %vm1619_vm10, %v3383_v52, %v3060_v22  ;;  %v3384_v14 = vsel %vm1586_vm9, %v3352_v24, %v2972_v57 }
 0x4ae   : > { %2989 = vrot.lane.b32.xlu1 %v8872_v5, %s4377_s12  ;;  %2694 = vrot.lane.b32.xlu0 %v8872_v5, %s4374_s9 }
 0x4b0   : > { %v2677_v60 = vpop.permute.xlu1 %2676  ;;  %v2777_v42 = vpop.permute.xlu0 %2776 }
 0x4b1   : > { %v3321_v57 = vsel %vm1520_vm7, %v3289_v15, %v2777_v42  ;;  %v3228_v42 = vsel %vm1423_vm4, %v8891_v37, %v8890_v39  ;;  %v3230_v15 = vsel %vm1423_vm4, %v6512_v7, %v8901_v31  ;;  %v8903_v7 = vld [vmem:[#allocation100_spill] sm:$0xff] }
 0x4b2   : > { %2991 = vrot.lane.b32.xlu1 %v8875_v6, %s4377_s12  ;;  %3079 = vrot.lane.b32.xlu0 %v8876_v25, %s4378_s23 }
 0x4b4   : > { %v3062_v21 = vpop.permute.xlu1 %3061  ;;  %v3150_v28 = vpop.permute.xlu0 %3149 }
 0x4b5   : > { %v3447_v33 = vsel %vm1652_vm11, %v3415_v45, %v3150_v28  ;;  %v3416_v34 = vsel %vm1619_vm10, %v3384_v14, %v3062_v21  ;;  %v8897_v14 = vld [vmem:[#allocation68_spill] sm:$0xff] }
 0x4b6   : > { %2696 = vrot.lane.b32.xlu1 %v8875_v6, %s4374_s9  ;;  %2796 = vrot.lane.b32.xlu0 %v8876_v25, %s4375_s10  ;;  %v3258_v25 = vsel %vm1455_vm5, %v3228_v42, %v8892_v20 }
 0x4b7   : > { %4268 = vmatprep.mubr.msk.f32.mxu1 %vm1690_vm12, %v3447_v33  ;;  %v3290_v52 = vsel %vm1487_vm6, %v3258_v25, %v2677_v60 }
 0x4b8   : > { %v2779_v35 = vpop.permute.xlu1 %2778  ;;  %v2878_v8 = vpop.permute.xlu0 %2877 }
 0x4b9   : > { %v3353_v22 = vsel %vm1553_vm8, %v3321_v57, %v2878_v8  ;;  %v3322_v28 = vsel %vm1520_vm7, %v3290_v52, %v2779_v35  ;;  %v8895_v8 = vld [vmem:[#allocation153_spill] sm:$0xff]  ;;  %v8905_v52 = vld [vmem:[#allocation72_spill] sm:$0xff] }
 0x4ba   : > { %3081 = vrot.lane.b32.xlu1 %v8881_v58, %s4378_s23  ;;  %3169 = vrot.lane.b32.xlu0 %v8882_v62, %s4379_s28 }
 0x4bc   : > { %v3152_v12 = vpop.permute.xlu1 %3151  ;;  %v2880_v26 = vpop.permute.xlu0 %2879 }
 0x4bd   : > { %v3448_v3 = vsel %vm1652_vm11, %v3416_v34, %v3152_v12  ;;  %v3354_v33 = vsel %vm1553_vm8, %v3322_v28, %v2880_v26  ;;  %v8898_v34 = vld [vmem:[#allocation14_spill] sm:$0xff]  ;;  %v8906_v28 = vld [vmem:[#allocation5_spill] sm:$0xff] }
 0x4be   : > { %2798 = vrot.lane.b32.xlu1 %v8881_v58, %s4375_s10  ;;  %2897 = vrot.lane.b32.xlu0 %v8882_v62, %s4376_s11  ;;  %v8896_v58 = vld [vmem:[#allocation74_spill] sm:$0xff] }
 0x4bf   : > { %4269 = vmatmul.mubr.msk.f32.gmra.mrb[12].mxu1 %vm1690_vm12, %v3448_v3  ;;  %v3229_v62 = vsel %vm1423_vm4, %v6515_v23, %v8896_v58  ;;  %v8900_v23 = vld [vmem:[#allocation101_spill] sm:$0xff] }
 0x4c0   : > { %v2974_v54 = vpop.permute.xlu1 %2973  ;;  %v2679_v27 = vpop.permute.xlu0 %2678  ;;  %v3259_v12 = vsel %vm1455_vm5, %v3229_v62, %v8898_v34  ;;  %v8911_v34 = vld [vmem:[#allocation133_spill] sm:$0xff] }
 0x4c1   : > { %v3385_v11 = vsel %vm1586_vm9, %v3353_v22, %v2974_v54  ;;  %v3291_v26 = vsel %vm1487_vm6, %v3259_v12, %v2679_v27  ;;  %v3232_v12 = vsel %vm1423_vm4, %v6537_v0, %v8911_v34  ;;  %v8913_v0 = vld [vmem:[#allocation151_spill] sm:$0xff] }
 0x4c2   : > { %3171 = vrot.lane.b32.xlu1 %v8883_v48, %s4379_s28  ;;  %2899 = vrot.lane.b32.xlu0 %v8883_v48, %s4376_s11  ;;  %v4331_v34 = vld [vmem:[%s4441_s30 + $0x8] sm:$0xff] }
 0x4c4   : > { %v2976_v46 = vpop.permute.xlu1 %2975  ;;  %v3064_v41 = vpop.permute.xlu0 %3063 }
 0x4c5   : > { %v3417_v40 = vsel %vm1619_vm10, %v3385_v11, %v3064_v41  ;;  %v3386_v53 = vsel %vm1586_vm9, %v3354_v33, %v2976_v46  ;;  %v8899_v41 = vld [vmem:[#allocation67_spill] sm:$0xff]  ;;  %v3231_v33 = vsel %vm1423_vm4, %v6540_v30, %v8906_v28  ;;  %v8910_v30 = vld [vmem:[#allocation150_spill] sm:$0xff]  ;;  %v8918_v28 = vld [vmem:[#allocation156_spill] sm:$0xff] }
 0x4c6   : > { %2993 = vrot.lane.b32.xlu1 %v8886_v18, %s4377_s12  ;;  %2698 = vrot.lane.b32.xlu0 %v8886_v18, %s4374_s9 }
 0x4c8   : > { %v2681_v2 = vpop.permute.xlu1 %2680  ;;  %v2781_v36 = vpop.permute.xlu0 %2780 }
 0x4c9   : > { %v3323_v48 = vsel %vm1520_vm7, %v3291_v26, %v2781_v36  ;;  %v8902_v36 = vld [vmem:[#allocation78_spill] sm:$0xff]  ;;  %v8912_v26 = vld [vmem:[#allocation9_spill] sm:$0xff] }
 0x4ca   : > { %2995 = vrot.lane.b32.xlu1 %v8888_v56, %s4377_s12  ;;  %3083 = vrot.lane.b32.xlu0 %v8889_v55, %s4378_s23  ;;  %v3260_v57 = vsel %vm1455_vm5, %v3230_v15, %v8902_v36 }
 0x4cb   : > { %v3292_v22 = vsel %vm1487_vm6, %v3260_v57, %v2681_v2 }
 0x4cc   : > { %v3066_v32 = vpop.permute.xlu1 %3065  ;;  %v3154_v44 = vpop.permute.xlu0 %3153 }
 0x4cd   : > { %v3449_v61 = vsel %vm1652_vm11, %v3417_v40, %v3154_v44  ;;  %v3418_v10 = vsel %vm1619_vm10, %v3386_v53, %v3066_v32  ;;  %v8904_v44 = vld [vmem:[#allocation104_spill] sm:$0xff] }
 0x4ce   : > { %2700 = vrot.lane.b32.xlu1 %v8888_v56, %s4374_s9  ;;  %2800 = vrot.lane.b32.xlu0 %v8889_v55, %s4375_s10 }
 0x4cf   : > { %4271 = vmatprep.mubr.msk.f32.mxu1 %vm1690_vm12, %v3449_v61 }
 0x4d0   : > { %v2783_v45 = vpop.permute.xlu1 %2782  ;;  %v2882_v21 = vpop.permute.xlu0 %2881 }
 0x4d1   : > { %v3355_v46 = vsel %vm1553_vm8, %v3323_v48, %v2882_v21  ;;  %v3324_v40 = vsel %vm1520_vm7, %v3292_v22, %v2783_v45  ;;  %v8915_v22 = vld [vmem:[#allocation70_spill] sm:$0xff] }
 0x4d2   : > { %3085 = vrot.lane.b32.xlu1 %v8893_v17, %s4378_s23  ;;  %3173 = vrot.lane.b32.xlu0 %v8894_v38, %s4379_s28 }
 0x4d4   : > { %v3156_v43 = vpop.permute.xlu1 %3155  ;;  %v2884_v49 = vpop.permute.xlu0 %2883 }
 0x4d5   : > { %v3450_v60 = vsel %vm1652_vm11, %v3418_v10, %v3156_v43  ;;  %v3356_v32 = vsel %vm1553_vm8, %v3324_v40, %v2884_v49  ;;  %v8916_v40 = vld [vmem:[#allocation47_spill] sm:$0xff] }
 0x4d6   : > { %2802 = vrot.lane.b32.xlu1 %v8893_v17, %s4375_s10  ;;  %2901 = vrot.lane.b32.xlu0 %v8894_v38, %s4376_s11  ;;  %v8907_v17 = vld [vmem:[#allocation130_spill] sm:$0xff]  ;;  %v8908_v38 = vld [vmem:[#allocation13_spill] sm:$0xff] }
 0x4d7   : > { %4272 = vmatmul.mubr.msk.f32.gmra.mrb[14].mxu1 %vm1690_vm12, %v3450_v60  ;;  %v3261_v53 = vsel %vm1455_vm5, %v3231_v33, %v8908_v38  ;;  %v3234_v33 = vsel %vm1423_vm4, %v8850_v50, %v8918_v28  ;;  %v7732_v38 = vld [vmem:[%s8059_s6] ss:$0 sm:$0xff]  ;;  %v8923_v28 = vld [vmem:[#allocation160_spill] sm:$0xff] }
 0x4d8   : > { %v2978_v19 = vpop.permute.xlu1 %2977  ;;  %v2683_v35 = vpop.permute.xlu0 %2682 }
 0x4d9   : > { %v3387_v47 = vsel %vm1586_vm9, %v3355_v46, %v2978_v19  ;;  %v3293_v10 = vsel %vm1487_vm6, %v3261_v53, %v2683_v35  ;;  %v8919_v53 = vld [vmem:[#allocation135_spill] sm:$0xff] }
 0x4da   : > { %3175 = vrot.lane.b32.xlu1 %v8895_v8, %s4379_s28  ;;  %2903 = vrot.lane.b32.xlu0 %v8895_v8, %s4376_s11  ;;  %v8909_v8 = vld [vmem:[#allocation44_spill] sm:$0xff] }
 0x4dc   : > { %v2980_v13 = vpop.permute.xlu1 %2979  ;;  %v3068_v24 = vpop.permute.xlu0 %3067 }
 0x4dd   : > { %v3419_v59 = vsel %vm1619_vm10, %v3387_v47, %v3068_v24  ;;  %v3388_v61 = vsel %vm1586_vm9, %v3356_v32, %v2980_v13  ;;  %v3233_v32 = vsel %vm1423_vm4, %v6567_v51, %v8916_v40  ;;  %v7723_v51 = vld [vmem:[%s8058_s5] ss:$0 sm:$0xff] }
 0x4de   : > { %2997 = vrot.lane.b32.xlu1 %v8897_v14, %s4377_s12  ;;  %2702 = vrot.lane.b32.xlu0 %v8897_v14, %s4374_s9 }
 0x4e0   : > { %v2685_v3 = vpop.permute.xlu1 %2684  ;;  %v2785_v54 = vpop.permute.xlu0 %2784 }
 0x4e1   : > { %v3325_v60 = vsel %vm1520_vm7, %v3293_v10, %v2785_v54  ;;  %v3262_v54 = vsel %vm1455_vm5, %v3232_v12, %v8912_v26  ;;  %v3264_v10 = vsel %vm1455_vm5, %v3234_v33, %v8919_v53 }
 0x4e2   : > { %2999 = vrot.lane.b32.xlu1 %v8899_v41, %s4377_s12  ;;  %3087 = vrot.lane.b32.xlu0 %v8900_v23, %s4378_s23  ;;  %v3294_v48 = vsel %vm1487_vm6, %v3262_v54, %v2685_v3 }
 0x4e4   : > { %v3070_v16 = vpop.permute.xlu1 %3069  ;;  %v3158_v29 = vpop.permute.xlu0 %3157 }
 0x4e5   : > { %v3451_v27 = vsel %vm1652_vm11, %v3419_v59, %v3158_v29  ;;  %v3420_v39 = vsel %vm1619_vm10, %v3388_v61, %v3070_v16  ;;  %v8914_v16 = vld [vmem:[#allocation69_spill] sm:$0xff] }
 0x4e6   : > { %2704 = vrot.lane.b32.xlu1 %v8899_v41, %s4374_s9  ;;  %2804 = vrot.lane.b32.xlu0 %v8900_v23, %s4375_s10 }
 0x4e7   : > { %4274 = vmatprep.mubr.msk.f32.mxu1 %vm1690_vm12, %v3451_v27 }
 0x4e8   : > { %v2787_v55 = vpop.permute.xlu1 %2786  ;;  %v2886_v11 = vpop.permute.xlu0 %2885 }
 0x4e9   : > { %v3357_v19 = vsel %vm1553_vm8, %v3325_v60, %v2886_v11  ;;  %v3326_v47 = vsel %vm1520_vm7, %v3294_v48, %v2787_v55 }
 0x4ea   : > { %3089 = vrot.lane.b32.xlu1 %v8903_v7, %s4378_s23  ;;  %3177 = vrot.lane.b32.xlu0 %v8904_v44, %s4379_s28 }
 0x4ec   : > { %v3160_v37 = vpop.permute.xlu1 %3159  ;;  %v2888_v42 = vpop.permute.xlu0 %2887 }
 0x4ed   : > { %v3452_v2 = vsel %vm1652_vm11, %v3420_v39, %v3160_v37  ;;  %v3358_v59 = vsel %vm1553_vm8, %v3326_v47, %v2888_v42 }
 0x4ee   : > { %2806 = vrot.lane.b32.xlu1 %v8903_v7, %s4375_s10  ;;  %2905 = vrot.lane.b32.xlu0 %v8904_v44, %s4376_s11  ;;  %v8917_v7 = vld [vmem:[#allocation10_spill] sm:$0xff] }
 0x4ef   : > { %4275 = vmatmul.mubr.msk.f32.gmra.mrb[16].mxu1 %vm1690_vm12, %v3452_v2  ;;  %v3263_v44 = vsel %vm1455_vm5, %v3233_v32, %v8917_v7 }
 0x4f0   : > { %v2982_v20 = vpop.permute.xlu1 %2981  ;;  %v2687_v25 = vpop.permute.xlu0 %2686 }
 0x4f1   : > { %v3389_v13 = vsel %vm1586_vm9, %v3357_v19, %v2982_v20  ;;  %v3295_v61 = vsel %vm1487_vm6, %v3263_v44, %v2687_v25 }
 0x4f2   : > { %3179 = vrot.lane.b32.xlu1 %v8905_v52, %s4379_s28  ;;  %2907 = vrot.lane.b32.xlu0 %v8905_v52, %s4376_s11 }
 0x4f4   : > { %v2984_v45 = vpop.permute.xlu1 %2983  ;;  %v3072_v21 = vpop.permute.xlu0 %3071 }
 0x4f5   : > { %v3421_v24 = vsel %vm1619_vm10, %v3389_v13, %v3072_v21  ;;  %v3390_v29 = vsel %vm1586_vm9, %v3358_v59, %v2984_v45 }
 0x4f6   : > { %3001 = vrot.lane.b32.xlu1 %v8907_v17, %s4377_s12  ;;  %2706 = vrot.lane.b32.xlu0 %v8907_v17, %s4374_s9 }
 0x4f8   : > { %v2689_v43 = vpop.permute.xlu1 %2688  ;;  %v2789_v49 = vpop.permute.xlu0 %2788 }
 0x4f9   : > { %v3327_v42 = vsel %vm1520_vm7, %v3295_v61, %v2789_v49  ;;  %v3296_v19 = vsel %vm1487_vm6, %v3264_v10, %v2689_v43  ;;  %v4332_v43 = vld [vmem:[%s4441_s30] sm:$0xff] }
 0x4fa   : > { %3003 = vrot.lane.b32.xlu1 %v8909_v8, %s4377_s12  ;;  %3091 = vrot.lane.b32.xlu0 %v8910_v30, %s4378_s23 }
 0x4fc   : > { %v3074_v58 = vpop.permute.xlu1 %3073  ;;  %v3162_v62 = vpop.permute.xlu0 %3161 }
 0x4fd   : > { %v3453_v35 = vsel %vm1652_vm11, %v3421_v24, %v3162_v62  ;;  %v3422_v27 = vsel %vm1619_vm10, %v3390_v29, %v3074_v58 }
 0x4fe   : > { %2708 = vrot.lane.b32.xlu1 %v8909_v8, %s4374_s9  ;;  %2808 = vrot.lane.b32.xlu0 %v8910_v30, %s4375_s10 }
 0x4ff   : > { %4277 = vmatprep.mubr.msk.f32.mxu1 %vm1690_vm12, %v3453_v35 }
 0x500   : > { %v2791_v46 = vpop.permute.xlu1 %2790  ;;  %v2890_v23 = vpop.permute.xlu0 %2889 }
 0x501   : > { %v3359_v2 = vsel %vm1553_vm8, %v3327_v42, %v2890_v23  ;;  %v3328_v13 = vsel %vm1520_vm7, %v3296_v19, %v2791_v46 }
 0x502   : > { %3093 = vrot.lane.b32.xlu1 %v8913_v0, %s4378_s23  ;;  %3181 = vrot.lane.b32.xlu0 %v8914_v16, %s4379_s28 }
 0x504   : > { %v3164_v31 = vpop.permute.xlu1 %3163  ;;  %v2892_v15 = vpop.permute.xlu0 %2891 }
 0x505   : > { %v3454_v3 = vsel %vm1652_vm11, %v3422_v27, %v3164_v31  ;;  %v3360_v58 = vsel %vm1553_vm8, %v3328_v13, %v2892_v15  ;;  %v8920_v31 = vld [vmem:[#allocation157_spill] sm:$0xff] }
 0x506   : > { %2810 = vrot.lane.b32.xlu1 %v8913_v0, %s4375_s10  ;;  %2909 = vrot.lane.b32.xlu0 %v8914_v16, %s4376_s11  ;;  %v3235_v15 = vsel %vm1423_vm4, %v6591_v4, %v8920_v31 }
 0x507   : > { %4278 = vmatmul.mubr.msk.f32.gmra.mrb[18].mxu1 %vm1690_vm12, %v3454_v3  ;;  %v8921_v3 = vld [vmem:[#allocation49_spill] sm:$0xff] }
 0x508   : > { %v2986_v36 = vpop.permute.xlu1 %2985  ;;  %v2691_v57 = vpop.permute.xlu0 %2690 }
 0x509   : > { %v3391_v20 = vsel %vm1586_vm9, %v3359_v2, %v2986_v36  ;;  %v3265_v36 = vsel %vm1455_vm5, %v3235_v15, %v8921_v3 }
 0x50a   : > { %3183 = vrot.lane.b32.xlu1 %v8915_v22, %s4379_s28  ;;  %2911 = vrot.lane.b32.xlu0 %v8915_v22, %s4376_s11  ;;  %v3297_v22 = vsel %vm1487_vm6, %v3265_v36, %v2691_v57 }
 0x50c   : > { %v2988_v55 = vpop.permute.xlu1 %2987  ;;  %v3076_v11 = vpop.permute.xlu0 %3075 }
 0x50d   : > { %v3423_v52 = vsel %vm1619_vm10, %v3391_v20, %v3076_v11  ;;  %v3392_v35 = vsel %vm1586_vm9, %v3360_v58, %v2988_v55 }
 0x510   : > { %v7714_v39 = vpop.permute.xlu1 %2692  ;;  %v2793_v37 = vpop.permute.xlu0 %2792 }
 0x511   : > { %v3329_v40 = vsel %vm1520_vm7, %v3297_v22, %v2793_v37 }
 0x514   : > { %v3078_v45 = vpop.permute.xlu1 %3077  ;;  %v3166_v21 = vpop.permute.xlu0 %3165 }
 0x515   : > { %v3455_v25 = vsel %vm1652_vm11, %v3423_v52, %v3166_v21  ;;  %v3424_v26 = vsel %vm1619_vm10, %v3392_v35, %v3078_v45  ;;  %v8922_v45 = vld [vmem:[#allocation75_spill] sm:$0xff] }
 0x516   : > { %v4252_v17 = vpop.f32.mrb[0].mxu1  ;;  %4280 = vmatprep.mubr.msk.f32.mxu1 %vm1690_vm12, %v3455_v25  ;;  %v3236_v21 = vsel %vm1423_vm4, %v6588_v9, %v8922_v45 }
 0x517   : > { %v3804_v49 = vmul.f32 %v4252_v17, %v7723_v51  ;;  %v3637_v60 = vpop.f32.mrb[1].mxu1  ;;  %v3266_v33 = vsel %vm1455_vm5, %v3236_v21, %v8923_v28  ;;  %v4333_v17 = vld [vmem:[%s4441_s30 + $0x18] sm:$0xff] }
 0x518   : > { %v3803_v50 = vmul.f32 %v7723_v51, %v3637_v60  ;;  %v2795_v8 = vpop.permute.xlu1 %2794  ;;  %v2894_v30 = vpop.permute.xlu0 %2893  ;;  %v3298_v10 = vsel %vm1487_vm6, %v3266_v33, %v7714_v39 }
 0x519   : > { %v3843_v24 = vadd.f32 %v7732_v38, %v3804_v49  ;;  %v3361_v32 = vsel %vm1553_vm8, %v3329_v40, %v2894_v30  ;;  %v4334_v49 = vld [vmem:[%s4441_s30 + $0x10] sm:$0xff]  ;;  %v3330_v9 = vsel %vm1520_vm7, %v3298_v10, %v2795_v8 }
 0x51a   : > { %v3842_v62 = vadd.f32 %v7732_v38, %v3803_v50 }
 0x51b   : > { %v3875_v12 = vadd.f32 %v4331_v34, %v3843_v24 }
 0x51c   : > { %v3874_v54 = vadd.f32 %v4332_v43, %v3842_v62  ;;  %v3168_v48 = vpop.permute.xlu1 %3167  ;;  %v2896_v46 = vpop.permute.xlu0 %2895 }
 0x51d   : > { %v3907_v23 = vmax.f32 %v3875_v12, 0.0  ;;  %v3456_v47 = vsel %vm1652_vm11, %v3424_v26, %v3168_v48  ;;  %v3362_v13 = vsel %vm1553_vm8, %v3330_v9, %v2896_v46 }
 0x51e   : > { %v3906_v59 = vmax.f32 %v3874_v54, 0.0  ;;  %4281 = vmatmul.mubr.msk.f32.gmra.mrb[20].mxu1 %vm1690_vm12, %v3456_v47  ;;  %v8924_v54 = vld [vmem:[#allocation7_spill] sm:$0xff] }
 0x51f   : > { %3939 = vst.msk [vmem:[%s7752_s13 + $0x8] sm:$0xff] %vm1423_vm4, %v3907_v23  ;;  %v3237_v48 = vsel %vm1423_vm4, %v8858_v63, %v8924_v54  ;;  %v8925_v23 = vld [vmem:[#allocation161_spill] sm:$0xff] }
 0x520   : > { %3938 = vst.msk [vmem:[%s7752_s13] sm:$0xff] %vm1423_vm4, %v3906_v59  ;;  %v2990_v0 = vpop.permute.xlu1 %2989  ;;  %v2695_v16 = vpop.permute.xlu0 %2694  ;;  %v3267_v47 = vsel %vm1455_vm5, %v3237_v48, %v8925_v23 }
 0x521   : > { %v3393_v44 = vsel %vm1586_vm9, %v3361_v32, %v2990_v0  ;;  %v4335_v32 = vld [vmem:[%s4441_s30 + $0x28] sm:$0xff] }
 0x524   : > { %v2992_v29 = vpop.permute.xlu1 %2991  ;;  %v3080_v27 = vpop.permute.xlu0 %3079 }
 0x525   : > { %v3425_v42 = vsel %vm1619_vm10, %v3393_v44, %v3080_v27  ;;  %v3394_v58 = vsel %vm1586_vm9, %v3362_v13, %v2992_v29  ;;  %v3299_v29 = vsel %vm1487_vm6, %v3267_v47, %v2695_v16  ;;  %v4336_v44 = vld [vmem:[%s4441_s30 + $0x20] sm:$0xff] }
 0x528   : > { %v7767_v55 = vpop.permute.xlu1 %2696  ;;  %v2797_v11 = vpop.permute.xlu0 %2796 }
 0x529   : > { %v3331_v3 = vsel %vm1520_vm7, %v3299_v29, %v2797_v11 }
 0x52a   : > { %v4255_v7 = vpop.f32.mrb[2].mxu1 }
 0x52b   : > { %v3806_v61 = vmul.f32 %v4255_v7, %v7723_v51  ;;  %v3647_v4 = vpop.f32.mrb[3].mxu1 }
 0x52c   : > { %v3805_v2 = vmul.f32 %v7723_v51, %v3647_v4  ;;  %v3082_v57 = vpop.permute.xlu1 %3081  ;;  %v3170_v20 = vpop.permute.xlu0 %3169 }
 0x52d   : > { %v3845_v52 = vadd.f32 %v7732_v38, %v3806_v61  ;;  %v3457_v37 = vsel %vm1652_vm11, %v3425_v42, %v3170_v20  ;;  %v3426_v62 = vsel %vm1619_vm10, %v3394_v58, %v3082_v57  ;;  %v8926_v57 = vld [vmem:[#allocation76_spill] sm:$0xff] }
 0x52e   : > { %v3844_v25 = vadd.f32 %v7732_v38, %v3805_v2  ;;  %4283 = vmatprep.mubr.msk.f32.mxu1 %vm1690_vm12, %v3457_v37  ;;  %v3238_v20 = vsel %vm1423_vm4, %v8861_v1, %v8926_v57  ;;  %v8927_v37 = vld [vmem:[#allocation176_spill] sm:$0xff] }
 0x52f   : > { %v3877_v53 = vadd.f32 %v4333_v17, %v3845_v52  ;;  %v3268_v45 = vsel %vm1455_vm5, %v3238_v20, %v8927_v37 }
 0x530   : > { %v3876_v60 = vadd.f32 %v4334_v49, %v3844_v25  ;;  %v2799_v19 = vpop.permute.xlu1 %2798  ;;  %v2898_v50 = vpop.permute.xlu0 %2897  ;;  %v3300_v21 = vsel %vm1487_vm6, %v3268_v45, %v7767_v55 }
 0x531   : > { %v3909_v30 = vmax.f32 %v3877_v53, 0.0  ;;  %v3363_v63 = vsel %vm1553_vm8, %v3331_v3, %v2898_v50  ;;  %v3332_v33 = vsel %vm1520_vm7, %v3300_v21, %v2799_v19 }
 0x532   : > { %v3908_v24 = vmax.f32 %v3876_v60, 0.0 }
 0x533   : > { %3941 = vst.msk [vmem:[%s7752_s13 + $0x18] sm:$0xff] %vm1423_vm4, %v3909_v30 }
 0x534   : > { %3940 = vst.msk [vmem:[%s7752_s13 + $0x10] sm:$0xff] %vm1423_vm4, %v3908_v24  ;;  %v3172_v35 = vpop.permute.xlu1 %3171  ;;  %v2900_v39 = vpop.permute.xlu0 %2899 }
 0x535   : > { %v3458_v34 = vsel %vm1652_vm11, %v3426_v62, %v3172_v35  ;;  %v3364_v17 = vsel %vm1553_vm8, %v3332_v33, %v2900_v39  ;;  %v8928_v35 = vld [vmem:[#allocation8_spill] sm:$0xff] }
 0x536   : > { %4284 = vmatmul.mubr.msk.f32.gmra.mrb[22].mxu1 %vm1690_vm12, %v3458_v34  ;;  %v3239_v39 = vsel %vm1423_vm4, %v8872_v5, %v8928_v35 }
 0x538   : > { %v2994_v12 = vpop.permute.xlu1 %2993  ;;  %v2699_v8 = vpop.permute.xlu0 %2698 }
 0x539   : > { %v3395_v40 = vsel %vm1586_vm9, %v3363_v63, %v2994_v12  ;;  %v8929_v12 = vld [vmem:[#allocation11_spill] sm:$0xff] }
 0x53c   : > { %v2996_v26 = vpop.permute.xlu1 %2995  ;;  %v3084_v43 = vpop.permute.xlu0 %3083 }
 0x53d   : > { %v3427_v16 = vsel %vm1619_vm10, %v3395_v40, %v3084_v43  ;;  %v3396_v1 = vsel %vm1586_vm9, %v3364_v17, %v2996_v26  ;;  %v3269_v26 = vsel %vm1455_vm5, %v3239_v39, %v8929_v12  ;;  %v4337_v43 = vld [vmem:[%s4441_s30 + $0x38] sm:$0xff]  ;;  %v8930_v40 = vld [vmem:[#allocation107_spill] sm:$0xff] }
 0x53e   : > { %v4258_v46 = vpop.f32.mrb[4].mxu1  ;;  %v3301_v48 = vsel %vm1487_vm6, %v3269_v26, %v2699_v8  ;;  %v4339_v17 = vld [vmem:[%s4441_s30 + $0x48] sm:$0xff] }
 0x53f   : > { %v3808_v59 = vmul.f32 %v4258_v46, %v7723_v51  ;;  %v3657_v0 = vpop.f32.mrb[5].mxu1  ;;  %v4338_v46 = vld [vmem:[%s4441_s30 + $0x30] sm:$0xff] }
 0x540   : > { %v3807_v27 = vmul.f32 %v7723_v51, %v3657_v0  ;;  %v7806_v31 = vpop.permute.xlu1 %2700  ;;  %v2801_v15 = vpop.permute.xlu0 %2800 }
 0x541   : > { %v3847_v36 = vadd.f32 %v7732_v38, %v3808_v59  ;;  %v3333_v0 = vsel %vm1520_vm7, %v3301_v48, %v2801_v15  ;;  %v3240_v15 = vsel %vm1423_vm4, %v8875_v6, %v8930_v40 }
 0x542   : > { %v3846_v22 = vadd.f32 %v7732_v38, %v3807_v27 }
 0x543   : > { %v3879_v7 = vadd.f32 %v4335_v32, %v3847_v36  ;;  %v8931_v32 = vld [vmem:[#allocation27_spill] sm:$0xff] }
 0x544   : > { %v3878_v61 = vadd.f32 %v4336_v44, %v3846_v22  ;;  %v3086_v4 = vpop.permute.xlu1 %3085  ;;  %v3174_v42 = vpop.permute.xlu0 %3173 }
 0x545   : > { %v3911_v2 = vmax.f32 %v3879_v7, 0.0  ;;  %v3459_v11 = vsel %vm1652_vm11, %v3427_v16, %v3174_v42  ;;  %v3428_v53 = vsel %vm1619_vm10, %v3396_v1, %v3086_v4  ;;  %v3270_v7 = vsel %vm1455_vm5, %v3240_v15, %v8931_v32  ;;  %v8939_v15 = vld [vmem:[#allocation80_spill] sm:$0xff] }
 0x546   : > { %v3910_v52 = vmax.f32 %v3878_v61, 0.0  ;;  %4286 = vmatprep.mubr.msk.f32.mxu1 %vm1690_vm12, %v3459_v11  ;;  %v3302_v16 = vsel %vm1487_vm6, %v3270_v7, %v7806_v31 }
 0x547   : > { %3943 = vst.msk [vmem:[%s7752_s13 + $0x28] sm:$0xff] %vm1423_vm4, %v3911_v2 }
 0x548   : > { %3942 = vst.msk [vmem:[%s7752_s13 + $0x20] sm:$0xff] %vm1423_vm4, %v3910_v52  ;;  %v2803_v25 = vpop.permute.xlu1 %2802  ;;  %v2902_v28 = vpop.permute.xlu0 %2901 }
 0x549   : > { %v3365_v5 = vsel %vm1553_vm8, %v3333_v0, %v2902_v28  ;;  %v3334_v4 = vsel %vm1520_vm7, %v3302_v16, %v2803_v25  ;;  %v8936_v0 = vld [vmem:[#allocation18_spill] sm:$0xff]  ;;  %v8940_v16 = vld [vmem:[#allocation35_spill] sm:$0xff] }
 0x54c   : > { %v3176_v10 = vpop.permute.xlu1 %3175  ;;  %v2904_v49 = vpop.permute.xlu0 %2903 }
 0x54d   : > { %v3460_v60 = vsel %vm1652_vm11, %v3428_v53, %v3176_v10  ;;  %v3366_v42 = vsel %vm1553_vm8, %v3334_v4, %v2904_v49  ;;  %v4340_v53 = vld [vmem:[%s4441_s30 + $0x40] sm:$0xff] }
 0x54e   : > { %4287 = vmatmul.mubr.msk.f32.gmra.mrb[24].mxu1 %vm1690_vm12, %v3460_v60 }
 0x550   : > { %v2998_v55 = vpop.permute.xlu1 %2997  ;;  %v7835_v50 = vpop.permute.xlu0 %2702 }
 0x551   : > { %v3397_v3 = vsel %vm1586_vm9, %v3365_v5, %v2998_v55 }
 0x552   : > { %v4261_v9 = vpop.f32.mrb[6].mxu1 }
 0x553   : > { %v3810_v19 = vmul.f32 %v4261_v9, %v7723_v51  ;;  %v3667_v30 = vpop.f32.mrb[7].mxu1  ;;  %v8932_v9 = vld [vmem:[#allocation6_spill] sm:$0xff] }
 0x554   : > { %v3809_v13 = vmul.f32 %v7723_v51, %v3667_v30  ;;  %v3000_v24 = vpop.permute.xlu1 %2999  ;;  %v3088_v58 = vpop.permute.xlu0 %3087 }
 0x555   : > { %v3849_v62 = vadd.f32 %v7732_v38, %v3810_v19  ;;  %v3429_v36 = vsel %vm1619_vm10, %v3397_v3, %v3088_v58  ;;  %v3398_v2 = vsel %vm1586_vm9, %v3366_v42, %v3000_v24  ;;  %v3241_v19 = vsel %vm1423_vm4, %v8886_v18, %v8932_v9 }
 0x556   : > { %v3848_v34 = vadd.f32 %v7732_v38, %v3809_v13  ;;  %v8933_v13 = vld [vmem:[#allocation28_spill] sm:$0xff] }
 0x557   : > { %v3881_v54 = vadd.f32 %v4337_v43, %v3849_v62  ;;  %v3271_v24 = vsel %vm1455_vm5, %v3241_v19, %v8933_v13 }
 0x558   : > { %v3880_v23 = vadd.f32 %v4338_v46, %v3848_v34  ;;  %v7849_v47 = vpop.permute.xlu1 %2704  ;;  %v2805_v59 = vpop.permute.xlu0 %2804  ;;  %v3303_v58 = vsel %vm1487_vm6, %v3271_v24, %v7835_v50  ;;  %v8935_v46 = vld [vmem:[#allocation134_spill] sm:$0xff] }
 0x559   : > { %v3913_v29 = vmax.f32 %v3881_v54, 0.0  ;;  %v3335_v39 = vsel %vm1520_vm7, %v3303_v58, %v2805_v59  ;;  %v8934_v54 = vld [vmem:[#allocation48_spill] sm:$0xff] }
 0x55a   : > { %v3912_v27 = vmax.f32 %v3880_v23, 0.0  ;;  %v3243_v48 = vsel %vm1423_vm4, %v8897_v14, %v8934_v54  ;;  %v3242_v23 = vsel %vm1423_vm4, %v8888_v56, %v8935_v46 }
 0x55b   : > { %3945 = vst.msk [vmem:[%s7752_s13 + $0x38] sm:$0xff] %vm1423_vm4, %v3913_v29  ;;  %v3273_v59 = vsel %vm1455_vm5, %v3243_v48, %v8936_v0  ;;  %v8937_v29 = vld [vmem:[#allocation79_spill] sm:$0xff] }
 0x55c   : > { %3944 = vst.msk [vmem:[%s7752_s13 + $0x30] sm:$0xff] %vm1423_vm4, %v3912_v27  ;;  %v3090_v8 = vpop.permute.xlu1 %3089  ;;  %v3178_v63 = vpop.permute.xlu0 %3177  ;;  %v3272_v5 = vsel %vm1455_vm5, %v3242_v23, %v8937_v29 }
 0x55d   : > { %v3461_v22 = vsel %vm1652_vm11, %v3429_v36, %v3178_v63  ;;  %v3430_v6 = vsel %vm1619_vm10, %v3398_v2, %v3090_v8  ;;  %v3304_v3 = vsel %vm1487_vm6, %v3272_v5, %v7849_v47  ;;  %v8938_v63 = vld [vmem:[#allocation158_spill] sm:$0xff]  ;;  %v4346_v5 = vld [vmem:[%s4441_s30 + $0x70] sm:$0xff] }
 0x55e   : > { %4289 = vmatprep.mubr.msk.f32.mxu1 %vm1690_vm12, %v3461_v22  ;;  %v3244_v56 = vsel %vm1423_vm4, %v8899_v41, %v8938_v63 }
 0x55f   : > { %v3274_v32 = vsel %vm1455_vm5, %v3244_v56, %v8939_v15  ;;  %v4347_v15 = vld [vmem:[%s4441_s30 + $0x88] sm:$0xff] }
 0x560   : > { %v2807_v44 = vpop.permute.xlu1 %2806  ;;  %v2906_v61 = vpop.permute.xlu0 %2905 }
 0x561   : > { %v3367_v34 = vsel %vm1553_vm8, %v3335_v39, %v2906_v61  ;;  %v3336_v22 = vsel %vm1520_vm7, %v3304_v3, %v2807_v44  ;;  %v8941_v44 = vld [vmem:[#allocation36_spill] sm:$0xff]  ;;  %v4343_v39 = vld [vmem:[%s4441_s30 + $0x68] sm:$0xff] }
 0x564   : > { %v3180_v11 = vpop.permute.xlu1 %3179  ;;  %v2908_v57 = vpop.permute.xlu0 %2907 }
 0x565   : > { %v3462_v20 = vsel %vm1652_vm11, %v3430_v6, %v3180_v11  ;;  %v3368_v7 = vsel %vm1553_vm8, %v3336_v22, %v2908_v57 }
 0x566   : > { %v4264_v52 = vpop.f32.mrb[8].mxu1  ;;  %4290 = vmatmul.mubr.msk.f32.gmra.mrb[26].mxu1 %vm1690_vm12, %v3462_v20 }
 0x567   : > { %v3812_v31 = vmul.f32 %v4264_v52, %v7723_v51  ;;  %v3677_v37 = vpop.f32.mrb[9].mxu1 }
 0x568   : > { %v3811_v45 = vmul.f32 %v7723_v51, %v3677_v37  ;;  %v3002_v21 = vpop.permute.xlu1 %3001  ;;  %v2707_v25 = vpop.permute.xlu0 %2706 }
 0x569   : > { %v3851_v28 = vadd.f32 %v7732_v38, %v3812_v31  ;;  %v3399_v12 = vsel %vm1586_vm9, %v3367_v34, %v3002_v21  ;;  %v3305_v27 = vsel %vm1487_vm6, %v3273_v59, %v2707_v25  ;;  %v4345_v59 = vld [vmem:[%s4441_s30 + $0x78] sm:$0xff] }
 0x56a   : > { %v3850_v33 = vadd.f32 %v7732_v38, %v3811_v45 }
 0x56b   : > { %v3883_v1 = vadd.f32 %v4339_v17, %v3851_v28 }
 0x56c   : > { %v3882_v10 = vadd.f32 %v4340_v53, %v3850_v33  ;;  %v3004_v49 = vpop.permute.xlu1 %3003  ;;  %v3092_v60 = vpop.permute.xlu0 %3091  ;;  %v8942_v33 = vld [vmem:[#allocation39_spill] sm:$0xff] }
 0x56d   : > { %v3915_v55 = vmax.f32 %v3883_v1, 0.0  ;;  %v3431_v18 = vsel %vm1619_vm10, %v3399_v12, %v3092_v60  ;;  %v3400_v4 = vsel %vm1586_vm9, %v3368_v7, %v3004_v49  ;;  %v4341_v1 = vld [vmem:[%s4441_s30 + $0x58] sm:$0xff]  ;;  %v4342_v49 = vld [vmem:[%s4441_s30 + $0x50] sm:$0xff]  ;;  %v4344_v12 = vld [vmem:[%s4441_s30 + $0x60] sm:$0xff] }
 0x56e   : > { %v3914_v30 = vmax.f32 %v3882_v10, 0.0  ;;  %v4348_v7 = vld [vmem:[%s4441_s30 + $0x80] sm:$0xff] }
 0x56f   : > { %3947 = vst.msk [vmem:[%s7752_s13 + $0x48] sm:$0xff] %vm1423_vm4, %v3915_v55 }
 0x570   : > { %3946 = vst.msk [vmem:[%s7752_s13 + $0x40] sm:$0xff] %vm1423_vm4, %v3914_v30  ;;  %v2709_v62 = vpop.permute.xlu1 %2708  ;;  %v2809_v35 = vpop.permute.xlu0 %2808 }
 0x571   : > { %v3337_v14 = vsel %vm1520_vm7, %v3305_v27, %v2809_v35  ;;  %v3306_v42 = vsel %vm1487_vm6, %v3274_v32, %v2709_v62 }
 0x574   : > { %v3094_v26 = vpop.permute.xlu1 %3093  ;;  %v3182_v43 = vpop.permute.xlu0 %3181 }
 0x575   : > { %v3463_v50 = vsel %vm1652_vm11, %v3431_v18, %v3182_v43  ;;  %v3432_v11 = vsel %vm1619_vm10, %v3400_v4, %v3094_v26 }
 0x576   : > { %4292 = vmatprep.mubr.msk.f32.mxu1 %vm1690_vm12, %v3463_v50 }
 0x578   : > { %v2811_v36 = vpop.permute.xlu1 %2810  ;;  %v2910_v8 = vpop.permute.xlu0 %2909 }
 0x579   : > { %v3369_v40 = vsel %vm1553_vm8, %v3337_v14, %v2910_v8  ;;  %v3338_v57 = vsel %vm1520_vm7, %v3306_v42, %v2811_v36 }
 0x57a   : > { %v3401_v47 = vsel %vm1586_vm9, %v3369_v40, %v8940_v16  ;;  %v4267_v61 = vpop.f32.mrb[10].mxu1 }
 0x57b   : > { %v3814_v41 = vmul.f32 %v4267_v61, %v7723_v51  ;;  %v3687_v2 = vpop.f32.mrb[11].mxu1  ;;  %v3433_v6 = vsel %vm1619_vm10, %v3401_v47, %v8941_v44 }
 0x57c   : > { %v3813_v20 = vmul.f32 %v7723_v51, %v3687_v2  ;;  %v3184_v52 = vpop.permute.xlu1 %3183  ;;  %v2912_v31 = vpop.permute.xlu0 %2911  ;;  %v3465_v17 = vsel %vm1652_vm11, %v3433_v6, %v8942_v33 }
 0x57d   : > { %v3853_v37 = vadd.f32 %v7732_v38, %v3814_v41  ;;  %v3464_v45 = vsel %vm1652_vm11, %v3432_v11, %v3184_v52  ;;  %v3370_v21 = vsel %vm1553_vm8, %v3338_v57, %v2912_v31  ;;  %v4349_v11 = vld [vmem:[%s4441_s30 + $0x98] sm:$0xff] }
 0x57e   : > { %v3852_v25 = vadd.f32 %v7732_v38, %v3813_v20  ;;  %v3402_v28 = vsel %vm1586_vm9, %v3370_v21, %v8940_v16  ;;  %4293 = vmatmul.mubr.msk.f32.gmra.mrb[28].mxu1 %vm1690_vm12, %v3464_v45  ;;  %v4350_v20 = vld [vmem:[%s4441_s30 + $0x90] sm:$0xff] }
 0x57f   : > { %v3885_v53 = vadd.f32 %v4341_v1, %v3853_v37  ;;  %4295 = vmatprep.mubr.msk.f32.mxu1 %vm1690_vm12, %v3465_v17  ;;  %v3434_v10 = vsel %vm1619_vm10, %v3402_v28, %v8941_v44  ;;  %v4351_v1 = vld [vmem:[%s4441_s30 + $0xa8] sm:$0xff] }
 0x580   : > { %v3884_v60 = vadd.f32 %v4342_v49, %v3852_v25  ;;  %v3466_v55 = vsel %vm1652_vm11, %v3434_v10, %v8942_v33  ;;  %v4352_v10 = vld [vmem:[%s4441_s30 + $0xa0] sm:$0xff] }
 0x581   : > { %v3917_v9 = vmax.f32 %v3885_v53, 0.0 }
 0x582   : > { %v3916_v19 = vmax.f32 %v3884_v60, 0.0  ;;  %4296 = vmatmul.mubr.msk.f32.gmra.mrb[30].mxu1 %vm1690_vm12, %v3466_v55 }
 0x583   : > { %3949 = vst.msk [vmem:[%s7752_s13 + $0x58] sm:$0xff] %vm1423_vm4, %v3917_v9 }
 0x584   : > { %3948 = vst.msk [vmem:[%s7752_s13 + $0x50] sm:$0xff] %vm1423_vm4, %v3916_v19 }
 0x592   : > { %v4270_v30 = vpop.f32.mrb[12].mxu1 }
 0x593   : > { %v3816_v13 = vmul.f32 %v4270_v30, %v7723_v51  ;;  %v3697_v24 = vpop.f32.mrb[13].mxu1 }
 0x594   : > { %v3815_v58 = vmul.f32 %v7723_v51, %v3697_v24 }
 0x595   : > { %v3855_v62 = vadd.f32 %v7732_v38, %v3816_v13 }
 0x596   : > { %v3854_v35 = vadd.f32 %v7732_v38, %v3815_v58 }
 0x597   : > { %v3887_v34 = vadd.f32 %v4343_v39, %v3855_v62  ;;  %v4353_v62 = vld [vmem:[%s4441_s30 + $0xb8] sm:$0xff]  ;;  %v4354_v39 = vld [vmem:[%s4441_s30 + $0xb0] sm:$0xff] }
 0x598   : > { %v3886_v18 = vadd.f32 %v4344_v12, %v3854_v35 }
 0x599   : > { %v3919_v26 = vmax.f32 %v3887_v34, 0.0 }
 0x59a   : > { %v3918_v43 = vmax.f32 %v3886_v18, 0.0 }
 0x59b   : > { %3951 = vst.msk [vmem:[%s7752_s13 + $0x68] sm:$0xff] %vm1423_vm4, %v3919_v26 }
 0x59c   : > { %3950 = vst.msk [vmem:[%s7752_s13 + $0x60] sm:$0xff] %vm1423_vm4, %v3918_v43 }
 0x5aa   : > { %v4273_v54 = vpop.f32.mrb[14].mxu1 }
 0x5ab   : > { %v3818_v48 = vmul.f32 %v4273_v54, %v7723_v51  ;;  %v3707_v50 = vpop.f32.mrb[15].mxu1 }
 0x5ac   : > { %v3817_v46 = vmul.f32 %v7723_v51, %v3707_v50 }
 0x5ad   : > { %v3857_v23 = vadd.f32 %v7732_v38, %v3818_v48 }
 0x5ae   : > { %v3856_v0 = vadd.f32 %v7732_v38, %v3817_v46 }
 0x5af   : > { %v3889_v29 = vadd.f32 %v4345_v59, %v3857_v23  ;;  %v4355_v23 = vld [vmem:[%s4441_s30 + $0xc8] sm:$0xff]  ;;  %v4356_v59 = vld [vmem:[%s4441_s30 + $0xc0] sm:$0xff] }
 0x5b0   : > { %v3888_v27 = vadd.f32 %v4346_v5, %v3856_v0 }
 0x5b1   : > { %v3921_v3 = vmax.f32 %v3889_v29, 0.0 }
 0x5b2   : > { %v3920_v14 = vmax.f32 %v3888_v27, 0.0 }
 0x5b3   : > { %3953 = vst.msk [vmem:[%s7752_s13 + $0x78] sm:$0xff] %vm1423_vm4, %v3921_v3 }
 0x5b4   : > { %3952 = vst.msk [vmem:[%s7752_s13 + $0x70] sm:$0xff] %vm1423_vm4, %v3920_v14 }
 0x5c2   : > { %v4276_v36 = vpop.f32.mrb[16].mxu1 }
 0x5c3   : > { %v3820_v8 = vmul.f32 %v4276_v36, %v7723_v51  ;;  %v3717_v63 = vpop.f32.mrb[17].mxu1 }
 0x5c4   : > { %v3819_v56 = vmul.f32 %v7723_v51, %v3717_v63 }
 0x5c5   : > { %v3859_v22 = vadd.f32 %v7732_v38, %v3820_v8 }
 0x5c6   : > { %v3858_v40 = vadd.f32 %v7732_v38, %v3819_v56 }
 0x5c7   : > { %v3891_v32 = vadd.f32 %v4347_v15, %v3859_v22  ;;  %v4357_v22 = vld [vmem:[%s4441_s30 + $0xd8] sm:$0xff]  ;;  %v4358_v15 = vld [vmem:[%s4441_s30 + $0xd0] sm:$0xff] }
 0x5c8   : > { %v3890_v16 = vadd.f32 %v4348_v7, %v3858_v40 }
 0x5c9   : > { %v3923_v47 = vmax.f32 %v3891_v32, 0.0 }
 0x5ca   : > { %v3922_v61 = vmax.f32 %v3890_v16, 0.0 }
 0x5cb   : > { %3955 = vst.msk [vmem:[%s7752_s13 + $0x88] sm:$0xff] %vm1423_vm4, %v3923_v47 }
 0x5cc   : > { %3954 = vst.msk [vmem:[%s7752_s13 + $0x80] sm:$0xff] %vm1423_vm4, %v3922_v61 }
 0x5da   : > { %v4279_v4 = vpop.f32.mrb[18].mxu1 }
 0x5db   : > { %v3822_v42 = vmul.f32 %v4279_v4, %v7723_v51  ;;  %v3727_v41 = vpop.f32.mrb[19].mxu1 }
 0x5dc   : > { %v3821_v2 = vmul.f32 %v7723_v51, %v3727_v41 }
 0x5dd   : > { %v3861_v44 = vadd.f32 %v7732_v38, %v3822_v42 }
 0x5de   : > { %v3860_v6 = vadd.f32 %v7732_v38, %v3821_v2 }
 0x5df   : > { %v3893_v57 = vadd.f32 %v4349_v11, %v3861_v44 }
 0x5e0   : > { %v3892_v52 = vadd.f32 %v4350_v20, %v3860_v6  ;;  %v4359_v6 = vld [vmem:[%s4441_s30 + $0xe8] sm:$0xff] }
 0x5e1   : > { %v3925_v31 = vmax.f32 %v3893_v57, 0.0 }
 0x5e2   : > { %v3924_v37 = vmax.f32 %v3892_v52, 0.0  ;;  %v4360_v52 = vld [vmem:[%s4441_s30 + $0xe0] sm:$0xff] }
 0x5e3   : > { %3957 = vst.msk [vmem:[%s7752_s13 + $0x98] sm:$0xff] %vm1423_vm4, %v3925_v31 }
 0x5e4   : > { %3956 = vst.msk [vmem:[%s7752_s13 + $0x90] sm:$0xff] %vm1423_vm4, %v3924_v37 }
 0x5f1   : > { %v4282_v45 = vpop.f32.mrb[20].mxu1 }
 0x5f2   : > { %v3824_v21 = vmul.f32 %v4282_v45, %v7723_v51  ;;  %v3737_v25 = vpop.f32.mrb[21].mxu1 }
 0x5f3   : > { %v3823_v28 = vmul.f32 %v7723_v51, %v3737_v25 }
 0x5f4   : > { %v3863_v33 = vadd.f32 %v7732_v38, %v3824_v21 }
 0x5f5   : > { %v3862_v17 = vadd.f32 %v7732_v38, %v3823_v28 }
 0x5f6   : > { %v3895_v53 = vadd.f32 %v4351_v1, %v3863_v33  ;;  %v4361_v33 = vld [vmem:[%s4441_s30 + $0xf8] sm:$0xff]  ;;  %v4362_v1 = vld [vmem:[%s4441_s30 + $0xf0] sm:$0xff] }
 0x5f7   : > { %v3894_v49 = vadd.f32 %v4352_v10, %v3862_v17 }
 0x5f8   : > { %v3927_v60 = vmax.f32 %v3895_v53, 0.0 }
 0x5f9   : > { %v3926_v55 = vmax.f32 %v3894_v49, 0.0 }
 0x5fa   : > { %3959 = vst.msk [vmem:[%s7752_s13 + $0xa8] sm:$0xff] %vm1423_vm4, %v3927_v60 }
 0x5fb   : > { %3958 = vst.msk [vmem:[%s7752_s13 + $0xa0] sm:$0xff] %vm1423_vm4, %v3926_v55 }
 0x609   : > { %v4285_v9 = vpop.f32.mrb[22].mxu1 }
 0x60a   : > { %v3826_v19 = vmul.f32 %v4285_v9, %v7723_v51  ;;  %v3747_v30 = vpop.f32.mrb[23].mxu1 }
 0x60b   : > { %v3825_v13 = vmul.f32 %v7723_v51, %v3747_v30 }
 0x60c   : > { %v3865_v24 = vadd.f32 %v7732_v38, %v3826_v19 }
 0x60d   : > { %v3864_v58 = vadd.f32 %v7732_v38, %v3825_v13 }
 0x60e   : > { %v3897_v35 = vadd.f32 %v4353_v62, %v3865_v24 }
 0x60f   : > { %v3896_v34 = vadd.f32 %v4354_v39, %v3864_v58 }
 0x610   : > { %v3929_v12 = vmax.f32 %v3897_v35, 0.0 }
 0x611   : > { %v3928_v18 = vmax.f32 %v3896_v34, 0.0 }
 0x612   : > { %3961 = vst.msk [vmem:[%s7752_s13 + $0xb8] sm:$0xff] %vm1423_vm4, %v3929_v12 }
 0x613   : > { %3960 = vst.msk [vmem:[%s7752_s13 + $0xb0] sm:$0xff] %vm1423_vm4, %v3928_v18 }
 0x621   : > { %v4288_v26 = vpop.f32.mrb[24].mxu1 }
 0x622   : > { %v3828_v43 = vmul.f32 %v4288_v26, %v7723_v51  ;;  %v3757_v54 = vpop.f32.mrb[25].mxu1 }
 0x623   : > { %v3827_v48 = vmul.f32 %v7723_v51, %v3757_v54 }
 0x624   : > { %v3867_v50 = vadd.f32 %v7732_v38, %v3828_v43 }
 0x625   : > { %v3866_v46 = vadd.f32 %v7732_v38, %v3827_v48 }
 0x626   : > { %v3899_v0 = vadd.f32 %v4355_v23, %v3867_v50 }
 0x627   : > { %v3898_v29 = vadd.f32 %v4356_v59, %v3866_v46 }
 0x628   : > { %v3931_v5 = vmax.f32 %v3899_v0, 0.0 }
 0x629   : > { %v3930_v27 = vmax.f32 %v3898_v29, 0.0 }
 0x62a   : > { %3963 = vst.msk [vmem:[%s7752_s13 + $0xc8] sm:$0xff] %vm1423_vm4, %v3931_v5 }
 0x62b   : > { %3962 = vst.msk [vmem:[%s7752_s13 + $0xc0] sm:$0xff] %vm1423_vm4, %v3930_v27 }
 0x639   : > { %v4291_v3 = vpop.f32.mrb[26].mxu1 }
 0x63a   : > { %v3830_v14 = vmul.f32 %v4291_v3, %v7723_v51  ;;  %v3767_v36 = vpop.f32.mrb[27].mxu1 }
 0x63b   : > { %v3829_v8 = vmul.f32 %v7723_v51, %v3767_v36 }
 0x63c   : > { %v3869_v63 = vadd.f32 %v7732_v38, %v3830_v14 }
 0x63d   : > { %v3868_v56 = vadd.f32 %v7732_v38, %v3829_v8 }
 0x63e   : > { %v3901_v40 = vadd.f32 %v4357_v22, %v3869_v63 }
 0x63f   : > { %v3900_v32 = vadd.f32 %v4358_v15, %v3868_v56 }
 0x640   : > { %v3933_v7 = vmax.f32 %v3901_v40, 0.0 }
 0x641   : > { %v3932_v16 = vmax.f32 %v3900_v32, 0.0 }
 0x642   : > { %3965 = vst.msk [vmem:[%s7752_s13 + $0xd8] sm:$0xff] %vm1423_vm4, %v3933_v7 }
 0x643   : > { %3964 = vst.msk [vmem:[%s7752_s13 + $0xd0] sm:$0xff] %vm1423_vm4, %v3932_v16 }
 0x651   : > { %v4294_v47 = vpop.f32.mrb[28].mxu1 }
 0x652   : > { %v3832_v61 = vmul.f32 %v4294_v47, %v7723_v51  ;;  %v3777_v4 = vpop.f32.mrb[29].mxu1 }
 0x653   : > { %v3831_v42 = vmul.f32 %v7723_v51, %v3777_v4 }
 0x654   : > { %v3871_v41 = vadd.f32 %v7732_v38, %v3832_v61 }
 0x655   : > { %v3870_v2 = vadd.f32 %v7732_v38, %v3831_v42  ;;  %v4297_v44 = vpop.f32.mrb[30].mxu1 }
 0x656   : > { %v3903_v11 = vadd.f32 %v4359_v6, %v3871_v41  ;;  %v3834_v57 = vmul.f32 %v4297_v44, %v7723_v51  ;;  %v3787_v20 = vpop.f32.mrb[31].mxu1 }
 0x657   : > { %v3902_v31 = vadd.f32 %v4360_v52, %v3870_v2  ;;  %v3833_v37 = vmul.f32 %v7723_v51, %v3787_v20 }
 0x658   : > { %v3935_v45 = vmax.f32 %v3903_v11, 0.0  ;;  %v3873_v21 = vadd.f32 %v7732_v38, %v3834_v57 }
 0x659   : > { %v3934_v25 = vmax.f32 %v3902_v31, 0.0  ;;  %v3872_v28 = vadd.f32 %v7732_v38, %v3833_v37 }
 0x65a   : > { %3967 = vst.msk [vmem:[%s7752_s13 + $0xe8] sm:$0xff] %vm1423_vm4, %v3935_v45  ;;  %v3905_v17 = vadd.f32 %v4361_v33, %v3873_v21 }
 0x65b   : > { %3966 = vst.msk [vmem:[%s7752_s13 + $0xe0] sm:$0xff] %vm1423_vm4, %v3934_v25  ;;  %v3904_v53 = vadd.f32 %v4362_v1, %v3872_v28 }
 0x65c   : > { %v3937_v10 = vmax.f32 %v3905_v17, 0.0 }
 0x65d   : > { %v3936_v49 = vmax.f32 %v3904_v53, 0.0 }
 0x65e   : > { %3969 = vst.msk [vmem:[%s7752_s13 + $0xf8] sm:$0xff] %vm1423_vm4, %v3937_v10 }
 0x65f   : > { %3968 = vst.msk [vmem:[%s7752_s13 + $0xf0] sm:$0xff] %vm1423_vm4, %v3936_v49 }
 0x660 PF: > { %s17_s24 = sadd.s32 1, %s4369_s24  }
 0x661   : > { %p14_p4 = scmp.ge.s32.totalorder %s17_s24, 4  }
 0x663   :  { %16 = sbr.rel (!%p14_p4) target bundleno = 1 (0x1), region = 78 }

</bundles_post_ra>
